<compile_context>
chip_gen: v6e
topology: v6e:2x2x1
jax: 0.10.0
libtpu: 0.0.40
codegen_flags: <defaults>
</compile_context>

<pallas_src>
import functools
import math

import jax
import jax.numpy as jnp
from jax import lax
from jax.experimental import pallas as pl
from jax.experimental.pallas import tpu as pltpu  # noqa: F401  (imported per template)

# ---- hyperparameters (small shapes consistent with the torch module) ----
FEATURE_SIZE = 1000        # nn.Embedding vocab size (as in the reference)
D_MODEL = 32
NHEAD = 4
HEAD_DIM = D_MODEL // NHEAD
NUM_LAYERS = 4
SEQ = 8                    # dim 0 of the input (attention / "sequence" axis for MHA)
BATCH = 2                  # dim 1 of the input (independent axis; reduced by mean(dim=1))
# num_global_tokens / num_random_tokens / window_size are stored but unused in the
# reference forward (dense attention), so they do not appear in the kernel.


# ---------------------------------------------------------------------------
# Fused kernel: all BigBird blocks + final pooling/FC/sigmoid head.
# Activation layout inside the kernel: x is (B*S, D) with rows grouped per batch
# element (row = b*S + s).
# ---------------------------------------------------------------------------
def _bigbird_kernel(x_ref, wq_ref, wk_ref, wv_ref, wo_ref, wff_ref, vec_ref,
                    wfc_ref, bfc_ref, o_ref, *, num_layers, nhead, batch, seq):
    D = x_ref.shape[-1]
    hd = D // nhead
    scale = 1.0 / math.sqrt(hd)

    x = x_ref[...]                                            # (B*S, D)

    for l in range(num_layers):                               # static unroll, 4 layers
        vecs = vec_ref[l]                                     # (8, D) packed per-layer vectors
        bq, bk, bv = vecs[0:1, :], vecs[1:2, :], vecs[2:3, :]
        bo, bff = vecs[3:4, :], vecs[4:5, :]
        gamma, beta = vecs[5:6, :], vecs[6:7, :]              # shared LayerNorm params

        # packed in-projection of nn.MultiheadAttention (q, k, v)
        q = jnp.dot(x, wq_ref[l], preferred_element_type=jnp.float32) + bq
        k = jnp.dot(x, wk_ref[l], preferred_element_type=jnp.float32) + bk
        v = jnp.dot(x, wv_ref[l], preferred_element_type=jnp.float32) + bv

        # dense scaled-dot-product attention, independent per batch element and head.
        # B=2, H=4 -> 8 tiny static-unrolled 2D matmul pairs per layer, all on
        # VMEM-resident values (kept 2D to avoid in-kernel reshape relayouts).
        rows = []
        for b in range(batch):
            r0 = b * seq
            head_outs = []
            for h in range(nhead):
                c0 = h * hd
                qh = q[r0:r0 + seq, c0:c0 + hd] * scale        # (S, hd)
                kh = k[r0:r0 + seq, c0:c0 + hd]
                vh = v[r0:r0 + seq, c0:c0 + hd]
                s = lax.dot_general(qh, kh, (((1,), (1,)), ((), ())),
                                    preferred_element_type=jnp.float32)   # (S, S)
                s = s - jnp.max(s, axis=-1, keepdims=True)
                p = jnp.exp(s)
                p = p * pl.reciprocal(jnp.sum(p, axis=-1, keepdims=True), approx=True)
                head_outs.append(jnp.dot(p, vh, preferred_element_type=jnp.float32))
            rows.append(jnp.concatenate(head_outs, axis=1))    # (S, D)
        attn = jnp.concatenate(rows, axis=0)                   # (B*S, D)
        attn = jnp.dot(attn, wo_ref[l], preferred_element_type=jnp.float32) + bo

        # residual + LayerNorm  (attention dropout is identity at inference)
        h1 = x + attn
        mu1 = jnp.mean(h1, axis=-1, keepdims=True)
        var1 = jnp.mean((h1 - mu1) ** 2, axis=-1, keepdims=True)
        h1 = (h1 - mu1) * lax.rsqrt(var1 + 1e-5) * gamma + beta

        # feed-forward + ReLU + residual + the SAME LayerNorm (shared module in reference)
        ff = jnp.dot(h1, wff_ref[l], preferred_element_type=jnp.float32) + bff
        ff = jnp.maximum(ff, 0.0)
        h2 = h1 + ff
        mu2 = jnp.mean(h2, axis=-1, keepdims=True)
        var2 = jnp.mean((h2 - mu2) ** 2, axis=-1, keepdims=True)
        x = (h2 - mu2) * lax.rsqrt(var2 + 1e-5) * gamma + beta

    # fused head: x.mean(dim=1) in the torch (S,B,D) layout == average over batch elements
    pooled = x[0:seq, :]
    for b in range(1, batch):
        pooled = pooled + x[b * seq:(b + 1) * seq, :]
    pooled = pooled * (1.0 / batch)                            # (S, D)
    logits = jnp.dot(pooled, wfc_ref[...], preferred_element_type=jnp.float32) + bfc_ref[...]
    o_ref[...] = jax.nn.sigmoid(logits)                        # (S, 1)


def bigbird_forward(tokens, params):
    """tokens: (S, B) int32 (seq-first, the layout nn.MultiheadAttention expects). -> (S, 1)"""
    # TODO(synk): embedding gather stays in plain JAX (data-dependent gather; no clean tiny-
    # shape Pallas equivalent); everything downstream runs in the single fused kernel.
    emb = params["embedding"][tokens]                          # (S, B, D)
    x = jnp.transpose(emb, (1, 0, 2)).reshape(BATCH * SEQ, D_MODEL)   # rows grouped per batch

    kernel = functools.partial(_bigbird_kernel, num_layers=NUM_LAYERS, nhead=NHEAD,
                               batch=BATCH, seq=SEQ)
    return pl.pallas_call(
        kernel,
        out_shape=jax.ShapeDtypeStruct((SEQ, 1), jnp.float32),
        # no grid / BlockSpecs: entire problem (~90 KiB of weights + 2 KiB activations)
        # lives in VMEM for the whole call — nothing to pipeline.
    )(x, params["wq_t"], params["wk_t"], params["wv_t"], params["wo_t"],
      params["wff_t"], params["vecs"], params["fc_w_t"], params["fc_b"])


# ---------------------------------------------------------------------------
# Deterministic parameter init (shapes mirror the torch module's __init__).
# Matrices are stored pre-transposed and stacked over layers; all per-layer
# vectors are packed into one (NUM_LAYERS, 8, D) array:
#   rows = [bq, bk, bv, bo, bff, gamma, beta, pad]
# ---------------------------------------------------------------------------
def init_params(key):
    D = D_MODEL
    k_emb, k_w, k_b, k_fc = jax.random.split(key, 4)
    params = {"embedding": jax.random.normal(k_emb, (FEATURE_SIZE, D), jnp.float32) * 0.1}

    wk = jax.random.split(k_w, 5)
    scale = 0.1
    params["wq_t"] = jax.random.normal(wk[0], (NUM_LAYERS, D, D), jnp.float32) * scale
    params["wk_t"] = jax.random.normal(wk[1], (NUM_LAYERS, D, D), jnp.float32) * scale
    params["wv_t"] = jax.random.normal(wk[2], (NUM_LAYERS, D, D), jnp.float32) * scale
    params["wo_t"] = jax.random.normal(wk[3], (NUM_LAYERS, D, D), jnp.float32) * scale
    params["wff_t"] = jax.random.normal(wk[4], (NUM_LAYERS, D, D), jnp.float32) * scale

    bias_rows = jax.random.normal(k_b, (NUM_LAYERS, 5, D), jnp.float32) * 0.01   # bq,bk,bv,bo,bff
    gamma = jnp.ones((NUM_LAYERS, 1, D), jnp.float32)                            # LayerNorm weight
    beta = jnp.zeros((NUM_LAYERS, 1, D), jnp.float32)                            # LayerNorm bias
    pad = jnp.zeros((NUM_LAYERS, 1, D), jnp.float32)                             # sublane padding
    params["vecs"] = jnp.concatenate([bias_rows, gamma, beta, pad], axis=1)      # (L, 8, D)

    w_fc = jax.random.normal(k_fc, (1, D), jnp.float32) * 0.1                    # nn.Linear(D, 1)
    params["fc_w_t"] = w_fc.T                                                    # (D, 1)
    params["fc_b"] = jnp.zeros((1, 1), jnp.float32)
    return params


if __name__ == "__main__":
    root = jax.random.PRNGKey(0)
    pkey, dkey = jax.random.split(root)
    params = init_params(pkey)
    tokens = jax.random.randint(dkey, (SEQ, BATCH), 0, FEATURE_SIZE, dtype=jnp.int32)
    out = bigbird_forward(tokens, params)
    out = jax.block_until_ready(out)
    assert out.shape == (SEQ, 1)
    assert bool(jnp.all(jnp.isfinite(out)))
    assert bool(jnp.all((out >= 0.0) & (out <= 1.0)))   # sigmoid output range
    print("KERNEL_OK")
</pallas_src>

<mosaic_0001>
module attributes {stable_mosaic.version = 11 : i64} {
  func.func @_bigbird_kernel(%arg0: memref<16x32xf32, #tpu.memory_space<vmem>>, %arg1: memref<4x32x32xf32, #tpu.memory_space<vmem>>, %arg2: memref<4x32x32xf32, #tpu.memory_space<vmem>>, %arg3: memref<4x32x32xf32, #tpu.memory_space<vmem>>, %arg4: memref<4x32x32xf32, #tpu.memory_space<vmem>>, %arg5: memref<4x32x32xf32, #tpu.memory_space<vmem>>, %arg6: memref<4x8x32xf32, #tpu.memory_space<vmem>>, %arg7: memref<32x1xf32, #tpu.memory_space<vmem>>, %arg8: memref<1x1xf32, #tpu.memory_space<vmem>>, %arg9: memref<8x1xf32, #tpu.memory_space<vmem>>) attributes {dimension_semantics = [], scalar_prefetch = 0 : i64, scratch_operands = 0 : i64, tpu.core_type = #tpu.core_type<tc>} {
    %c0 = arith.constant 0 : index
    %c0_0 = arith.constant 0 : index
    %0 = vector.load %arg0[%c0, %c0_0] : memref<16x32xf32, #tpu.memory_space<vmem>>, vector<16x32xf32>
    %c0_1 = arith.constant 0 : index
    %c0_2 = arith.constant 0 : index
    %c0_3 = arith.constant 0 : index
    %1 = vector.load %arg6[%c0_1, %c0_2, %c0_3] : memref<4x8x32xf32, #tpu.memory_space<vmem>>, vector<1x8x32xf32>
    %2 = vector.shape_cast %1 : vector<1x8x32xf32> to vector<8x32xf32>
    %3 = vector.extract_strided_slice %2 {offsets = [0, 0], sizes = [1, 32], strides = [1, 1]} : vector<8x32xf32> to vector<1x32xf32>
    %4 = vector.extract_strided_slice %2 {offsets = [1, 0], sizes = [1, 32], strides = [1, 1]} : vector<8x32xf32> to vector<1x32xf32>
    %5 = vector.extract_strided_slice %2 {offsets = [2, 0], sizes = [1, 32], strides = [1, 1]} : vector<8x32xf32> to vector<1x32xf32>
    %6 = vector.extract_strided_slice %2 {offsets = [3, 0], sizes = [1, 32], strides = [1, 1]} : vector<8x32xf32> to vector<1x32xf32>
    %7 = vector.extract_strided_slice %2 {offsets = [4, 0], sizes = [1, 32], strides = [1, 1]} : vector<8x32xf32> to vector<1x32xf32>
    %8 = vector.extract_strided_slice %2 {offsets = [5, 0], sizes = [1, 32], strides = [1, 1]} : vector<8x32xf32> to vector<1x32xf32>
    %9 = vector.extract_strided_slice %2 {offsets = [6, 0], sizes = [1, 32], strides = [1, 1]} : vector<8x32xf32> to vector<1x32xf32>
    %c0_4 = arith.constant 0 : index
    %c0_5 = arith.constant 0 : index
    %c0_6 = arith.constant 0 : index
    %10 = vector.load %arg1[%c0_4, %c0_5, %c0_6] : memref<4x32x32xf32, #tpu.memory_space<vmem>>, vector<1x32x32xf32>
    %11 = vector.shape_cast %10 : vector<1x32x32xf32> to vector<32x32xf32>
    %cst = arith.constant dense<0.000000e+00> : vector<16x32xf32>
    %12 = tpu.matmul %0, %11, %cst {dimension_numbers = #tpu.dot_dimension_numbers<[1], [0], [0], [1], [0, 0, 1, 1], [], []>} : vector<16x32xf32>, vector<32x32xf32>, vector<16x32xf32> -> vector<16x32xf32>
    %13 = vector.broadcast %3 : vector<1x32xf32> to vector<16x32xf32>
    %14 = arith.addf %12, %13 : vector<16x32xf32>
    %c0_7 = arith.constant 0 : index
    %c0_8 = arith.constant 0 : index
    %c0_9 = arith.constant 0 : index
    %15 = vector.load %arg2[%c0_7, %c0_8, %c0_9] : memref<4x32x32xf32, #tpu.memory_space<vmem>>, vector<1x32x32xf32>
    %16 = vector.shape_cast %15 : vector<1x32x32xf32> to vector<32x32xf32>
    %cst_10 = arith.constant dense<0.000000e+00> : vector<16x32xf32>
    %17 = tpu.matmul %0, %16, %cst_10 {dimension_numbers = #tpu.dot_dimension_numbers<[1], [0], [0], [1], [0, 0, 1, 1], [], []>} : vector<16x32xf32>, vector<32x32xf32>, vector<16x32xf32> -> vector<16x32xf32>
    %18 = vector.broadcast %4 : vector<1x32xf32> to vector<16x32xf32>
    %19 = arith.addf %17, %18 : vector<16x32xf32>
    %c0_11 = arith.constant 0 : index
    %c0_12 = arith.constant 0 : index
    %c0_13 = arith.constant 0 : index
    %20 = vector.load %arg3[%c0_11, %c0_12, %c0_13] : memref<4x32x32xf32, #tpu.memory_space<vmem>>, vector<1x32x32xf32>
    %21 = vector.shape_cast %20 : vector<1x32x32xf32> to vector<32x32xf32>
    %cst_14 = arith.constant dense<0.000000e+00> : vector<16x32xf32>
    %22 = tpu.matmul %0, %21, %cst_14 {dimension_numbers = #tpu.dot_dimension_numbers<[1], [0], [0], [1], [0, 0, 1, 1], [], []>} : vector<16x32xf32>, vector<32x32xf32>, vector<16x32xf32> -> vector<16x32xf32>
    %23 = vector.broadcast %5 : vector<1x32xf32> to vector<16x32xf32>
    %24 = arith.addf %22, %23 : vector<16x32xf32>
    %25 = vector.extract_strided_slice %14 {offsets = [0, 0], sizes = [8, 8], strides = [1, 1]} : vector<16x32xf32> to vector<8x8xf32>
    %cst_15 = arith.constant 0.353553385 : f32
    %26 = vector.broadcast %cst_15 : f32 to vector<8x8xf32>
    %27 = arith.mulf %25, %26 : vector<8x8xf32>
    %28 = vector.extract_strided_slice %19 {offsets = [0, 0], sizes = [8, 8], strides = [1, 1]} : vector<16x32xf32> to vector<8x8xf32>
    %29 = vector.extract_strided_slice %24 {offsets = [0, 0], sizes = [8, 8], strides = [1, 1]} : vector<16x32xf32> to vector<8x8xf32>
    %cst_16 = arith.constant dense<0.000000e+00> : vector<8x8xf32>
    %30 = tpu.matmul %27, %28, %cst_16 {dimension_numbers = #tpu.dot_dimension_numbers<[1], [1], [0], [0], [0, 0, 1, 0], [], []>} : vector<8x8xf32>, vector<8x8xf32>, vector<8x8xf32> -> vector<8x8xf32>
    %cst_17 = arith.constant dense<0xFF800000> : vector<8xf32>
    %31 = vector.multi_reduction <maximumf>, %30, %cst_17 [1] : vector<8x8xf32> to vector<8xf32>
    %32 = vector.shape_cast %31 : vector<8xf32> to vector<8x1xf32>
    %33 = vector.broadcast %32 : vector<8x1xf32> to vector<8x8xf32>
    %34 = arith.subf %30, %33 : vector<8x8xf32>
    %35 = math.exp %34 : vector<8x8xf32>
    %cst_18 = arith.constant dense<0.000000e+00> : vector<8xf32>
    %36 = vector.multi_reduction <add>, %35, %cst_18 [1] : vector<8x8xf32> to vector<8xf32>
    %37 = vector.shape_cast %36 : vector<8xf32> to vector<8x1xf32>
    %38 = tpu.reciprocal %37 {approx = true} : vector<8x1xf32> -> vector<8x1xf32>
    %39 = vector.broadcast %38 : vector<8x1xf32> to vector<8x8xf32>
    %40 = arith.mulf %35, %39 : vector<8x8xf32>
    %cst_19 = arith.constant dense<0.000000e+00> : vector<8x8xf32>
    %41 = tpu.matmul %40, %29, %cst_19 {dimension_numbers = #tpu.dot_dimension_numbers<[1], [0], [0], [1], [0, 0, 1, 1], [], []>} : vector<8x8xf32>, vector<8x8xf32>, vector<8x8xf32> -> vector<8x8xf32>
    %42 = vector.extract_strided_slice %14 {offsets = [0, 8], sizes = [8, 8], strides = [1, 1]} : vector<16x32xf32> to vector<8x8xf32>
    %cst_20 = arith.constant 0.353553385 : f32
    %43 = vector.broadcast %cst_20 : f32 to vector<8x8xf32>
    %44 = arith.mulf %42, %43 : vector<8x8xf32>
    %45 = vector.extract_strided_slice %19 {offsets = [0, 8], sizes = [8, 8], strides = [1, 1]} : vector<16x32xf32> to vector<8x8xf32>
    %46 = vector.extract_strided_slice %24 {offsets = [0, 8], sizes = [8, 8], strides = [1, 1]} : vector<16x32xf32> to vector<8x8xf32>
    %cst_21 = arith.constant dense<0.000000e+00> : vector<8x8xf32>
    %47 = tpu.matmul %44, %45, %cst_21 {dimension_numbers = #tpu.dot_dimension_numbers<[1], [1], [0], [0], [0, 0, 1, 0], [], []>} : vector<8x8xf32>, vector<8x8xf32>, vector<8x8xf32> -> vector<8x8xf32>
    %cst_22 = arith.constant dense<0xFF800000> : vector<8xf32>
    %48 = vector.multi_reduction <maximumf>, %47, %cst_22 [1] : vector<8x8xf32> to vector<8xf32>
    %49 = vector.shape_cast %48 : vector<8xf32> to vector<8x1xf32>
    %50 = vector.broadcast %49 : vector<8x1xf32> to vector<8x8xf32>
    %51 = arith.subf %47, %50 : vector<8x8xf32>
    %52 = math.exp %51 : vector<8x8xf32>
    %cst_23 = arith.constant dense<0.000000e+00> : vector<8xf32>
    %53 = vector.multi_reduction <add>, %52, %cst_23 [1] : vector<8x8xf32> to vector<8xf32>
    %54 = vector.shape_cast %53 : vector<8xf32> to vector<8x1xf32>
    %55 = tpu.reciprocal %54 {approx = true} : vector<8x1xf32> -> vector<8x1xf32>
    %56 = vector.broadcast %55 : vector<8x1xf32> to vector<8x8xf32>
    %57 = arith.mulf %52, %56 : vector<8x8xf32>
    %cst_24 = arith.constant dense<0.000000e+00> : vector<8x8xf32>
    %58 = tpu.matmul %57, %46, %cst_24 {dimension_numbers = #tpu.dot_dimension_numbers<[1], [0], [0], [1], [0, 0, 1, 1], [], []>} : vector<8x8xf32>, vector<8x8xf32>, vector<8x8xf32> -> vector<8x8xf32>
    %59 = vector.extract_strided_slice %14 {offsets = [0, 16], sizes = [8, 8], strides = [1, 1]} : vector<16x32xf32> to vector<8x8xf32>
    %cst_25 = arith.constant 0.353553385 : f32
    %60 = vector.broadcast %cst_25 : f32 to vector<8x8xf32>
    %61 = arith.mulf %59, %60 : vector<8x8xf32>
    %62 = vector.extract_strided_slice %19 {offsets = [0, 16], sizes = [8, 8], strides = [1, 1]} : vector<16x32xf32> to vector<8x8xf32>
    %63 = vector.extract_strided_slice %24 {offsets = [0, 16], sizes = [8, 8], strides = [1, 1]} : vector<16x32xf32> to vector<8x8xf32>
    %cst_26 = arith.constant dense<0.000000e+00> : vector<8x8xf32>
    %64 = tpu.matmul %61, %62, %cst_26 {dimension_numbers = #tpu.dot_dimension_numbers<[1], [1], [0], [0], [0, 0, 1, 0], [], []>} : vector<8x8xf32>, vector<8x8xf32>, vector<8x8xf32> -> vector<8x8xf32>
    %cst_27 = arith.constant dense<0xFF800000> : vector<8xf32>
    %65 = vector.multi_reduction <maximumf>, %64, %cst_27 [1] : vector<8x8xf32> to vector<8xf32>
    %66 = vector.shape_cast %65 : vector<8xf32> to vector<8x1xf32>
    %67 = vector.broadcast %66 : vector<8x1xf32> to vector<8x8xf32>
    %68 = arith.subf %64, %67 : vector<8x8xf32>
    %69 = math.exp %68 : vector<8x8xf32>
    %cst_28 = arith.constant dense<0.000000e+00> : vector<8xf32>
    %70 = vector.multi_reduction <add>, %69, %cst_28 [1] : vector<8x8xf32> to vector<8xf32>
    %71 = vector.shape_cast %70 : vector<8xf32> to vector<8x1xf32>
    %72 = tpu.reciprocal %71 {approx = true} : vector<8x1xf32> -> vector<8x1xf32>
    %73 = vector.broadcast %72 : vector<8x1xf32> to vector<8x8xf32>
    %74 = arith.mulf %69, %73 : vector<8x8xf32>
    %cst_29 = arith.constant dense<0.000000e+00> : vector<8x8xf32>
    %75 = tpu.matmul %74, %63, %cst_29 {dimension_numbers = #tpu.dot_dimension_numbers<[1], [0], [0], [1], [0, 0, 1, 1], [], []>} : vector<8x8xf32>, vector<8x8xf32>, vector<8x8xf32> -> vector<8x8xf32>
    %76 = vector.extract_strided_slice %14 {offsets = [0, 24], sizes = [8, 8], strides = [1, 1]} : vector<16x32xf32> to vector<8x8xf32>
    %cst_30 = arith.constant 0.353553385 : f32
    %77 = vector.broadcast %cst_30 : f32 to vector<8x8xf32>
    %78 = arith.mulf %76, %77 : vector<8x8xf32>
    %79 = vector.extract_strided_slice %19 {offsets = [0, 24], sizes = [8, 8], strides = [1, 1]} : vector<16x32xf32> to vector<8x8xf32>
    %80 = vector.extract_strided_slice %24 {offsets = [0, 24], sizes = [8, 8], strides = [1, 1]} : vector<16x32xf32> to vector<8x8xf32>
    %cst_31 = arith.constant dense<0.000000e+00> : vector<8x8xf32>
    %81 = tpu.matmul %78, %79, %cst_31 {dimension_numbers = #tpu.dot_dimension_numbers<[1], [1], [0], [0], [0, 0, 1, 0], [], []>} : vector<8x8xf32>, vector<8x8xf32>, vector<8x8xf32> -> vector<8x8xf32>
    %cst_32 = arith.constant dense<0xFF800000> : vector<8xf32>
    %82 = vector.multi_reduction <maximumf>, %81, %cst_32 [1] : vector<8x8xf32> to vector<8xf32>
    %83 = vector.shape_cast %82 : vector<8xf32> to vector<8x1xf32>
    %84 = vector.broadcast %83 : vector<8x1xf32> to vector<8x8xf32>
    %85 = arith.subf %81, %84 : vector<8x8xf32>
    %86 = math.exp %85 : vector<8x8xf32>
    %cst_33 = arith.constant dense<0.000000e+00> : vector<8xf32>
    %87 = vector.multi_reduction <add>, %86, %cst_33 [1] : vector<8x8xf32> to vector<8xf32>
    %88 = vector.shape_cast %87 : vector<8xf32> to vector<8x1xf32>
    %89 = tpu.reciprocal %88 {approx = true} : vector<8x1xf32> -> vector<8x1xf32>
    %90 = vector.broadcast %89 : vector<8x1xf32> to vector<8x8xf32>
    %91 = arith.mulf %86, %90 : vector<8x8xf32>
    %cst_34 = arith.constant dense<0.000000e+00> : vector<8x8xf32>
    %92 = tpu.matmul %91, %80, %cst_34 {dimension_numbers = #tpu.dot_dimension_numbers<[1], [0], [0], [1], [0, 0, 1, 1], [], []>} : vector<8x8xf32>, vector<8x8xf32>, vector<8x8xf32> -> vector<8x8xf32>
    %93 = tpu.concatenate %41, %58, %75, %92 in 1 : vector<8x8xf32>, vector<8x8xf32>, vector<8x8xf32>, vector<8x8xf32> -> vector<8x32xf32>
    %94 = vector.extract_strided_slice %14 {offsets = [8, 0], sizes = [8, 8], strides = [1, 1]} : vector<16x32xf32> to vector<8x8xf32>
    %cst_35 = arith.constant 0.353553385 : f32
    %95 = vector.broadcast %cst_35 : f32 to vector<8x8xf32>
    %96 = arith.mulf %94, %95 : vector<8x8xf32>
    %97 = vector.extract_strided_slice %19 {offsets = [8, 0], sizes = [8, 8], strides = [1, 1]} : vector<16x32xf32> to vector<8x8xf32>
    %98 = vector.extract_strided_slice %24 {offsets = [8, 0], sizes = [8, 8], strides = [1, 1]} : vector<16x32xf32> to vector<8x8xf32>
    %cst_36 = arith.constant dense<0.000000e+00> : vector<8x8xf32>
    %99 = tpu.matmul %96, %97, %cst_36 {dimension_numbers = #tpu.dot_dimension_numbers<[1], [1], [0], [0], [0, 0, 1, 0], [], []>} : vector<8x8xf32>, vector<8x8xf32>, vector<8x8xf32> -> vector<8x8xf32>
    %cst_37 = arith.constant dense<0xFF800000> : vector<8xf32>
    %100 = vector.multi_reduction <maximumf>, %99, %cst_37 [1] : vector<8x8xf32> to vector<8xf32>
    %101 = vector.shape_cast %100 : vector<8xf32> to vector<8x1xf32>
    %102 = vector.broadcast %101 : vector<8x1xf32> to vector<8x8xf32>
    %103 = arith.subf %99, %102 : vector<8x8xf32>
    %104 = math.exp %103 : vector<8x8xf32>
    %cst_38 = arith.constant dense<0.000000e+00> : vector<8xf32>
    %105 = vector.multi_reduction <add>, %104, %cst_38 [1] : vector<8x8xf32> to vector<8xf32>
    %106 = vector.shape_cast %105 : vector<8xf32> to vector<8x1xf32>
    %107 = tpu.reciprocal %106 {approx = true} : vector<8x1xf32> -> vector<8x1xf32>
    %108 = vector.broadcast %107 : vector<8x1xf32> to vector<8x8xf32>
    %109 = arith.mulf %104, %108 : vector<8x8xf32>
    %cst_39 = arith.constant dense<0.000000e+00> : vector<8x8xf32>
    %110 = tpu.matmul %109, %98, %cst_39 {dimension_numbers = #tpu.dot_dimension_numbers<[1], [0], [0], [1], [0, 0, 1, 1], [], []>} : vector<8x8xf32>, vector<8x8xf32>, vector<8x8xf32> -> vector<8x8xf32>
    %111 = vector.extract_strided_slice %14 {offsets = [8, 8], sizes = [8, 8], strides = [1, 1]} : vector<16x32xf32> to vector<8x8xf32>
    %cst_40 = arith.constant 0.353553385 : f32
    %112 = vector.broadcast %cst_40 : f32 to vector<8x8xf32>
    %113 = arith.mulf %111, %112 : vector<8x8xf32>
    %114 = vector.extract_strided_slice %19 {offsets = [8, 8], sizes = [8, 8], strides = [1, 1]} : vector<16x32xf32> to vector<8x8xf32>
    %115 = vector.extract_strided_slice %24 {offsets = [8, 8], sizes = [8, 8], strides = [1, 1]} : vector<16x32xf32> to vector<8x8xf32>
    %cst_41 = arith.constant dense<0.000000e+00> : vector<8x8xf32>
    %116 = tpu.matmul %113, %114, %cst_41 {dimension_numbers = #tpu.dot_dimension_numbers<[1], [1], [0], [0], [0, 0, 1, 0], [], []>} : vector<8x8xf32>, vector<8x8xf32>, vector<8x8xf32> -> vector<8x8xf32>
    %cst_42 = arith.constant dense<0xFF800000> : vector<8xf32>
    %117 = vector.multi_reduction <maximumf>, %116, %cst_42 [1] : vector<8x8xf32> to vector<8xf32>
    %118 = vector.shape_cast %117 : vector<8xf32> to vector<8x1xf32>
    %119 = vector.broadcast %118 : vector<8x1xf32> to vector<8x8xf32>
    %120 = arith.subf %116, %119 : vector<8x8xf32>
    %121 = math.exp %120 : vector<8x8xf32>
    %cst_43 = arith.constant dense<0.000000e+00> : vector<8xf32>
    %122 = vector.multi_reduction <add>, %121, %cst_43 [1] : vector<8x8xf32> to vector<8xf32>
    %123 = vector.shape_cast %122 : vector<8xf32> to vector<8x1xf32>
    %124 = tpu.reciprocal %123 {approx = true} : vector<8x1xf32> -> vector<8x1xf32>
    %125 = vector.broadcast %124 : vector<8x1xf32> to vector<8x8xf32>
    %126 = arith.mulf %121, %125 : vector<8x8xf32>
    %cst_44 = arith.constant dense<0.000000e+00> : vector<8x8xf32>
    %127 = tpu.matmul %126, %115, %cst_44 {dimension_numbers = #tpu.dot_dimension_numbers<[1], [0], [0], [1], [0, 0, 1, 1], [], []>} : vector<8x8xf32>, vector<8x8xf32>, vector<8x8xf32> -> vector<8x8xf32>
    %128 = vector.extract_strided_slice %14 {offsets = [8, 16], sizes = [8, 8], strides = [1, 1]} : vector<16x32xf32> to vector<8x8xf32>
    %cst_45 = arith.constant 0.353553385 : f32
    %129 = vector.broadcast %cst_45 : f32 to vector<8x8xf32>
    %130 = arith.mulf %128, %129 : vector<8x8xf32>
    %131 = vector.extract_strided_slice %19 {offsets = [8, 16], sizes = [8, 8], strides = [1, 1]} : vector<16x32xf32> to vector<8x8xf32>
    %132 = vector.extract_strided_slice %24 {offsets = [8, 16], sizes = [8, 8], strides = [1, 1]} : vector<16x32xf32> to vector<8x8xf32>
    %cst_46 = arith.constant dense<0.000000e+00> : vector<8x8xf32>
    %133 = tpu.matmul %130, %131, %cst_46 {dimension_numbers = #tpu.dot_dimension_numbers<[1], [1], [0], [0], [0, 0, 1, 0], [], []>} : vector<8x8xf32>, vector<8x8xf32>, vector<8x8xf32> -> vector<8x8xf32>
    %cst_47 = arith.constant dense<0xFF800000> : vector<8xf32>
    %134 = vector.multi_reduction <maximumf>, %133, %cst_47 [1] : vector<8x8xf32> to vector<8xf32>
    %135 = vector.shape_cast %134 : vector<8xf32> to vector<8x1xf32>
    %136 = vector.broadcast %135 : vector<8x1xf32> to vector<8x8xf32>
    %137 = arith.subf %133, %136 : vector<8x8xf32>
    %138 = math.exp %137 : vector<8x8xf32>
    %cst_48 = arith.constant dense<0.000000e+00> : vector<8xf32>
    %139 = vector.multi_reduction <add>, %138, %cst_48 [1] : vector<8x8xf32> to vector<8xf32>
    %140 = vector.shape_cast %139 : vector<8xf32> to vector<8x1xf32>
    %141 = tpu.reciprocal %140 {approx = true} : vector<8x1xf32> -> vector<8x1xf32>
    %142 = vector.broadcast %141 : vector<8x1xf32> to vector<8x8xf32>
    %143 = arith.mulf %138, %142 : vector<8x8xf32>
    %cst_49 = arith.constant dense<0.000000e+00> : vector<8x8xf32>
    %144 = tpu.matmul %143, %132, %cst_49 {dimension_numbers = #tpu.dot_dimension_numbers<[1], [0], [0], [1], [0, 0, 1, 1], [], []>} : vector<8x8xf32>, vector<8x8xf32>, vector<8x8xf32> -> vector<8x8xf32>
    %145 = vector.extract_strided_slice %14 {offsets = [8, 24], sizes = [8, 8], strides = [1, 1]} : vector<16x32xf32> to vector<8x8xf32>
    %cst_50 = arith.constant 0.353553385 : f32
    %146 = vector.broadcast %cst_50 : f32 to vector<8x8xf32>
    %147 = arith.mulf %145, %146 : vector<8x8xf32>
    %148 = vector.extract_strided_slice %19 {offsets = [8, 24], sizes = [8, 8], strides = [1, 1]} : vector<16x32xf32> to vector<8x8xf32>
    %149 = vector.extract_strided_slice %24 {offsets = [8, 24], sizes = [8, 8], strides = [1, 1]} : vector<16x32xf32> to vector<8x8xf32>
    %cst_51 = arith.constant dense<0.000000e+00> : vector<8x8xf32>
    %150 = tpu.matmul %147, %148, %cst_51 {dimension_numbers = #tpu.dot_dimension_numbers<[1], [1], [0], [0], [0, 0, 1, 0], [], []>} : vector<8x8xf32>, vector<8x8xf32>, vector<8x8xf32> -> vector<8x8xf32>
    %cst_52 = arith.constant dense<0xFF800000> : vector<8xf32>
    %151 = vector.multi_reduction <maximumf>, %150, %cst_52 [1] : vector<8x8xf32> to vector<8xf32>
    %152 = vector.shape_cast %151 : vector<8xf32> to vector<8x1xf32>
    %153 = vector.broadcast %152 : vector<8x1xf32> to vector<8x8xf32>
    %154 = arith.subf %150, %153 : vector<8x8xf32>
    %155 = math.exp %154 : vector<8x8xf32>
    %cst_53 = arith.constant dense<0.000000e+00> : vector<8xf32>
    %156 = vector.multi_reduction <add>, %155, %cst_53 [1] : vector<8x8xf32> to vector<8xf32>
    %157 = vector.shape_cast %156 : vector<8xf32> to vector<8x1xf32>
    %158 = tpu.reciprocal %157 {approx = true} : vector<8x1xf32> -> vector<8x1xf32>
    %159 = vector.broadcast %158 : vector<8x1xf32> to vector<8x8xf32>
    %160 = arith.mulf %155, %159 : vector<8x8xf32>
    %cst_54 = arith.constant dense<0.000000e+00> : vector<8x8xf32>
    %161 = tpu.matmul %160, %149, %cst_54 {dimension_numbers = #tpu.dot_dimension_numbers<[1], [0], [0], [1], [0, 0, 1, 1], [], []>} : vector<8x8xf32>, vector<8x8xf32>, vector<8x8xf32> -> vector<8x8xf32>
    %162 = tpu.concatenate %110, %127, %144, %161 in 1 : vector<8x8xf32>, vector<8x8xf32>, vector<8x8xf32>, vector<8x8xf32> -> vector<8x32xf32>
    %163 = tpu.concatenate %93, %162 in 0 : vector<8x32xf32>, vector<8x32xf32> -> vector<16x32xf32>
    %c0_55 = arith.constant 0 : index
    %c0_56 = arith.constant 0 : index
    %c0_57 = arith.constant 0 : index
    %164 = vector.load %arg4[%c0_55, %c0_56, %c0_57] : memref<4x32x32xf32, #tpu.memory_space<vmem>>, vector<1x32x32xf32>
    %165 = vector.shape_cast %164 : vector<1x32x32xf32> to vector<32x32xf32>
    %cst_58 = arith.constant dense<0.000000e+00> : vector<16x32xf32>
    %166 = tpu.matmul %163, %165, %cst_58 {dimension_numbers = #tpu.dot_dimension_numbers<[1], [0], [0], [1], [0, 0, 1, 1], [], []>} : vector<16x32xf32>, vector<32x32xf32>, vector<16x32xf32> -> vector<16x32xf32>
    %167 = vector.broadcast %6 : vector<1x32xf32> to vector<16x32xf32>
    %168 = arith.addf %166, %167 : vector<16x32xf32>
    %169 = arith.addf %0, %168 : vector<16x32xf32>
    %cst_59 = arith.constant dense<0.000000e+00> : vector<16xf32>
    %170 = vector.multi_reduction <add>, %169, %cst_59 [1] : vector<16x32xf32> to vector<16xf32>
    %171 = vector.shape_cast %170 : vector<16xf32> to vector<16x1xf32>
    %cst_60 = arith.constant 3.200000e+01 : f32
    %172 = vector.broadcast %cst_60 : f32 to vector<16x1xf32>
    %173 = arith.divf %171, %172 : vector<16x1xf32>
    %174 = vector.broadcast %173 : vector<16x1xf32> to vector<16x32xf32>
    %175 = arith.subf %169, %174 : vector<16x32xf32>
    %176 = arith.mulf %175, %175 : vector<16x32xf32>
    %cst_61 = arith.constant dense<0.000000e+00> : vector<16xf32>
    %177 = vector.multi_reduction <add>, %176, %cst_61 [1] : vector<16x32xf32> to vector<16xf32>
    %178 = vector.shape_cast %177 : vector<16xf32> to vector<16x1xf32>
    %cst_62 = arith.constant 3.200000e+01 : f32
    %179 = vector.broadcast %cst_62 : f32 to vector<16x1xf32>
    %180 = arith.divf %178, %179 : vector<16x1xf32>
    %181 = vector.broadcast %173 : vector<16x1xf32> to vector<16x32xf32>
    %182 = arith.subf %169, %181 : vector<16x32xf32>
    %cst_63 = arith.constant 9.99999974E-6 : f32
    %183 = vector.broadcast %cst_63 : f32 to vector<16x1xf32>
    %184 = arith.addf %180, %183 : vector<16x1xf32>
    %185 = math.rsqrt %184 : vector<16x1xf32>
    %186 = vector.broadcast %185 : vector<16x1xf32> to vector<16x32xf32>
    %187 = arith.mulf %182, %186 : vector<16x32xf32>
    %188 = vector.broadcast %8 : vector<1x32xf32> to vector<16x32xf32>
    %189 = arith.mulf %187, %188 : vector<16x32xf32>
    %190 = vector.broadcast %9 : vector<1x32xf32> to vector<16x32xf32>
    %191 = arith.addf %189, %190 : vector<16x32xf32>
    %c0_64 = arith.constant 0 : index
    %c0_65 = arith.constant 0 : index
    %c0_66 = arith.constant 0 : index
    %192 = vector.load %arg5[%c0_64, %c0_65, %c0_66] : memref<4x32x32xf32, #tpu.memory_space<vmem>>, vector<1x32x32xf32>
    %193 = vector.shape_cast %192 : vector<1x32x32xf32> to vector<32x32xf32>
    %cst_67 = arith.constant dense<0.000000e+00> : vector<16x32xf32>
    %194 = tpu.matmul %191, %193, %cst_67 {dimension_numbers = #tpu.dot_dimension_numbers<[1], [0], [0], [1], [0, 0, 1, 1], [], []>} : vector<16x32xf32>, vector<32x32xf32>, vector<16x32xf32> -> vector<16x32xf32>
    %195 = vector.broadcast %7 : vector<1x32xf32> to vector<16x32xf32>
    %196 = arith.addf %194, %195 : vector<16x32xf32>
    %cst_68 = arith.constant 0.000000e+00 : f32
    %197 = vector.broadcast %cst_68 : f32 to vector<16x32xf32>
    %198 = arith.maximumf %196, %197 : vector<16x32xf32>
    %199 = arith.addf %191, %198 : vector<16x32xf32>
    %cst_69 = arith.constant dense<0.000000e+00> : vector<16xf32>
    %200 = vector.multi_reduction <add>, %199, %cst_69 [1] : vector<16x32xf32> to vector<16xf32>
    %201 = vector.shape_cast %200 : vector<16xf32> to vector<16x1xf32>
    %cst_70 = arith.constant 3.200000e+01 : f32
    %202 = vector.broadcast %cst_70 : f32 to vector<16x1xf32>
    %203 = arith.divf %201, %202 : vector<16x1xf32>
    %204 = vector.broadcast %203 : vector<16x1xf32> to vector<16x32xf32>
    %205 = arith.subf %199, %204 : vector<16x32xf32>
    %206 = arith.mulf %205, %205 : vector<16x32xf32>
    %cst_71 = arith.constant dense<0.000000e+00> : vector<16xf32>
    %207 = vector.multi_reduction <add>, %206, %cst_71 [1] : vector<16x32xf32> to vector<16xf32>
    %208 = vector.shape_cast %207 : vector<16xf32> to vector<16x1xf32>
    %cst_72 = arith.constant 3.200000e+01 : f32
    %209 = vector.broadcast %cst_72 : f32 to vector<16x1xf32>
    %210 = arith.divf %208, %209 : vector<16x1xf32>
    %211 = vector.broadcast %203 : vector<16x1xf32> to vector<16x32xf32>
    %212 = arith.subf %199, %211 : vector<16x32xf32>
    %cst_73 = arith.constant 9.99999974E-6 : f32
    %213 = vector.broadcast %cst_73 : f32 to vector<16x1xf32>
    %214 = arith.addf %210, %213 : vector<16x1xf32>
    %215 = math.rsqrt %214 : vector<16x1xf32>
    %216 = vector.broadcast %215 : vector<16x1xf32> to vector<16x32xf32>
    %217 = arith.mulf %212, %216 : vector<16x32xf32>
    %218 = vector.broadcast %8 : vector<1x32xf32> to vector<16x32xf32>
    %219 = arith.mulf %217, %218 : vector<16x32xf32>
    %220 = vector.broadcast %9 : vector<1x32xf32> to vector<16x32xf32>
    %221 = arith.addf %219, %220 : vector<16x32xf32>
    %c1 = arith.constant 1 : index
    %c0_74 = arith.constant 0 : index
    %c0_75 = arith.constant 0 : index
    %222 = vector.load %arg6[%c1, %c0_74, %c0_75] : memref<4x8x32xf32, #tpu.memory_space<vmem>>, vector<1x8x32xf32>
    %223 = vector.shape_cast %222 : vector<1x8x32xf32> to vector<8x32xf32>
    %224 = vector.extract_strided_slice %223 {offsets = [0, 0], sizes = [1, 32], strides = [1, 1]} : vector<8x32xf32> to vector<1x32xf32>
    %225 = vector.extract_strided_slice %223 {offsets = [1, 0], sizes = [1, 32], strides = [1, 1]} : vector<8x32xf32> to vector<1x32xf32>
    %226 = vector.extract_strided_slice %223 {offsets = [2, 0], sizes = [1, 32], strides = [1, 1]} : vector<8x32xf32> to vector<1x32xf32>
    %227 = vector.extract_strided_slice %223 {offsets = [3, 0], sizes = [1, 32], strides = [1, 1]} : vector<8x32xf32> to vector<1x32xf32>
    %228 = vector.extract_strided_slice %223 {offsets = [4, 0], sizes = [1, 32], strides = [1, 1]} : vector<8x32xf32> to vector<1x32xf32>
    %229 = vector.extract_strided_slice %223 {offsets = [5, 0], sizes = [1, 32], strides = [1, 1]} : vector<8x32xf32> to vector<1x32xf32>
    %230 = vector.extract_strided_slice %223 {offsets = [6, 0], sizes = [1, 32], strides = [1, 1]} : vector<8x32xf32> to vector<1x32xf32>
    %c1_76 = arith.constant 1 : index
    %c0_77 = arith.constant 0 : index
    %c0_78 = arith.constant 0 : index
    %231 = vector.load %arg1[%c1_76, %c0_77, %c0_78] : memref<4x32x32xf32, #tpu.memory_space<vmem>>, vector<1x32x32xf32>
    %232 = vector.shape_cast %231 : vector<1x32x32xf32> to vector<32x32xf32>
    %cst_79 = arith.constant dense<0.000000e+00> : vector<16x32xf32>
    %233 = tpu.matmul %221, %232, %cst_79 {dimension_numbers = #tpu.dot_dimension_numbers<[1], [0], [0], [1], [0, 0, 1, 1], [], []>} : vector<16x32xf32>, vector<32x32xf32>, vector<16x32xf32> -> vector<16x32xf32>
    %234 = vector.broadcast %224 : vector<1x32xf32> to vector<16x32xf32>
    %235 = arith.addf %233, %234 : vector<16x32xf32>
    %c1_80 = arith.constant 1 : index
    %c0_81 = arith.constant 0 : index
    %c0_82 = arith.constant 0 : index
    %236 = vector.load %arg2[%c1_80, %c0_81, %c0_82] : memref<4x32x32xf32, #tpu.memory_space<vmem>>, vector<1x32x32xf32>
    %237 = vector.shape_cast %236 : vector<1x32x32xf32> to vector<32x32xf32>
    %cst_83 = arith.constant dense<0.000000e+00> : vector<16x32xf32>
    %238 = tpu.matmul %221, %237, %cst_83 {dimension_numbers = #tpu.dot_dimension_numbers<[1], [0], [0], [1], [0, 0, 1, 1], [], []>} : vector<16x32xf32>, vector<32x32xf32>, vector<16x32xf32> -> vector<16x32xf32>
    %239 = vector.broadcast %225 : vector<1x32xf32> to vector<16x32xf32>
    %240 = arith.addf %238, %239 : vector<16x32xf32>
    %c1_84 = arith.constant 1 : index
    %c0_85 = arith.constant 0 : index
    %c0_86 = arith.constant 0 : index
    %241 = vector.load %arg3[%c1_84, %c0_85, %c0_86] : memref<4x32x32xf32, #tpu.memory_space<vmem>>, vector<1x32x32xf32>
    %242 = vector.shape_cast %241 : vector<1x32x32xf32> to vector<32x32xf32>
    %cst_87 = arith.constant dense<0.000000e+00> : vector<16x32xf32>
    %243 = tpu.matmul %221, %242, %cst_87 {dimension_numbers = #tpu.dot_dimension_numbers<[1], [0], [0], [1], [0, 0, 1, 1], [], []>} : vector<16x32xf32>, vector<32x32xf32>, vector<16x32xf32> -> vector<16x32xf32>
    %244 = vector.broadcast %226 : vector<1x32xf32> to vector<16x32xf32>
    %245 = arith.addf %243, %244 : vector<16x32xf32>
    %246 = vector.extract_strided_slice %235 {offsets = [0, 0], sizes = [8, 8], strides = [1, 1]} : vector<16x32xf32> to vector<8x8xf32>
    %cst_88 = arith.constant 0.353553385 : f32
    %247 = vector.broadcast %cst_88 : f32 to vector<8x8xf32>
    %248 = arith.mulf %246, %247 : vector<8x8xf32>
    %249 = vector.extract_strided_slice %240 {offsets = [0, 0], sizes = [8, 8], strides = [1, 1]} : vector<16x32xf32> to vector<8x8xf32>
    %250 = vector.extract_strided_slice %245 {offsets = [0, 0], sizes = [8, 8], strides = [1, 1]} : vector<16x32xf32> to vector<8x8xf32>
    %cst_89 = arith.constant dense<0.000000e+00> : vector<8x8xf32>
    %251 = tpu.matmul %248, %249, %cst_89 {dimension_numbers = #tpu.dot_dimension_numbers<[1], [1], [0], [0], [0, 0, 1, 0], [], []>} : vector<8x8xf32>, vector<8x8xf32>, vector<8x8xf32> -> vector<8x8xf32>
    %cst_90 = arith.constant dense<0xFF800000> : vector<8xf32>
    %252 = vector.multi_reduction <maximumf>, %251, %cst_90 [1] : vector<8x8xf32> to vector<8xf32>
    %253 = vector.shape_cast %252 : vector<8xf32> to vector<8x1xf32>
    %254 = vector.broadcast %253 : vector<8x1xf32> to vector<8x8xf32>
    %255 = arith.subf %251, %254 : vector<8x8xf32>
    %256 = math.exp %255 : vector<8x8xf32>
    %cst_91 = arith.constant dense<0.000000e+00> : vector<8xf32>
    %257 = vector.multi_reduction <add>, %256, %cst_91 [1] : vector<8x8xf32> to vector<8xf32>
    %258 = vector.shape_cast %257 : vector<8xf32> to vector<8x1xf32>
    %259 = tpu.reciprocal %258 {approx = true} : vector<8x1xf32> -> vector<8x1xf32>
    %260 = vector.broadcast %259 : vector<8x1xf32> to vector<8x8xf32>
    %261 = arith.mulf %256, %260 : vector<8x8xf32>
    %cst_92 = arith.constant dense<0.000000e+00> : vector<8x8xf32>
    %262 = tpu.matmul %261, %250, %cst_92 {dimension_numbers = #tpu.dot_dimension_numbers<[1], [0], [0], [1], [0, 0, 1, 1], [], []>} : vector<8x8xf32>, vector<8x8xf32>, vector<8x8xf32> -> vector<8x8xf32>
    %263 = vector.extract_strided_slice %235 {offsets = [0, 8], sizes = [8, 8], strides = [1, 1]} : vector<16x32xf32> to vector<8x8xf32>
    %cst_93 = arith.constant 0.353553385 : f32
    %264 = vector.broadcast %cst_93 : f32 to vector<8x8xf32>
    %265 = arith.mulf %263, %264 : vector<8x8xf32>
    %266 = vector.extract_strided_slice %240 {offsets = [0, 8], sizes = [8, 8], strides = [1, 1]} : vector<16x32xf32> to vector<8x8xf32>
    %267 = vector.extract_strided_slice %245 {offsets = [0, 8], sizes = [8, 8], strides = [1, 1]} : vector<16x32xf32> to vector<8x8xf32>
    %cst_94 = arith.constant dense<0.000000e+00> : vector<8x8xf32>
    %268 = tpu.matmul %265, %266, %cst_94 {dimension_numbers = #tpu.dot_dimension_numbers<[1], [1], [0], [0], [0, 0, 1, 0], [], []>} : vector<8x8xf32>, vector<8x8xf32>, vector<8x8xf32> -> vector<8x8xf32>
    %cst_95 = arith.constant dense<0xFF800000> : vector<8xf32>
    %269 = vector.multi_reduction <maximumf>, %268, %cst_95 [1] : vector<8x8xf32> to vector<8xf32>
    %270 = vector.shape_cast %269 : vector<8xf32> to vector<8x1xf32>
    %271 = vector.broadcast %270 : vector<8x1xf32> to vector<8x8xf32>
    %272 = arith.subf %268, %271 : vector<8x8xf32>
    %273 = math.exp %272 : vector<8x8xf32>
    %cst_96 = arith.constant dense<0.000000e+00> : vector<8xf32>
    %274 = vector.multi_reduction <add>, %273, %cst_96 [1] : vector<8x8xf32> to vector<8xf32>
    %275 = vector.shape_cast %274 : vector<8xf32> to vector<8x1xf32>
    %276 = tpu.reciprocal %275 {approx = true} : vector<8x1xf32> -> vector<8x1xf32>
    %277 = vector.broadcast %276 : vector<8x1xf32> to vector<8x8xf32>
    %278 = arith.mulf %273, %277 : vector<8x8xf32>
    %cst_97 = arith.constant dense<0.000000e+00> : vector<8x8xf32>
    %279 = tpu.matmul %278, %267, %cst_97 {dimension_numbers = #tpu.dot_dimension_numbers<[1], [0], [0], [1], [0, 0, 1, 1], [], []>} : vector<8x8xf32>, vector<8x8xf32>, vector<8x8xf32> -> vector<8x8xf32>
    %280 = vector.extract_strided_slice %235 {offsets = [0, 16], sizes = [8, 8], strides = [1, 1]} : vector<16x32xf32> to vector<8x8xf32>
    %cst_98 = arith.constant 0.353553385 : f32
    %281 = vector.broadcast %cst_98 : f32 to vector<8x8xf32>
    %282 = arith.mulf %280, %281 : vector<8x8xf32>
    %283 = vector.extract_strided_slice %240 {offsets = [0, 16], sizes = [8, 8], strides = [1, 1]} : vector<16x32xf32> to vector<8x8xf32>
    %284 = vector.extract_strided_slice %245 {offsets = [0, 16], sizes = [8, 8], strides = [1, 1]} : vector<16x32xf32> to vector<8x8xf32>
    %cst_99 = arith.constant dense<0.000000e+00> : vector<8x8xf32>
    %285 = tpu.matmul %282, %283, %cst_99 {dimension_numbers = #tpu.dot_dimension_numbers<[1], [1], [0], [0], [0, 0, 1, 0], [], []>} : vector<8x8xf32>, vector<8x8xf32>, vector<8x8xf32> -> vector<8x8xf32>
    %cst_100 = arith.constant dense<0xFF800000> : vector<8xf32>
    %286 = vector.multi_reduction <maximumf>, %285, %cst_100 [1] : vector<8x8xf32> to vector<8xf32>
    %287 = vector.shape_cast %286 : vector<8xf32> to vector<8x1xf32>
    %288 = vector.broadcast %287 : vector<8x1xf32> to vector<8x8xf32>
    %289 = arith.subf %285, %288 : vector<8x8xf32>
    %290 = math.exp %289 : vector<8x8xf32>
    %cst_101 = arith.constant dense<0.000000e+00> : vector<8xf32>
    %291 = vector.multi_reduction <add>, %290, %cst_101 [1] : vector<8x8xf32> to vector<8xf32>
    %292 = vector.shape_cast %291 : vector<8xf32> to vector<8x1xf32>
    %293 = tpu.reciprocal %292 {approx = true} : vector<8x1xf32> -> vector<8x1xf32>
    %294 = vector.broadcast %293 : vector<8x1xf32> to vector<8x8xf32>
    %295 = arith.mulf %290, %294 : vector<8x8xf32>
    %cst_102 = arith.constant dense<0.000000e+00> : vector<8x8xf32>
    %296 = tpu.matmul %295, %284, %cst_102 {dimension_numbers = #tpu.dot_dimension_numbers<[1], [0], [0], [1], [0, 0, 1, 1], [], []>} : vector<8x8xf32>, vector<8x8xf32>, vector<8x8xf32> -> vector<8x8xf32>
    %297 = vector.extract_strided_slice %235 {offsets = [0, 24], sizes = [8, 8], strides = [1, 1]} : vector<16x32xf32> to vector<8x8xf32>
    %cst_103 = arith.constant 0.353553385 : f32
    %298 = vector.broadcast %cst_103 : f32 to vector<8x8xf32>
    %299 = arith.mulf %297, %298 : vector<8x8xf32>
    %300 = vector.extract_strided_slice %240 {offsets = [0, 24], sizes = [8, 8], strides = [1, 1]} : vector<16x32xf32> to vector<8x8xf32>
    %301 = vector.extract_strided_slice %245 {offsets = [0, 24], sizes = [8, 8], strides = [1, 1]} : vector<16x32xf32> to vector<8x8xf32>
    %cst_104 = arith.constant dense<0.000000e+00> : vector<8x8xf32>
    %302 = tpu.matmul %299, %300, %cst_104 {dimension_numbers = #tpu.dot_dimension_numbers<[1], [1], [0], [0], [0, 0, 1, 0], [], []>} : vector<8x8xf32>, vector<8x8xf32>, vector<8x8xf32> -> vector<8x8xf32>
    %cst_105 = arith.constant dense<0xFF800000> : vector<8xf32>
    %303 = vector.multi_reduction <maximumf>, %302, %cst_105 [1] : vector<8x8xf32> to vector<8xf32>
    %304 = vector.shape_cast %303 : vector<8xf32> to vector<8x1xf32>
    %305 = vector.broadcast %304 : vector<8x1xf32> to vector<8x8xf32>
    %306 = arith.subf %302, %305 : vector<8x8xf32>
    %307 = math.exp %306 : vector<8x8xf32>
    %cst_106 = arith.constant dense<0.000000e+00> : vector<8xf32>
    %308 = vector.multi_reduction <add>, %307, %cst_106 [1] : vector<8x8xf32> to vector<8xf32>
    %309 = vector.shape_cast %308 : vector<8xf32> to vector<8x1xf32>
    %310 = tpu.reciprocal %309 {approx = true} : vector<8x1xf32> -> vector<8x1xf32>
    %311 = vector.broadcast %310 : vector<8x1xf32> to vector<8x8xf32>
    %312 = arith.mulf %307, %311 : vector<8x8xf32>
    %cst_107 = arith.constant dense<0.000000e+00> : vector<8x8xf32>
    %313 = tpu.matmul %312, %301, %cst_107 {dimension_numbers = #tpu.dot_dimension_numbers<[1], [0], [0], [1], [0, 0, 1, 1], [], []>} : vector<8x8xf32>, vector<8x8xf32>, vector<8x8xf32> -> vector<8x8xf32>
    %314 = tpu.concatenate %262, %279, %296, %313 in 1 : vector<8x8xf32>, vector<8x8xf32>, vector<8x8xf32>, vector<8x8xf32> -> vector<8x32xf32>
    %315 = vector.extract_strided_slice %235 {offsets = [8, 0], sizes = [8, 8], strides = [1, 1]} : vector<16x32xf32> to vector<8x8xf32>
    %cst_108 = arith.constant 0.353553385 : f32
    %316 = vector.broadcast %cst_108 : f32 to vector<8x8xf32>
    %317 = arith.mulf %315, %316 : vector<8x8xf32>
    %318 = vector.extract_strided_slice %240 {offsets = [8, 0], sizes = [8, 8], strides = [1, 1]} : vector<16x32xf32> to vector<8x8xf32>
    %319 = vector.extract_strided_slice %245 {offsets = [8, 0], sizes = [8, 8], strides = [1, 1]} : vector<16x32xf32> to vector<8x8xf32>
    %cst_109 = arith.constant dense<0.000000e+00> : vector<8x8xf32>
    %320 = tpu.matmul %317, %318, %cst_109 {dimension_numbers = #tpu.dot_dimension_numbers<[1], [1], [0], [0], [0, 0, 1, 0], [], []>} : vector<8x8xf32>, vector<8x8xf32>, vector<8x8xf32> -> vector<8x8xf32>
    %cst_110 = arith.constant dense<0xFF800000> : vector<8xf32>
    %321 = vector.multi_reduction <maximumf>, %320, %cst_110 [1] : vector<8x8xf32> to vector<8xf32>
    %322 = vector.shape_cast %321 : vector<8xf32> to vector<8x1xf32>
    %323 = vector.broadcast %322 : vector<8x1xf32> to vector<8x8xf32>
    %324 = arith.subf %320, %323 : vector<8x8xf32>
    %325 = math.exp %324 : vector<8x8xf32>
    %cst_111 = arith.constant dense<0.000000e+00> : vector<8xf32>
    %326 = vector.multi_reduction <add>, %325, %cst_111 [1] : vector<8x8xf32> to vector<8xf32>
    %327 = vector.shape_cast %326 : vector<8xf32> to vector<8x1xf32>
    %328 = tpu.reciprocal %327 {approx = true} : vector<8x1xf32> -> vector<8x1xf32>
    %329 = vector.broadcast %328 : vector<8x1xf32> to vector<8x8xf32>
    %330 = arith.mulf %325, %329 : vector<8x8xf32>
    %cst_112 = arith.constant dense<0.000000e+00> : vector<8x8xf32>
    %331 = tpu.matmul %330, %319, %cst_112 {dimension_numbers = #tpu.dot_dimension_numbers<[1], [0], [0], [1], [0, 0, 1, 1], [], []>} : vector<8x8xf32>, vector<8x8xf32>, vector<8x8xf32> -> vector<8x8xf32>
    %332 = vector.extract_strided_slice %235 {offsets = [8, 8], sizes = [8, 8], strides = [1, 1]} : vector<16x32xf32> to vector<8x8xf32>
    %cst_113 = arith.constant 0.353553385 : f32
    %333 = vector.broadcast %cst_113 : f32 to vector<8x8xf32>
    %334 = arith.mulf %332, %333 : vector<8x8xf32>
    %335 = vector.extract_strided_slice %240 {offsets = [8, 8], sizes = [8, 8], strides = [1, 1]} : vector<16x32xf32> to vector<8x8xf32>
    %336 = vector.extract_strided_slice %245 {offsets = [8, 8], sizes = [8, 8], strides = [1, 1]} : vector<16x32xf32> to vector<8x8xf32>
    %cst_114 = arith.constant dense<0.000000e+00> : vector<8x8xf32>
    %337 = tpu.matmul %334, %335, %cst_114 {dimension_numbers = #tpu.dot_dimension_numbers<[1], [1], [0], [0], [0, 0, 1, 0], [], []>} : vector<8x8xf32>, vector<8x8xf32>, vector<8x8xf32> -> vector<8x8xf32>
    %cst_115 = arith.constant dense<0xFF800000> : vector<8xf32>
    %338 = vector.multi_reduction <maximumf>, %337, %cst_115 [1] : vector<8x8xf32> to vector<8xf32>
    %339 = vector.shape_cast %338 : vector<8xf32> to vector<8x1xf32>
    %340 = vector.broadcast %339 : vector<8x1xf32> to vector<8x8xf32>
    %341 = arith.subf %337, %340 : vector<8x8xf32>
    %342 = math.exp %341 : vector<8x8xf32>
    %cst_116 = arith.constant dense<0.000000e+00> : vector<8xf32>
    %343 = vector.multi_reduction <add>, %342, %cst_116 [1] : vector<8x8xf32> to vector<8xf32>
    %344 = vector.shape_cast %343 : vector<8xf32> to vector<8x1xf32>
    %345 = tpu.reciprocal %344 {approx = true} : vector<8x1xf32> -> vector<8x1xf32>
    %346 = vector.broadcast %345 : vector<8x1xf32> to vector<8x8xf32>
    %347 = arith.mulf %342, %346 : vector<8x8xf32>
    %cst_117 = arith.constant dense<0.000000e+00> : vector<8x8xf32>
    %348 = tpu.matmul %347, %336, %cst_117 {dimension_numbers = #tpu.dot_dimension_numbers<[1], [0], [0], [1], [0, 0, 1, 1], [], []>} : vector<8x8xf32>, vector<8x8xf32>, vector<8x8xf32> -> vector<8x8xf32>
    %349 = vector.extract_strided_slice %235 {offsets = [8, 16], sizes = [8, 8], strides = [1, 1]} : vector<16x32xf32> to vector<8x8xf32>
    %cst_118 = arith.constant 0.353553385 : f32
    %350 = vector.broadcast %cst_118 : f32 to vector<8x8xf32>
    %351 = arith.mulf %349, %350 : vector<8x8xf32>
    %352 = vector.extract_strided_slice %240 {offsets = [8, 16], sizes = [8, 8], strides = [1, 1]} : vector<16x32xf32> to vector<8x8xf32>
    %353 = vector.extract_strided_slice %245 {offsets = [8, 16], sizes = [8, 8], strides = [1, 1]} : vector<16x32xf32> to vector<8x8xf32>
    %cst_119 = arith.constant dense<0.000000e+00> : vector<8x8xf32>
    %354 = tpu.matmul %351, %352, %cst_119 {dimension_numbers = #tpu.dot_dimension_numbers<[1], [1], [0], [0], [0, 0, 1, 0], [], []>} : vector<8x8xf32>, vector<8x8xf32>, vector<8x8xf32> -> vector<8x8xf32>
    %cst_120 = arith.constant dense<0xFF800000> : vector<8xf32>
    %355 = vector.multi_reduction <maximumf>, %354, %cst_120 [1] : vector<8x8xf32> to vector<8xf32>
    %356 = vector.shape_cast %355 : vector<8xf32> to vector<8x1xf32>
    %357 = vector.broadcast %356 : vector<8x1xf32> to vector<8x8xf32>
    %358 = arith.subf %354, %357 : vector<8x8xf32>
    %359 = math.exp %358 : vector<8x8xf32>
    %cst_121 = arith.constant dense<0.000000e+00> : vector<8xf32>
    %360 = vector.multi_reduction <add>, %359, %cst_121 [1] : vector<8x8xf32> to vector<8xf32>
    %361 = vector.shape_cast %360 : vector<8xf32> to vector<8x1xf32>
    %362 = tpu.reciprocal %361 {approx = true} : vector<8x1xf32> -> vector<8x1xf32>
    %363 = vector.broadcast %362 : vector<8x1xf32> to vector<8x8xf32>
    %364 = arith.mulf %359, %363 : vector<8x8xf32>
    %cst_122 = arith.constant dense<0.000000e+00> : vector<8x8xf32>
    %365 = tpu.matmul %364, %353, %cst_122 {dimension_numbers = #tpu.dot_dimension_numbers<[1], [0], [0], [1], [0, 0, 1, 1], [], []>} : vector<8x8xf32>, vector<8x8xf32>, vector<8x8xf32> -> vector<8x8xf32>
    %366 = vector.extract_strided_slice %235 {offsets = [8, 24], sizes = [8, 8], strides = [1, 1]} : vector<16x32xf32> to vector<8x8xf32>
    %cst_123 = arith.constant 0.353553385 : f32
    %367 = vector.broadcast %cst_123 : f32 to vector<8x8xf32>
    %368 = arith.mulf %366, %367 : vector<8x8xf32>
    %369 = vector.extract_strided_slice %240 {offsets = [8, 24], sizes = [8, 8], strides = [1, 1]} : vector<16x32xf32> to vector<8x8xf32>
    %370 = vector.extract_strided_slice %245 {offsets = [8, 24], sizes = [8, 8], strides = [1, 1]} : vector<16x32xf32> to vector<8x8xf32>
    %cst_124 = arith.constant dense<0.000000e+00> : vector<8x8xf32>
    %371 = tpu.matmul %368, %369, %cst_124 {dimension_numbers = #tpu.dot_dimension_numbers<[1], [1], [0], [0], [0, 0, 1, 0], [], []>} : vector<8x8xf32>, vector<8x8xf32>, vector<8x8xf32> -> vector<8x8xf32>
    %cst_125 = arith.constant dense<0xFF800000> : vector<8xf32>
    %372 = vector.multi_reduction <maximumf>, %371, %cst_125 [1] : vector<8x8xf32> to vector<8xf32>
    %373 = vector.shape_cast %372 : vector<8xf32> to vector<8x1xf32>
    %374 = vector.broadcast %373 : vector<8x1xf32> to vector<8x8xf32>
    %375 = arith.subf %371, %374 : vector<8x8xf32>
    %376 = math.exp %375 : vector<8x8xf32>
    %cst_126 = arith.constant dense<0.000000e+00> : vector<8xf32>
    %377 = vector.multi_reduction <add>, %376, %cst_126 [1] : vector<8x8xf32> to vector<8xf32>
    %378 = vector.shape_cast %377 : vector<8xf32> to vector<8x1xf32>
    %379 = tpu.reciprocal %378 {approx = true} : vector<8x1xf32> -> vector<8x1xf32>
    %380 = vector.broadcast %379 : vector<8x1xf32> to vector<8x8xf32>
    %381 = arith.mulf %376, %380 : vector<8x8xf32>
    %cst_127 = arith.constant dense<0.000000e+00> : vector<8x8xf32>
    %382 = tpu.matmul %381, %370, %cst_127 {dimension_numbers = #tpu.dot_dimension_numbers<[1], [0], [0], [1], [0, 0, 1, 1], [], []>} : vector<8x8xf32>, vector<8x8xf32>, vector<8x8xf32> -> vector<8x8xf32>
    %383 = tpu.concatenate %331, %348, %365, %382 in 1 : vector<8x8xf32>, vector<8x8xf32>, vector<8x8xf32>, vector<8x8xf32> -> vector<8x32xf32>
    %384 = tpu.concatenate %314, %383 in 0 : vector<8x32xf32>, vector<8x32xf32> -> vector<16x32xf32>
    %c1_128 = arith.constant 1 : index
    %c0_129 = arith.constant 0 : index
    %c0_130 = arith.constant 0 : index
    %385 = vector.load %arg4[%c1_128, %c0_129, %c0_130] : memref<4x32x32xf32, #tpu.memory_space<vmem>>, vector<1x32x32xf32>
    %386 = vector.shape_cast %385 : vector<1x32x32xf32> to vector<32x32xf32>
    %cst_131 = arith.constant dense<0.000000e+00> : vector<16x32xf32>
    %387 = tpu.matmul %384, %386, %cst_131 {dimension_numbers = #tpu.dot_dimension_numbers<[1], [0], [0], [1], [0, 0, 1, 1], [], []>} : vector<16x32xf32>, vector<32x32xf32>, vector<16x32xf32> -> vector<16x32xf32>
    %388 = vector.broadcast %227 : vector<1x32xf32> to vector<16x32xf32>
    %389 = arith.addf %387, %388 : vector<16x32xf32>
    %390 = arith.addf %221, %389 : vector<16x32xf32>
    %cst_132 = arith.constant dense<0.000000e+00> : vector<16xf32>
    %391 = vector.multi_reduction <add>, %390, %cst_132 [1] : vector<16x32xf32> to vector<16xf32>
    %392 = vector.shape_cast %391 : vector<16xf32> to vector<16x1xf32>
    %cst_133 = arith.constant 3.200000e+01 : f32
    %393 = vector.broadcast %cst_133 : f32 to vector<16x1xf32>
    %394 = arith.divf %392, %393 : vector<16x1xf32>
    %395 = vector.broadcast %394 : vector<16x1xf32> to vector<16x32xf32>
    %396 = arith.subf %390, %395 : vector<16x32xf32>
    %397 = arith.mulf %396, %396 : vector<16x32xf32>
    %cst_134 = arith.constant dense<0.000000e+00> : vector<16xf32>
    %398 = vector.multi_reduction <add>, %397, %cst_134 [1] : vector<16x32xf32> to vector<16xf32>
    %399 = vector.shape_cast %398 : vector<16xf32> to vector<16x1xf32>
    %cst_135 = arith.constant 3.200000e+01 : f32
    %400 = vector.broadcast %cst_135 : f32 to vector<16x1xf32>
    %401 = arith.divf %399, %400 : vector<16x1xf32>
    %402 = vector.broadcast %394 : vector<16x1xf32> to vector<16x32xf32>
    %403 = arith.subf %390, %402 : vector<16x32xf32>
    %cst_136 = arith.constant 9.99999974E-6 : f32
    %404 = vector.broadcast %cst_136 : f32 to vector<16x1xf32>
    %405 = arith.addf %401, %404 : vector<16x1xf32>
    %406 = math.rsqrt %405 : vector<16x1xf32>
    %407 = vector.broadcast %406 : vector<16x1xf32> to vector<16x32xf32>
    %408 = arith.mulf %403, %407 : vector<16x32xf32>
    %409 = vector.broadcast %229 : vector<1x32xf32> to vector<16x32xf32>
    %410 = arith.mulf %408, %409 : vector<16x32xf32>
    %411 = vector.broadcast %230 : vector<1x32xf32> to vector<16x32xf32>
    %412 = arith.addf %410, %411 : vector<16x32xf32>
    %c1_137 = arith.constant 1 : index
    %c0_138 = arith.constant 0 : index
    %c0_139 = arith.constant 0 : index
    %413 = vector.load %arg5[%c1_137, %c0_138, %c0_139] : memref<4x32x32xf32, #tpu.memory_space<vmem>>, vector<1x32x32xf32>
    %414 = vector.shape_cast %413 : vector<1x32x32xf32> to vector<32x32xf32>
    %cst_140 = arith.constant dense<0.000000e+00> : vector<16x32xf32>
    %415 = tpu.matmul %412, %414, %cst_140 {dimension_numbers = #tpu.dot_dimension_numbers<[1], [0], [0], [1], [0, 0, 1, 1], [], []>} : vector<16x32xf32>, vector<32x32xf32>, vector<16x32xf32> -> vector<16x32xf32>
    %416 = vector.broadcast %228 : vector<1x32xf32> to vector<16x32xf32>
    %417 = arith.addf %415, %416 : vector<16x32xf32>
    %cst_141 = arith.constant 0.000000e+00 : f32
    %418 = vector.broadcast %cst_141 : f32 to vector<16x32xf32>
    %419 = arith.maximumf %417, %418 : vector<16x32xf32>
    %420 = arith.addf %412, %419 : vector<16x32xf32>
    %cst_142 = arith.constant dense<0.000000e+00> : vector<16xf32>
    %421 = vector.multi_reduction <add>, %420, %cst_142 [1] : vector<16x32xf32> to vector<16xf32>
    %422 = vector.shape_cast %421 : vector<16xf32> to vector<16x1xf32>
    %cst_143 = arith.constant 3.200000e+01 : f32
    %423 = vector.broadcast %cst_143 : f32 to vector<16x1xf32>
    %424 = arith.divf %422, %423 : vector<16x1xf32>
    %425 = vector.broadcast %424 : vector<16x1xf32> to vector<16x32xf32>
    %426 = arith.subf %420, %425 : vector<16x32xf32>
    %427 = arith.mulf %426, %426 : vector<16x32xf32>
    %cst_144 = arith.constant dense<0.000000e+00> : vector<16xf32>
    %428 = vector.multi_reduction <add>, %427, %cst_144 [1] : vector<16x32xf32> to vector<16xf32>
    %429 = vector.shape_cast %428 : vector<16xf32> to vector<16x1xf32>
    %cst_145 = arith.constant 3.200000e+01 : f32
    %430 = vector.broadcast %cst_145 : f32 to vector<16x1xf32>
    %431 = arith.divf %429, %430 : vector<16x1xf32>
    %432 = vector.broadcast %424 : vector<16x1xf32> to vector<16x32xf32>
    %433 = arith.subf %420, %432 : vector<16x32xf32>
    %cst_146 = arith.constant 9.99999974E-6 : f32
    %434 = vector.broadcast %cst_146 : f32 to vector<16x1xf32>
    %435 = arith.addf %431, %434 : vector<16x1xf32>
    %436 = math.rsqrt %435 : vector<16x1xf32>
    %437 = vector.broadcast %436 : vector<16x1xf32> to vector<16x32xf32>
    %438 = arith.mulf %433, %437 : vector<16x32xf32>
    %439 = vector.broadcast %229 : vector<1x32xf32> to vector<16x32xf32>
    %440 = arith.mulf %438, %439 : vector<16x32xf32>
    %441 = vector.broadcast %230 : vector<1x32xf32> to vector<16x32xf32>
    %442 = arith.addf %440, %441 : vector<16x32xf32>
    %c2 = arith.constant 2 : index
    %c0_147 = arith.constant 0 : index
    %c0_148 = arith.constant 0 : index
    %443 = vector.load %arg6[%c2, %c0_147, %c0_148] : memref<4x8x32xf32, #tpu.memory_space<vmem>>, vector<1x8x32xf32>
    %444 = vector.shape_cast %443 : vector<1x8x32xf32> to vector<8x32xf32>
    %445 = vector.extract_strided_slice %444 {offsets = [0, 0], sizes = [1, 32], strides = [1, 1]} : vector<8x32xf32> to vector<1x32xf32>
    %446 = vector.extract_strided_slice %444 {offsets = [1, 0], sizes = [1, 32], strides = [1, 1]} : vector<8x32xf32> to vector<1x32xf32>
    %447 = vector.extract_strided_slice %444 {offsets = [2, 0], sizes = [1, 32], strides = [1, 1]} : vector<8x32xf32> to vector<1x32xf32>
    %448 = vector.extract_strided_slice %444 {offsets = [3, 0], sizes = [1, 32], strides = [1, 1]} : vector<8x32xf32> to vector<1x32xf32>
    %449 = vector.extract_strided_slice %444 {offsets = [4, 0], sizes = [1, 32], strides = [1, 1]} : vector<8x32xf32> to vector<1x32xf32>
    %450 = vector.extract_strided_slice %444 {offsets = [5, 0], sizes = [1, 32], strides = [1, 1]} : vector<8x32xf32> to vector<1x32xf32>
    %451 = vector.extract_strided_slice %444 {offsets = [6, 0], sizes = [1, 32], strides = [1, 1]} : vector<8x32xf32> to vector<1x32xf32>
    %c2_149 = arith.constant 2 : index
    %c0_150 = arith.constant 0 : index
    %c0_151 = arith.constant 0 : index
    %452 = vector.load %arg1[%c2_149, %c0_150, %c0_151] : memref<4x32x32xf32, #tpu.memory_space<vmem>>, vector<1x32x32xf32>
    %453 = vector.shape_cast %452 : vector<1x32x32xf32> to vector<32x32xf32>
    %cst_152 = arith.constant dense<0.000000e+00> : vector<16x32xf32>
    %454 = tpu.matmul %442, %453, %cst_152 {dimension_numbers = #tpu.dot_dimension_numbers<[1], [0], [0], [1], [0, 0, 1, 1], [], []>} : vector<16x32xf32>, vector<32x32xf32>, vector<16x32xf32> -> vector<16x32xf32>
    %455 = vector.broadcast %445 : vector<1x32xf32> to vector<16x32xf32>
    %456 = arith.addf %454, %455 : vector<16x32xf32>
    %c2_153 = arith.constant 2 : index
    %c0_154 = arith.constant 0 : index
    %c0_155 = arith.constant 0 : index
    %457 = vector.load %arg2[%c2_153, %c0_154, %c0_155] : memref<4x32x32xf32, #tpu.memory_space<vmem>>, vector<1x32x32xf32>
    %458 = vector.shape_cast %457 : vector<1x32x32xf32> to vector<32x32xf32>
    %cst_156 = arith.constant dense<0.000000e+00> : vector<16x32xf32>
    %459 = tpu.matmul %442, %458, %cst_156 {dimension_numbers = #tpu.dot_dimension_numbers<[1], [0], [0], [1], [0, 0, 1, 1], [], []>} : vector<16x32xf32>, vector<32x32xf32>, vector<16x32xf32> -> vector<16x32xf32>
    %460 = vector.broadcast %446 : vector<1x32xf32> to vector<16x32xf32>
    %461 = arith.addf %459, %460 : vector<16x32xf32>
    %c2_157 = arith.constant 2 : index
    %c0_158 = arith.constant 0 : index
    %c0_159 = arith.constant 0 : index
    %462 = vector.load %arg3[%c2_157, %c0_158, %c0_159] : memref<4x32x32xf32, #tpu.memory_space<vmem>>, vector<1x32x32xf32>
    %463 = vector.shape_cast %462 : vector<1x32x32xf32> to vector<32x32xf32>
    %cst_160 = arith.constant dense<0.000000e+00> : vector<16x32xf32>
    %464 = tpu.matmul %442, %463, %cst_160 {dimension_numbers = #tpu.dot_dimension_numbers<[1], [0], [0], [1], [0, 0, 1, 1], [], []>} : vector<16x32xf32>, vector<32x32xf32>, vector<16x32xf32> -> vector<16x32xf32>
    %465 = vector.broadcast %447 : vector<1x32xf32> to vector<16x32xf32>
    %466 = arith.addf %464, %465 : vector<16x32xf32>
    %467 = vector.extract_strided_slice %456 {offsets = [0, 0], sizes = [8, 8], strides = [1, 1]} : vector<16x32xf32> to vector<8x8xf32>
    %cst_161 = arith.constant 0.353553385 : f32
    %468 = vector.broadcast %cst_161 : f32 to vector<8x8xf32>
    %469 = arith.mulf %467, %468 : vector<8x8xf32>
    %470 = vector.extract_strided_slice %461 {offsets = [0, 0], sizes = [8, 8], strides = [1, 1]} : vector<16x32xf32> to vector<8x8xf32>
    %471 = vector.extract_strided_slice %466 {offsets = [0, 0], sizes = [8, 8], strides = [1, 1]} : vector<16x32xf32> to vector<8x8xf32>
    %cst_162 = arith.constant dense<0.000000e+00> : vector<8x8xf32>
    %472 = tpu.matmul %469, %470, %cst_162 {dimension_numbers = #tpu.dot_dimension_numbers<[1], [1], [0], [0], [0, 0, 1, 0], [], []>} : vector<8x8xf32>, vector<8x8xf32>, vector<8x8xf32> -> vector<8x8xf32>
    %cst_163 = arith.constant dense<0xFF800000> : vector<8xf32>
    %473 = vector.multi_reduction <maximumf>, %472, %cst_163 [1] : vector<8x8xf32> to vector<8xf32>
    %474 = vector.shape_cast %473 : vector<8xf32> to vector<8x1xf32>
    %475 = vector.broadcast %474 : vector<8x1xf32> to vector<8x8xf32>
    %476 = arith.subf %472, %475 : vector<8x8xf32>
    %477 = math.exp %476 : vector<8x8xf32>
    %cst_164 = arith.constant dense<0.000000e+00> : vector<8xf32>
    %478 = vector.multi_reduction <add>, %477, %cst_164 [1] : vector<8x8xf32> to vector<8xf32>
    %479 = vector.shape_cast %478 : vector<8xf32> to vector<8x1xf32>
    %480 = tpu.reciprocal %479 {approx = true} : vector<8x1xf32> -> vector<8x1xf32>
    %481 = vector.broadcast %480 : vector<8x1xf32> to vector<8x8xf32>
    %482 = arith.mulf %477, %481 : vector<8x8xf32>
    %cst_165 = arith.constant dense<0.000000e+00> : vector<8x8xf32>
    %483 = tpu.matmul %482, %471, %cst_165 {dimension_numbers = #tpu.dot_dimension_numbers<[1], [0], [0], [1], [0, 0, 1, 1], [], []>} : vector<8x8xf32>, vector<8x8xf32>, vector<8x8xf32> -> vector<8x8xf32>
    %484 = vector.extract_strided_slice %456 {offsets = [0, 8], sizes = [8, 8], strides = [1, 1]} : vector<16x32xf32> to vector<8x8xf32>
    %cst_166 = arith.constant 0.353553385 : f32
    %485 = vector.broadcast %cst_166 : f32 to vector<8x8xf32>
    %486 = arith.mulf %484, %485 : vector<8x8xf32>
    %487 = vector.extract_strided_slice %461 {offsets = [0, 8], sizes = [8, 8], strides = [1, 1]} : vector<16x32xf32> to vector<8x8xf32>
    %488 = vector.extract_strided_slice %466 {offsets = [0, 8], sizes = [8, 8], strides = [1, 1]} : vector<16x32xf32> to vector<8x8xf32>
    %cst_167 = arith.constant dense<0.000000e+00> : vector<8x8xf32>
    %489 = tpu.matmul %486, %487, %cst_167 {dimension_numbers = #tpu.dot_dimension_numbers<[1], [1], [0], [0], [0, 0, 1, 0], [], []>} : vector<8x8xf32>, vector<8x8xf32>, vector<8x8xf32> -> vector<8x8xf32>
    %cst_168 = arith.constant dense<0xFF800000> : vector<8xf32>
    %490 = vector.multi_reduction <maximumf>, %489, %cst_168 [1] : vector<8x8xf32> to vector<8xf32>
    %491 = vector.shape_cast %490 : vector<8xf32> to vector<8x1xf32>
    %492 = vector.broadcast %491 : vector<8x1xf32> to vector<8x8xf32>
    %493 = arith.subf %489, %492 : vector<8x8xf32>
    %494 = math.exp %493 : vector<8x8xf32>
    %cst_169 = arith.constant dense<0.000000e+00> : vector<8xf32>
    %495 = vector.multi_reduction <add>, %494, %cst_169 [1] : vector<8x8xf32> to vector<8xf32>
    %496 = vector.shape_cast %495 : vector<8xf32> to vector<8x1xf32>
    %497 = tpu.reciprocal %496 {approx = true} : vector<8x1xf32> -> vector<8x1xf32>
    %498 = vector.broadcast %497 : vector<8x1xf32> to vector<8x8xf32>
    %499 = arith.mulf %494, %498 : vector<8x8xf32>
    %cst_170 = arith.constant dense<0.000000e+00> : vector<8x8xf32>
    %500 = tpu.matmul %499, %488, %cst_170 {dimension_numbers = #tpu.dot_dimension_numbers<[1], [0], [0], [1], [0, 0, 1, 1], [], []>} : vector<8x8xf32>, vector<8x8xf32>, vector<8x8xf32> -> vector<8x8xf32>
    %501 = vector.extract_strided_slice %456 {offsets = [0, 16], sizes = [8, 8], strides = [1, 1]} : vector<16x32xf32> to vector<8x8xf32>
    %cst_171 = arith.constant 0.353553385 : f32
    %502 = vector.broadcast %cst_171 : f32 to vector<8x8xf32>
    %503 = arith.mulf %501, %502 : vector<8x8xf32>
    %504 = vector.extract_strided_slice %461 {offsets = [0, 16], sizes = [8, 8], strides = [1, 1]} : vector<16x32xf32> to vector<8x8xf32>
    %505 = vector.extract_strided_slice %466 {offsets = [0, 16], sizes = [8, 8], strides = [1, 1]} : vector<16x32xf32> to vector<8x8xf32>
    %cst_172 = arith.constant dense<0.000000e+00> : vector<8x8xf32>
    %506 = tpu.matmul %503, %504, %cst_172 {dimension_numbers = #tpu.dot_dimension_numbers<[1], [1], [0], [0], [0, 0, 1, 0], [], []>} : vector<8x8xf32>, vector<8x8xf32>, vector<8x8xf32> -> vector<8x8xf32>
    %cst_173 = arith.constant dense<0xFF800000> : vector<8xf32>
    %507 = vector.multi_reduction <maximumf>, %506, %cst_173 [1] : vector<8x8xf32> to vector<8xf32>
    %508 = vector.shape_cast %507 : vector<8xf32> to vector<8x1xf32>
    %509 = vector.broadcast %508 : vector<8x1xf32> to vector<8x8xf32>
    %510 = arith.subf %506, %509 : vector<8x8xf32>
    %511 = math.exp %510 : vector<8x8xf32>
    %cst_174 = arith.constant dense<0.000000e+00> : vector<8xf32>
    %512 = vector.multi_reduction <add>, %511, %cst_174 [1] : vector<8x8xf32> to vector<8xf32>
    %513 = vector.shape_cast %512 : vector<8xf32> to vector<8x1xf32>
    %514 = tpu.reciprocal %513 {approx = true} : vector<8x1xf32> -> vector<8x1xf32>
    %515 = vector.broadcast %514 : vector<8x1xf32> to vector<8x8xf32>
    %516 = arith.mulf %511, %515 : vector<8x8xf32>
    %cst_175 = arith.constant dense<0.000000e+00> : vector<8x8xf32>
    %517 = tpu.matmul %516, %505, %cst_175 {dimension_numbers = #tpu.dot_dimension_numbers<[1], [0], [0], [1], [0, 0, 1, 1], [], []>} : vector<8x8xf32>, vector<8x8xf32>, vector<8x8xf32> -> vector<8x8xf32>
    %518 = vector.extract_strided_slice %456 {offsets = [0, 24], sizes = [8, 8], strides = [1, 1]} : vector<16x32xf32> to vector<8x8xf32>
    %cst_176 = arith.constant 0.353553385 : f32
    %519 = vector.broadcast %cst_176 : f32 to vector<8x8xf32>
    %520 = arith.mulf %518, %519 : vector<8x8xf32>
    %521 = vector.extract_strided_slice %461 {offsets = [0, 24], sizes = [8, 8], strides = [1, 1]} : vector<16x32xf32> to vector<8x8xf32>
    %522 = vector.extract_strided_slice %466 {offsets = [0, 24], sizes = [8, 8], strides = [1, 1]} : vector<16x32xf32> to vector<8x8xf32>
    %cst_177 = arith.constant dense<0.000000e+00> : vector<8x8xf32>
    %523 = tpu.matmul %520, %521, %cst_177 {dimension_numbers = #tpu.dot_dimension_numbers<[1], [1], [0], [0], [0, 0, 1, 0], [], []>} : vector<8x8xf32>, vector<8x8xf32>, vector<8x8xf32> -> vector<8x8xf32>
    %cst_178 = arith.constant dense<0xFF800000> : vector<8xf32>
    %524 = vector.multi_reduction <maximumf>, %523, %cst_178 [1] : vector<8x8xf32> to vector<8xf32>
    %525 = vector.shape_cast %524 : vector<8xf32> to vector<8x1xf32>
    %526 = vector.broadcast %525 : vector<8x1xf32> to vector<8x8xf32>
    %527 = arith.subf %523, %526 : vector<8x8xf32>
    %528 = math.exp %527 : vector<8x8xf32>
    %cst_179 = arith.constant dense<0.000000e+00> : vector<8xf32>
    %529 = vector.multi_reduction <add>, %528, %cst_179 [1] : vector<8x8xf32> to vector<8xf32>
    %530 = vector.shape_cast %529 : vector<8xf32> to vector<8x1xf32>
    %531 = tpu.reciprocal %530 {approx = true} : vector<8x1xf32> -> vector<8x1xf32>
    %532 = vector.broadcast %531 : vector<8x1xf32> to vector<8x8xf32>
    %533 = arith.mulf %528, %532 : vector<8x8xf32>
    %cst_180 = arith.constant dense<0.000000e+00> : vector<8x8xf32>
    %534 = tpu.matmul %533, %522, %cst_180 {dimension_numbers = #tpu.dot_dimension_numbers<[1], [0], [0], [1], [0, 0, 1, 1], [], []>} : vector<8x8xf32>, vector<8x8xf32>, vector<8x8xf32> -> vector<8x8xf32>
    %535 = tpu.concatenate %483, %500, %517, %534 in 1 : vector<8x8xf32>, vector<8x8xf32>, vector<8x8xf32>, vector<8x8xf32> -> vector<8x32xf32>
    %536 = vector.extract_strided_slice %456 {offsets = [8, 0], sizes = [8, 8], strides = [1, 1]} : vector<16x32xf32> to vector<8x8xf32>
    %cst_181 = arith.constant 0.353553385 : f32
    %537 = vector.broadcast %cst_181 : f32 to vector<8x8xf32>
    %538 = arith.mulf %536, %537 : vector<8x8xf32>
    %539 = vector.extract_strided_slice %461 {offsets = [8, 0], sizes = [8, 8], strides = [1, 1]} : vector<16x32xf32> to vector<8x8xf32>
    %540 = vector.extract_strided_slice %466 {offsets = [8, 0], sizes = [8, 8], strides = [1, 1]} : vector<16x32xf32> to vector<8x8xf32>
    %cst_182 = arith.constant dense<0.000000e+00> : vector<8x8xf32>
    %541 = tpu.matmul %538, %539, %cst_182 {dimension_numbers = #tpu.dot_dimension_numbers<[1], [1], [0], [0], [0, 0, 1, 0], [], []>} : vector<8x8xf32>, vector<8x8xf32>, vector<8x8xf32> -> vector<8x8xf32>
    %cst_183 = arith.constant dense<0xFF800000> : vector<8xf32>
    %542 = vector.multi_reduction <maximumf>, %541, %cst_183 [1] : vector<8x8xf32> to vector<8xf32>
    %543 = vector.shape_cast %542 : vector<8xf32> to vector<8x1xf32>
    %544 = vector.broadcast %543 : vector<8x1xf32> to vector<8x8xf32>
    %545 = arith.subf %541, %544 : vector<8x8xf32>
    %546 = math.exp %545 : vector<8x8xf32>
    %cst_184 = arith.constant dense<0.000000e+00> : vector<8xf32>
    %547 = vector.multi_reduction <add>, %546, %cst_184 [1] : vector<8x8xf32> to vector<8xf32>
    %548 = vector.shape_cast %547 : vector<8xf32> to vector<8x1xf32>
    %549 = tpu.reciprocal %548 {approx = true} : vector<8x1xf32> -> vector<8x1xf32>
    %550 = vector.broadcast %549 : vector<8x1xf32> to vector<8x8xf32>
    %551 = arith.mulf %546, %550 : vector<8x8xf32>
    %cst_185 = arith.constant dense<0.000000e+00> : vector<8x8xf32>
    %552 = tpu.matmul %551, %540, %cst_185 {dimension_numbers = #tpu.dot_dimension_numbers<[1], [0], [0], [1], [0, 0, 1, 1], [], []>} : vector<8x8xf32>, vector<8x8xf32>, vector<8x8xf32> -> vector<8x8xf32>
    %553 = vector.extract_strided_slice %456 {offsets = [8, 8], sizes = [8, 8], strides = [1, 1]} : vector<16x32xf32> to vector<8x8xf32>
    %cst_186 = arith.constant 0.353553385 : f32
    %554 = vector.broadcast %cst_186 : f32 to vector<8x8xf32>
    %555 = arith.mulf %553, %554 : vector<8x8xf32>
    %556 = vector.extract_strided_slice %461 {offsets = [8, 8], sizes = [8, 8], strides = [1, 1]} : vector<16x32xf32> to vector<8x8xf32>
    %557 = vector.extract_strided_slice %466 {offsets = [8, 8], sizes = [8, 8], strides = [1, 1]} : vector<16x32xf32> to vector<8x8xf32>
    %cst_187 = arith.constant dense<0.000000e+00> : vector<8x8xf32>
    %558 = tpu.matmul %555, %556, %cst_187 {dimension_numbers = #tpu.dot_dimension_numbers<[1], [1], [0], [0], [0, 0, 1, 0], [], []>} : vector<8x8xf32>, vector<8x8xf32>, vector<8x8xf32> -> vector<8x8xf32>
    %cst_188 = arith.constant dense<0xFF800000> : vector<8xf32>
    %559 = vector.multi_reduction <maximumf>, %558, %cst_188 [1] : vector<8x8xf32> to vector<8xf32>
    %560 = vector.shape_cast %559 : vector<8xf32> to vector<8x1xf32>
    %561 = vector.broadcast %560 : vector<8x1xf32> to vector<8x8xf32>
    %562 = arith.subf %558, %561 : vector<8x8xf32>
    %563 = math.exp %562 : vector<8x8xf32>
    %cst_189 = arith.constant dense<0.000000e+00> : vector<8xf32>
    %564 = vector.multi_reduction <add>, %563, %cst_189 [1] : vector<8x8xf32> to vector<8xf32>
    %565 = vector.shape_cast %564 : vector<8xf32> to vector<8x1xf32>
    %566 = tpu.reciprocal %565 {approx = true} : vector<8x1xf32> -> vector<8x1xf32>
    %567 = vector.broadcast %566 : vector<8x1xf32> to vector<8x8xf32>
    %568 = arith.mulf %563, %567 : vector<8x8xf32>
    %cst_190 = arith.constant dense<0.000000e+00> : vector<8x8xf32>
    %569 = tpu.matmul %568, %557, %cst_190 {dimension_numbers = #tpu.dot_dimension_numbers<[1], [0], [0], [1], [0, 0, 1, 1], [], []>} : vector<8x8xf32>, vector<8x8xf32>, vector<8x8xf32> -> vector<8x8xf32>
    %570 = vector.extract_strided_slice %456 {offsets = [8, 16], sizes = [8, 8], strides = [1, 1]} : vector<16x32xf32> to vector<8x8xf32>
    %cst_191 = arith.constant 0.353553385 : f32
    %571 = vector.broadcast %cst_191 : f32 to vector<8x8xf32>
    %572 = arith.mulf %570, %571 : vector<8x8xf32>
    %573 = vector.extract_strided_slice %461 {offsets = [8, 16], sizes = [8, 8], strides = [1, 1]} : vector<16x32xf32> to vector<8x8xf32>
    %574 = vector.extract_strided_slice %466 {offsets = [8, 16], sizes = [8, 8], strides = [1, 1]} : vector<16x32xf32> to vector<8x8xf32>
    %cst_192 = arith.constant dense<0.000000e+00> : vector<8x8xf32>
    %575 = tpu.matmul %572, %573, %cst_192 {dimension_numbers = #tpu.dot_dimension_numbers<[1], [1], [0], [0], [0, 0, 1, 0], [], []>} : vector<8x8xf32>, vector<8x8xf32>, vector<8x8xf32> -> vector<8x8xf32>
    %cst_193 = arith.constant dense<0xFF800000> : vector<8xf32>
    %576 = vector.multi_reduction <maximumf>, %575, %cst_193 [1] : vector<8x8xf32> to vector<8xf32>
    %577 = vector.shape_cast %576 : vector<8xf32> to vector<8x1xf32>
    %578 = vector.broadcast %577 : vector<8x1xf32> to vector<8x8xf32>
    %579 = arith.subf %575, %578 : vector<8x8xf32>
    %580 = math.exp %579 : vector<8x8xf32>
    %cst_194 = arith.constant dense<0.000000e+00> : vector<8xf32>
    %581 = vector.multi_reduction <add>, %580, %cst_194 [1] : vector<8x8xf32> to vector<8xf32>
    %582 = vector.shape_cast %581 : vector<8xf32> to vector<8x1xf32>
    %583 = tpu.reciprocal %582 {approx = true} : vector<8x1xf32> -> vector<8x1xf32>
    %584 = vector.broadcast %583 : vector<8x1xf32> to vector<8x8xf32>
    %585 = arith.mulf %580, %584 : vector<8x8xf32>
    %cst_195 = arith.constant dense<0.000000e+00> : vector<8x8xf32>
    %586 = tpu.matmul %585, %574, %cst_195 {dimension_numbers = #tpu.dot_dimension_numbers<[1], [0], [0], [1], [0, 0, 1, 1], [], []>} : vector<8x8xf32>, vector<8x8xf32>, vector<8x8xf32> -> vector<8x8xf32>
    %587 = vector.extract_strided_slice %456 {offsets = [8, 24], sizes = [8, 8], strides = [1, 1]} : vector<16x32xf32> to vector<8x8xf32>
    %cst_196 = arith.constant 0.353553385 : f32
    %588 = vector.broadcast %cst_196 : f32 to vector<8x8xf32>
    %589 = arith.mulf %587, %588 : vector<8x8xf32>
    %590 = vector.extract_strided_slice %461 {offsets = [8, 24], sizes = [8, 8], strides = [1, 1]} : vector<16x32xf32> to vector<8x8xf32>
    %591 = vector.extract_strided_slice %466 {offsets = [8, 24], sizes = [8, 8], strides = [1, 1]} : vector<16x32xf32> to vector<8x8xf32>
    %cst_197 = arith.constant dense<0.000000e+00> : vector<8x8xf32>
    %592 = tpu.matmul %589, %590, %cst_197 {dimension_numbers = #tpu.dot_dimension_numbers<[1], [1], [0], [0], [0, 0, 1, 0], [], []>} : vector<8x8xf32>, vector<8x8xf32>, vector<8x8xf32> -> vector<8x8xf32>
    %cst_198 = arith.constant dense<0xFF800000> : vector<8xf32>
    %593 = vector.multi_reduction <maximumf>, %592, %cst_198 [1] : vector<8x8xf32> to vector<8xf32>
    %594 = vector.shape_cast %593 : vector<8xf32> to vector<8x1xf32>
    %595 = vector.broadcast %594 : vector<8x1xf32> to vector<8x8xf32>
    %596 = arith.subf %592, %595 : vector<8x8xf32>
    %597 = math.exp %596 : vector<8x8xf32>
    %cst_199 = arith.constant dense<0.000000e+00> : vector<8xf32>
    %598 = vector.multi_reduction <add>, %597, %cst_199 [1] : vector<8x8xf32> to vector<8xf32>
    %599 = vector.shape_cast %598 : vector<8xf32> to vector<8x1xf32>
    %600 = tpu.reciprocal %599 {approx = true} : vector<8x1xf32> -> vector<8x1xf32>
    %601 = vector.broadcast %600 : vector<8x1xf32> to vector<8x8xf32>
    %602 = arith.mulf %597, %601 : vector<8x8xf32>
    %cst_200 = arith.constant dense<0.000000e+00> : vector<8x8xf32>
    %603 = tpu.matmul %602, %591, %cst_200 {dimension_numbers = #tpu.dot_dimension_numbers<[1], [0], [0], [1], [0, 0, 1, 1], [], []>} : vector<8x8xf32>, vector<8x8xf32>, vector<8x8xf32> -> vector<8x8xf32>
    %604 = tpu.concatenate %552, %569, %586, %603 in 1 : vector<8x8xf32>, vector<8x8xf32>, vector<8x8xf32>, vector<8x8xf32> -> vector<8x32xf32>
    %605 = tpu.concatenate %535, %604 in 0 : vector<8x32xf32>, vector<8x32xf32> -> vector<16x32xf32>
    %c2_201 = arith.constant 2 : index
    %c0_202 = arith.constant 0 : index
    %c0_203 = arith.constant 0 : index
    %606 = vector.load %arg4[%c2_201, %c0_202, %c0_203] : memref<4x32x32xf32, #tpu.memory_space<vmem>>, vector<1x32x32xf32>
    %607 = vector.shape_cast %606 : vector<1x32x32xf32> to vector<32x32xf32>
    %cst_204 = arith.constant dense<0.000000e+00> : vector<16x32xf32>
    %608 = tpu.matmul %605, %607, %cst_204 {dimension_numbers = #tpu.dot_dimension_numbers<[1], [0], [0], [1], [0, 0, 1, 1], [], []>} : vector<16x32xf32>, vector<32x32xf32>, vector<16x32xf32> -> vector<16x32xf32>
    %609 = vector.broadcast %448 : vector<1x32xf32> to vector<16x32xf32>
    %610 = arith.addf %608, %609 : vector<16x32xf32>
    %611 = arith.addf %442, %610 : vector<16x32xf32>
    %cst_205 = arith.constant dense<0.000000e+00> : vector<16xf32>
    %612 = vector.multi_reduction <add>, %611, %cst_205 [1] : vector<16x32xf32> to vector<16xf32>
    %613 = vector.shape_cast %612 : vector<16xf32> to vector<16x1xf32>
    %cst_206 = arith.constant 3.200000e+01 : f32
    %614 = vector.broadcast %cst_206 : f32 to vector<16x1xf32>
    %615 = arith.divf %613, %614 : vector<16x1xf32>
    %616 = vector.broadcast %615 : vector<16x1xf32> to vector<16x32xf32>
    %617 = arith.subf %611, %616 : vector<16x32xf32>
    %618 = arith.mulf %617, %617 : vector<16x32xf32>
    %cst_207 = arith.constant dense<0.000000e+00> : vector<16xf32>
    %619 = vector.multi_reduction <add>, %618, %cst_207 [1] : vector<16x32xf32> to vector<16xf32>
    %620 = vector.shape_cast %619 : vector<16xf32> to vector<16x1xf32>
    %cst_208 = arith.constant 3.200000e+01 : f32
    %621 = vector.broadcast %cst_208 : f32 to vector<16x1xf32>
    %622 = arith.divf %620, %621 : vector<16x1xf32>
    %623 = vector.broadcast %615 : vector<16x1xf32> to vector<16x32xf32>
    %624 = arith.subf %611, %623 : vector<16x32xf32>
    %cst_209 = arith.constant 9.99999974E-6 : f32
    %625 = vector.broadcast %cst_209 : f32 to vector<16x1xf32>
    %626 = arith.addf %622, %625 : vector<16x1xf32>
    %627 = math.rsqrt %626 : vector<16x1xf32>
    %628 = vector.broadcast %627 : vector<16x1xf32> to vector<16x32xf32>
    %629 = arith.mulf %624, %628 : vector<16x32xf32>
    %630 = vector.broadcast %450 : vector<1x32xf32> to vector<16x32xf32>
    %631 = arith.mulf %629, %630 : vector<16x32xf32>
    %632 = vector.broadcast %451 : vector<1x32xf32> to vector<16x32xf32>
    %633 = arith.addf %631, %632 : vector<16x32xf32>
    %c2_210 = arith.constant 2 : index
    %c0_211 = arith.constant 0 : index
    %c0_212 = arith.constant 0 : index
    %634 = vector.load %arg5[%c2_210, %c0_211, %c0_212] : memref<4x32x32xf32, #tpu.memory_space<vmem>>, vector<1x32x32xf32>
    %635 = vector.shape_cast %634 : vector<1x32x32xf32> to vector<32x32xf32>
    %cst_213 = arith.constant dense<0.000000e+00> : vector<16x32xf32>
    %636 = tpu.matmul %633, %635, %cst_213 {dimension_numbers = #tpu.dot_dimension_numbers<[1], [0], [0], [1], [0, 0, 1, 1], [], []>} : vector<16x32xf32>, vector<32x32xf32>, vector<16x32xf32> -> vector<16x32xf32>
    %637 = vector.broadcast %449 : vector<1x32xf32> to vector<16x32xf32>
    %638 = arith.addf %636, %637 : vector<16x32xf32>
    %cst_214 = arith.constant 0.000000e+00 : f32
    %639 = vector.broadcast %cst_214 : f32 to vector<16x32xf32>
    %640 = arith.maximumf %638, %639 : vector<16x32xf32>
    %641 = arith.addf %633, %640 : vector<16x32xf32>
    %cst_215 = arith.constant dense<0.000000e+00> : vector<16xf32>
    %642 = vector.multi_reduction <add>, %641, %cst_215 [1] : vector<16x32xf32> to vector<16xf32>
    %643 = vector.shape_cast %642 : vector<16xf32> to vector<16x1xf32>
    %cst_216 = arith.constant 3.200000e+01 : f32
    %644 = vector.broadcast %cst_216 : f32 to vector<16x1xf32>
    %645 = arith.divf %643, %644 : vector<16x1xf32>
    %646 = vector.broadcast %645 : vector<16x1xf32> to vector<16x32xf32>
    %647 = arith.subf %641, %646 : vector<16x32xf32>
    %648 = arith.mulf %647, %647 : vector<16x32xf32>
    %cst_217 = arith.constant dense<0.000000e+00> : vector<16xf32>
    %649 = vector.multi_reduction <add>, %648, %cst_217 [1] : vector<16x32xf32> to vector<16xf32>
    %650 = vector.shape_cast %649 : vector<16xf32> to vector<16x1xf32>
    %cst_218 = arith.constant 3.200000e+01 : f32
    %651 = vector.broadcast %cst_218 : f32 to vector<16x1xf32>
    %652 = arith.divf %650, %651 : vector<16x1xf32>
    %653 = vector.broadcast %645 : vector<16x1xf32> to vector<16x32xf32>
    %654 = arith.subf %641, %653 : vector<16x32xf32>
    %cst_219 = arith.constant 9.99999974E-6 : f32
    %655 = vector.broadcast %cst_219 : f32 to vector<16x1xf32>
    %656 = arith.addf %652, %655 : vector<16x1xf32>
    %657 = math.rsqrt %656 : vector<16x1xf32>
    %658 = vector.broadcast %657 : vector<16x1xf32> to vector<16x32xf32>
    %659 = arith.mulf %654, %658 : vector<16x32xf32>
    %660 = vector.broadcast %450 : vector<1x32xf32> to vector<16x32xf32>
    %661 = arith.mulf %659, %660 : vector<16x32xf32>
    %662 = vector.broadcast %451 : vector<1x32xf32> to vector<16x32xf32>
    %663 = arith.addf %661, %662 : vector<16x32xf32>
    %c3 = arith.constant 3 : index
    %c0_220 = arith.constant 0 : index
    %c0_221 = arith.constant 0 : index
    %664 = vector.load %arg6[%c3, %c0_220, %c0_221] : memref<4x8x32xf32, #tpu.memory_space<vmem>>, vector<1x8x32xf32>
    %665 = vector.shape_cast %664 : vector<1x8x32xf32> to vector<8x32xf32>
    %666 = vector.extract_strided_slice %665 {offsets = [0, 0], sizes = [1, 32], strides = [1, 1]} : vector<8x32xf32> to vector<1x32xf32>
    %667 = vector.extract_strided_slice %665 {offsets = [1, 0], sizes = [1, 32], strides = [1, 1]} : vector<8x32xf32> to vector<1x32xf32>
    %668 = vector.extract_strided_slice %665 {offsets = [2, 0], sizes = [1, 32], strides = [1, 1]} : vector<8x32xf32> to vector<1x32xf32>
    %669 = vector.extract_strided_slice %665 {offsets = [3, 0], sizes = [1, 32], strides = [1, 1]} : vector<8x32xf32> to vector<1x32xf32>
    %670 = vector.extract_strided_slice %665 {offsets = [4, 0], sizes = [1, 32], strides = [1, 1]} : vector<8x32xf32> to vector<1x32xf32>
    %671 = vector.extract_strided_slice %665 {offsets = [5, 0], sizes = [1, 32], strides = [1, 1]} : vector<8x32xf32> to vector<1x32xf32>
    %672 = vector.extract_strided_slice %665 {offsets = [6, 0], sizes = [1, 32], strides = [1, 1]} : vector<8x32xf32> to vector<1x32xf32>
    %c3_222 = arith.constant 3 : index
    %c0_223 = arith.constant 0 : index
    %c0_224 = arith.constant 0 : index
    %673 = vector.load %arg1[%c3_222, %c0_223, %c0_224] : memref<4x32x32xf32, #tpu.memory_space<vmem>>, vector<1x32x32xf32>
    %674 = vector.shape_cast %673 : vector<1x32x32xf32> to vector<32x32xf32>
    %cst_225 = arith.constant dense<0.000000e+00> : vector<16x32xf32>
    %675 = tpu.matmul %663, %674, %cst_225 {dimension_numbers = #tpu.dot_dimension_numbers<[1], [0], [0], [1], [0, 0, 1, 1], [], []>} : vector<16x32xf32>, vector<32x32xf32>, vector<16x32xf32> -> vector<16x32xf32>
    %676 = vector.broadcast %666 : vector<1x32xf32> to vector<16x32xf32>
    %677 = arith.addf %675, %676 : vector<16x32xf32>
    %c3_226 = arith.constant 3 : index
    %c0_227 = arith.constant 0 : index
    %c0_228 = arith.constant 0 : index
    %678 = vector.load %arg2[%c3_226, %c0_227, %c0_228] : memref<4x32x32xf32, #tpu.memory_space<vmem>>, vector<1x32x32xf32>
    %679 = vector.shape_cast %678 : vector<1x32x32xf32> to vector<32x32xf32>
    %cst_229 = arith.constant dense<0.000000e+00> : vector<16x32xf32>
    %680 = tpu.matmul %663, %679, %cst_229 {dimension_numbers = #tpu.dot_dimension_numbers<[1], [0], [0], [1], [0, 0, 1, 1], [], []>} : vector<16x32xf32>, vector<32x32xf32>, vector<16x32xf32> -> vector<16x32xf32>
    %681 = vector.broadcast %667 : vector<1x32xf32> to vector<16x32xf32>
    %682 = arith.addf %680, %681 : vector<16x32xf32>
    %c3_230 = arith.constant 3 : index
    %c0_231 = arith.constant 0 : index
    %c0_232 = arith.constant 0 : index
    %683 = vector.load %arg3[%c3_230, %c0_231, %c0_232] : memref<4x32x32xf32, #tpu.memory_space<vmem>>, vector<1x32x32xf32>
    %684 = vector.shape_cast %683 : vector<1x32x32xf32> to vector<32x32xf32>
    %cst_233 = arith.constant dense<0.000000e+00> : vector<16x32xf32>
    %685 = tpu.matmul %663, %684, %cst_233 {dimension_numbers = #tpu.dot_dimension_numbers<[1], [0], [0], [1], [0, 0, 1, 1], [], []>} : vector<16x32xf32>, vector<32x32xf32>, vector<16x32xf32> -> vector<16x32xf32>
    %686 = vector.broadcast %668 : vector<1x32xf32> to vector<16x32xf32>
    %687 = arith.addf %685, %686 : vector<16x32xf32>
    %688 = vector.extract_strided_slice %677 {offsets = [0, 0], sizes = [8, 8], strides = [1, 1]} : vector<16x32xf32> to vector<8x8xf32>
    %cst_234 = arith.constant 0.353553385 : f32
    %689 = vector.broadcast %cst_234 : f32 to vector<8x8xf32>
    %690 = arith.mulf %688, %689 : vector<8x8xf32>
    %691 = vector.extract_strided_slice %682 {offsets = [0, 0], sizes = [8, 8], strides = [1, 1]} : vector<16x32xf32> to vector<8x8xf32>
    %692 = vector.extract_strided_slice %687 {offsets = [0, 0], sizes = [8, 8], strides = [1, 1]} : vector<16x32xf32> to vector<8x8xf32>
    %cst_235 = arith.constant dense<0.000000e+00> : vector<8x8xf32>
    %693 = tpu.matmul %690, %691, %cst_235 {dimension_numbers = #tpu.dot_dimension_numbers<[1], [1], [0], [0], [0, 0, 1, 0], [], []>} : vector<8x8xf32>, vector<8x8xf32>, vector<8x8xf32> -> vector<8x8xf32>
    %cst_236 = arith.constant dense<0xFF800000> : vector<8xf32>
    %694 = vector.multi_reduction <maximumf>, %693, %cst_236 [1] : vector<8x8xf32> to vector<8xf32>
    %695 = vector.shape_cast %694 : vector<8xf32> to vector<8x1xf32>
    %696 = vector.broadcast %695 : vector<8x1xf32> to vector<8x8xf32>
    %697 = arith.subf %693, %696 : vector<8x8xf32>
    %698 = math.exp %697 : vector<8x8xf32>
    %cst_237 = arith.constant dense<0.000000e+00> : vector<8xf32>
    %699 = vector.multi_reduction <add>, %698, %cst_237 [1] : vector<8x8xf32> to vector<8xf32>
    %700 = vector.shape_cast %699 : vector<8xf32> to vector<8x1xf32>
    %701 = tpu.reciprocal %700 {approx = true} : vector<8x1xf32> -> vector<8x1xf32>
    %702 = vector.broadcast %701 : vector<8x1xf32> to vector<8x8xf32>
    %703 = arith.mulf %698, %702 : vector<8x8xf32>
    %cst_238 = arith.constant dense<0.000000e+00> : vector<8x8xf32>
    %704 = tpu.matmul %703, %692, %cst_238 {dimension_numbers = #tpu.dot_dimension_numbers<[1], [0], [0], [1], [0, 0, 1, 1], [], []>} : vector<8x8xf32>, vector<8x8xf32>, vector<8x8xf32> -> vector<8x8xf32>
    %705 = vector.extract_strided_slice %677 {offsets = [0, 8], sizes = [8, 8], strides = [1, 1]} : vector<16x32xf32> to vector<8x8xf32>
    %cst_239 = arith.constant 0.353553385 : f32
    %706 = vector.broadcast %cst_239 : f32 to vector<8x8xf32>
    %707 = arith.mulf %705, %706 : vector<8x8xf32>
    %708 = vector.extract_strided_slice %682 {offsets = [0, 8], sizes = [8, 8], strides = [1, 1]} : vector<16x32xf32> to vector<8x8xf32>
    %709 = vector.extract_strided_slice %687 {offsets = [0, 8], sizes = [8, 8], strides = [1, 1]} : vector<16x32xf32> to vector<8x8xf32>
    %cst_240 = arith.constant dense<0.000000e+00> : vector<8x8xf32>
    %710 = tpu.matmul %707, %708, %cst_240 {dimension_numbers = #tpu.dot_dimension_numbers<[1], [1], [0], [0], [0, 0, 1, 0], [], []>} : vector<8x8xf32>, vector<8x8xf32>, vector<8x8xf32> -> vector<8x8xf32>
    %cst_241 = arith.constant dense<0xFF800000> : vector<8xf32>
    %711 = vector.multi_reduction <maximumf>, %710, %cst_241 [1] : vector<8x8xf32> to vector<8xf32>
    %712 = vector.shape_cast %711 : vector<8xf32> to vector<8x1xf32>
    %713 = vector.broadcast %712 : vector<8x1xf32> to vector<8x8xf32>
    %714 = arith.subf %710, %713 : vector<8x8xf32>
    %715 = math.exp %714 : vector<8x8xf32>
    %cst_242 = arith.constant dense<0.000000e+00> : vector<8xf32>
    %716 = vector.multi_reduction <add>, %715, %cst_242 [1] : vector<8x8xf32> to vector<8xf32>
    %717 = vector.shape_cast %716 : vector<8xf32> to vector<8x1xf32>
    %718 = tpu.reciprocal %717 {approx = true} : vector<8x1xf32> -> vector<8x1xf32>
    %719 = vector.broadcast %718 : vector<8x1xf32> to vector<8x8xf32>
    %720 = arith.mulf %715, %719 : vector<8x8xf32>
    %cst_243 = arith.constant dense<0.000000e+00> : vector<8x8xf32>
    %721 = tpu.matmul %720, %709, %cst_243 {dimension_numbers = #tpu.dot_dimension_numbers<[1], [0], [0], [1], [0, 0, 1, 1], [], []>} : vector<8x8xf32>, vector<8x8xf32>, vector<8x8xf32> -> vector<8x8xf32>
    %722 = vector.extract_strided_slice %677 {offsets = [0, 16], sizes = [8, 8], strides = [1, 1]} : vector<16x32xf32> to vector<8x8xf32>
    %cst_244 = arith.constant 0.353553385 : f32
    %723 = vector.broadcast %cst_244 : f32 to vector<8x8xf32>
    %724 = arith.mulf %722, %723 : vector<8x8xf32>
    %725 = vector.extract_strided_slice %682 {offsets = [0, 16], sizes = [8, 8], strides = [1, 1]} : vector<16x32xf32> to vector<8x8xf32>
    %726 = vector.extract_strided_slice %687 {offsets = [0, 16], sizes = [8, 8], strides = [1, 1]} : vector<16x32xf32> to vector<8x8xf32>
    %cst_245 = arith.constant dense<0.000000e+00> : vector<8x8xf32>
    %727 = tpu.matmul %724, %725, %cst_245 {dimension_numbers = #tpu.dot_dimension_numbers<[1], [1], [0], [0], [0, 0, 1, 0], [], []>} : vector<8x8xf32>, vector<8x8xf32>, vector<8x8xf32> -> vector<8x8xf32>
    %cst_246 = arith.constant dense<0xFF800000> : vector<8xf32>
    %728 = vector.multi_reduction <maximumf>, %727, %cst_246 [1] : vector<8x8xf32> to vector<8xf32>
    %729 = vector.shape_cast %728 : vector<8xf32> to vector<8x1xf32>
    %730 = vector.broadcast %729 : vector<8x1xf32> to vector<8x8xf32>
    %731 = arith.subf %727, %730 : vector<8x8xf32>
    %732 = math.exp %731 : vector<8x8xf32>
    %cst_247 = arith.constant dense<0.000000e+00> : vector<8xf32>
    %733 = vector.multi_reduction <add>, %732, %cst_247 [1] : vector<8x8xf32> to vector<8xf32>
    %734 = vector.shape_cast %733 : vector<8xf32> to vector<8x1xf32>
    %735 = tpu.reciprocal %734 {approx = true} : vector<8x1xf32> -> vector<8x1xf32>
    %736 = vector.broadcast %735 : vector<8x1xf32> to vector<8x8xf32>
    %737 = arith.mulf %732, %736 : vector<8x8xf32>
    %cst_248 = arith.constant dense<0.000000e+00> : vector<8x8xf32>
    %738 = tpu.matmul %737, %726, %cst_248 {dimension_numbers = #tpu.dot_dimension_numbers<[1], [0], [0], [1], [0, 0, 1, 1], [], []>} : vector<8x8xf32>, vector<8x8xf32>, vector<8x8xf32> -> vector<8x8xf32>
    %739 = vector.extract_strided_slice %677 {offsets = [0, 24], sizes = [8, 8], strides = [1, 1]} : vector<16x32xf32> to vector<8x8xf32>
    %cst_249 = arith.constant 0.353553385 : f32
    %740 = vector.broadcast %cst_249 : f32 to vector<8x8xf32>
    %741 = arith.mulf %739, %740 : vector<8x8xf32>
    %742 = vector.extract_strided_slice %682 {offsets = [0, 24], sizes = [8, 8], strides = [1, 1]} : vector<16x32xf32> to vector<8x8xf32>
    %743 = vector.extract_strided_slice %687 {offsets = [0, 24], sizes = [8, 8], strides = [1, 1]} : vector<16x32xf32> to vector<8x8xf32>
    %cst_250 = arith.constant dense<0.000000e+00> : vector<8x8xf32>
    %744 = tpu.matmul %741, %742, %cst_250 {dimension_numbers = #tpu.dot_dimension_numbers<[1], [1], [0], [0], [0, 0, 1, 0], [], []>} : vector<8x8xf32>, vector<8x8xf32>, vector<8x8xf32> -> vector<8x8xf32>
    %cst_251 = arith.constant dense<0xFF800000> : vector<8xf32>
    %745 = vector.multi_reduction <maximumf>, %744, %cst_251 [1] : vector<8x8xf32> to vector<8xf32>
    %746 = vector.shape_cast %745 : vector<8xf32> to vector<8x1xf32>
    %747 = vector.broadcast %746 : vector<8x1xf32> to vector<8x8xf32>
    %748 = arith.subf %744, %747 : vector<8x8xf32>
    %749 = math.exp %748 : vector<8x8xf32>
    %cst_252 = arith.constant dense<0.000000e+00> : vector<8xf32>
    %750 = vector.multi_reduction <add>, %749, %cst_252 [1] : vector<8x8xf32> to vector<8xf32>
    %751 = vector.shape_cast %750 : vector<8xf32> to vector<8x1xf32>
    %752 = tpu.reciprocal %751 {approx = true} : vector<8x1xf32> -> vector<8x1xf32>
    %753 = vector.broadcast %752 : vector<8x1xf32> to vector<8x8xf32>
    %754 = arith.mulf %749, %753 : vector<8x8xf32>
    %cst_253 = arith.constant dense<0.000000e+00> : vector<8x8xf32>
    %755 = tpu.matmul %754, %743, %cst_253 {dimension_numbers = #tpu.dot_dimension_numbers<[1], [0], [0], [1], [0, 0, 1, 1], [], []>} : vector<8x8xf32>, vector<8x8xf32>, vector<8x8xf32> -> vector<8x8xf32>
    %756 = tpu.concatenate %704, %721, %738, %755 in 1 : vector<8x8xf32>, vector<8x8xf32>, vector<8x8xf32>, vector<8x8xf32> -> vector<8x32xf32>
    %757 = vector.extract_strided_slice %677 {offsets = [8, 0], sizes = [8, 8], strides = [1, 1]} : vector<16x32xf32> to vector<8x8xf32>
    %cst_254 = arith.constant 0.353553385 : f32
    %758 = vector.broadcast %cst_254 : f32 to vector<8x8xf32>
    %759 = arith.mulf %757, %758 : vector<8x8xf32>
    %760 = vector.extract_strided_slice %682 {offsets = [8, 0], sizes = [8, 8], strides = [1, 1]} : vector<16x32xf32> to vector<8x8xf32>
    %761 = vector.extract_strided_slice %687 {offsets = [8, 0], sizes = [8, 8], strides = [1, 1]} : vector<16x32xf32> to vector<8x8xf32>
    %cst_255 = arith.constant dense<0.000000e+00> : vector<8x8xf32>
    %762 = tpu.matmul %759, %760, %cst_255 {dimension_numbers = #tpu.dot_dimension_numbers<[1], [1], [0], [0], [0, 0, 1, 0], [], []>} : vector<8x8xf32>, vector<8x8xf32>, vector<8x8xf32> -> vector<8x8xf32>
    %cst_256 = arith.constant dense<0xFF800000> : vector<8xf32>
    %763 = vector.multi_reduction <maximumf>, %762, %cst_256 [1] : vector<8x8xf32> to vector<8xf32>
    %764 = vector.shape_cast %763 : vector<8xf32> to vector<8x1xf32>
    %765 = vector.broadcast %764 : vector<8x1xf32> to vector<8x8xf32>
    %766 = arith.subf %762, %765 : vector<8x8xf32>
    %767 = math.exp %766 : vector<8x8xf32>
    %cst_257 = arith.constant dense<0.000000e+00> : vector<8xf32>
    %768 = vector.multi_reduction <add>, %767, %cst_257 [1] : vector<8x8xf32> to vector<8xf32>
    %769 = vector.shape_cast %768 : vector<8xf32> to vector<8x1xf32>
    %770 = tpu.reciprocal %769 {approx = true} : vector<8x1xf32> -> vector<8x1xf32>
    %771 = vector.broadcast %770 : vector<8x1xf32> to vector<8x8xf32>
    %772 = arith.mulf %767, %771 : vector<8x8xf32>
    %cst_258 = arith.constant dense<0.000000e+00> : vector<8x8xf32>
    %773 = tpu.matmul %772, %761, %cst_258 {dimension_numbers = #tpu.dot_dimension_numbers<[1], [0], [0], [1], [0, 0, 1, 1], [], []>} : vector<8x8xf32>, vector<8x8xf32>, vector<8x8xf32> -> vector<8x8xf32>
    %774 = vector.extract_strided_slice %677 {offsets = [8, 8], sizes = [8, 8], strides = [1, 1]} : vector<16x32xf32> to vector<8x8xf32>
    %cst_259 = arith.constant 0.353553385 : f32
    %775 = vector.broadcast %cst_259 : f32 to vector<8x8xf32>
    %776 = arith.mulf %774, %775 : vector<8x8xf32>
    %777 = vector.extract_strided_slice %682 {offsets = [8, 8], sizes = [8, 8], strides = [1, 1]} : vector<16x32xf32> to vector<8x8xf32>
    %778 = vector.extract_strided_slice %687 {offsets = [8, 8], sizes = [8, 8], strides = [1, 1]} : vector<16x32xf32> to vector<8x8xf32>
    %cst_260 = arith.constant dense<0.000000e+00> : vector<8x8xf32>
    %779 = tpu.matmul %776, %777, %cst_260 {dimension_numbers = #tpu.dot_dimension_numbers<[1], [1], [0], [0], [0, 0, 1, 0], [], []>} : vector<8x8xf32>, vector<8x8xf32>, vector<8x8xf32> -> vector<8x8xf32>
    %cst_261 = arith.constant dense<0xFF800000> : vector<8xf32>
    %780 = vector.multi_reduction <maximumf>, %779, %cst_261 [1] : vector<8x8xf32> to vector<8xf32>
    %781 = vector.shape_cast %780 : vector<8xf32> to vector<8x1xf32>
    %782 = vector.broadcast %781 : vector<8x1xf32> to vector<8x8xf32>
    %783 = arith.subf %779, %782 : vector<8x8xf32>
    %784 = math.exp %783 : vector<8x8xf32>
    %cst_262 = arith.constant dense<0.000000e+00> : vector<8xf32>
    %785 = vector.multi_reduction <add>, %784, %cst_262 [1] : vector<8x8xf32> to vector<8xf32>
    %786 = vector.shape_cast %785 : vector<8xf32> to vector<8x1xf32>
    %787 = tpu.reciprocal %786 {approx = true} : vector<8x1xf32> -> vector<8x1xf32>
    %788 = vector.broadcast %787 : vector<8x1xf32> to vector<8x8xf32>
    %789 = arith.mulf %784, %788 : vector<8x8xf32>
    %cst_263 = arith.constant dense<0.000000e+00> : vector<8x8xf32>
    %790 = tpu.matmul %789, %778, %cst_263 {dimension_numbers = #tpu.dot_dimension_numbers<[1], [0], [0], [1], [0, 0, 1, 1], [], []>} : vector<8x8xf32>, vector<8x8xf32>, vector<8x8xf32> -> vector<8x8xf32>
    %791 = vector.extract_strided_slice %677 {offsets = [8, 16], sizes = [8, 8], strides = [1, 1]} : vector<16x32xf32> to vector<8x8xf32>
    %cst_264 = arith.constant 0.353553385 : f32
    %792 = vector.broadcast %cst_264 : f32 to vector<8x8xf32>
    %793 = arith.mulf %791, %792 : vector<8x8xf32>
    %794 = vector.extract_strided_slice %682 {offsets = [8, 16], sizes = [8, 8], strides = [1, 1]} : vector<16x32xf32> to vector<8x8xf32>
    %795 = vector.extract_strided_slice %687 {offsets = [8, 16], sizes = [8, 8], strides = [1, 1]} : vector<16x32xf32> to vector<8x8xf32>
    %cst_265 = arith.constant dense<0.000000e+00> : vector<8x8xf32>
    %796 = tpu.matmul %793, %794, %cst_265 {dimension_numbers = #tpu.dot_dimension_numbers<[1], [1], [0], [0], [0, 0, 1, 0], [], []>} : vector<8x8xf32>, vector<8x8xf32>, vector<8x8xf32> -> vector<8x8xf32>
    %cst_266 = arith.constant dense<0xFF800000> : vector<8xf32>
    %797 = vector.multi_reduction <maximumf>, %796, %cst_266 [1] : vector<8x8xf32> to vector<8xf32>
    %798 = vector.shape_cast %797 : vector<8xf32> to vector<8x1xf32>
    %799 = vector.broadcast %798 : vector<8x1xf32> to vector<8x8xf32>
    %800 = arith.subf %796, %799 : vector<8x8xf32>
    %801 = math.exp %800 : vector<8x8xf32>
    %cst_267 = arith.constant dense<0.000000e+00> : vector<8xf32>
    %802 = vector.multi_reduction <add>, %801, %cst_267 [1] : vector<8x8xf32> to vector<8xf32>
    %803 = vector.shape_cast %802 : vector<8xf32> to vector<8x1xf32>
    %804 = tpu.reciprocal %803 {approx = true} : vector<8x1xf32> -> vector<8x1xf32>
    %805 = vector.broadcast %804 : vector<8x1xf32> to vector<8x8xf32>
    %806 = arith.mulf %801, %805 : vector<8x8xf32>
    %cst_268 = arith.constant dense<0.000000e+00> : vector<8x8xf32>
    %807 = tpu.matmul %806, %795, %cst_268 {dimension_numbers = #tpu.dot_dimension_numbers<[1], [0], [0], [1], [0, 0, 1, 1], [], []>} : vector<8x8xf32>, vector<8x8xf32>, vector<8x8xf32> -> vector<8x8xf32>
    %808 = vector.extract_strided_slice %677 {offsets = [8, 24], sizes = [8, 8], strides = [1, 1]} : vector<16x32xf32> to vector<8x8xf32>
    %cst_269 = arith.constant 0.353553385 : f32
    %809 = vector.broadcast %cst_269 : f32 to vector<8x8xf32>
    %810 = arith.mulf %808, %809 : vector<8x8xf32>
    %811 = vector.extract_strided_slice %682 {offsets = [8, 24], sizes = [8, 8], strides = [1, 1]} : vector<16x32xf32> to vector<8x8xf32>
    %812 = vector.extract_strided_slice %687 {offsets = [8, 24], sizes = [8, 8], strides = [1, 1]} : vector<16x32xf32> to vector<8x8xf32>
    %cst_270 = arith.constant dense<0.000000e+00> : vector<8x8xf32>
    %813 = tpu.matmul %810, %811, %cst_270 {dimension_numbers = #tpu.dot_dimension_numbers<[1], [1], [0], [0], [0, 0, 1, 0], [], []>} : vector<8x8xf32>, vector<8x8xf32>, vector<8x8xf32> -> vector<8x8xf32>
    %cst_271 = arith.constant dense<0xFF800000> : vector<8xf32>
    %814 = vector.multi_reduction <maximumf>, %813, %cst_271 [1] : vector<8x8xf32> to vector<8xf32>
    %815 = vector.shape_cast %814 : vector<8xf32> to vector<8x1xf32>
    %816 = vector.broadcast %815 : vector<8x1xf32> to vector<8x8xf32>
    %817 = arith.subf %813, %816 : vector<8x8xf32>
    %818 = math.exp %817 : vector<8x8xf32>
    %cst_272 = arith.constant dense<0.000000e+00> : vector<8xf32>
    %819 = vector.multi_reduction <add>, %818, %cst_272 [1] : vector<8x8xf32> to vector<8xf32>
    %820 = vector.shape_cast %819 : vector<8xf32> to vector<8x1xf32>
    %821 = tpu.reciprocal %820 {approx = true} : vector<8x1xf32> -> vector<8x1xf32>
    %822 = vector.broadcast %821 : vector<8x1xf32> to vector<8x8xf32>
    %823 = arith.mulf %818, %822 : vector<8x8xf32>
    %cst_273 = arith.constant dense<0.000000e+00> : vector<8x8xf32>
    %824 = tpu.matmul %823, %812, %cst_273 {dimension_numbers = #tpu.dot_dimension_numbers<[1], [0], [0], [1], [0, 0, 1, 1], [], []>} : vector<8x8xf32>, vector<8x8xf32>, vector<8x8xf32> -> vector<8x8xf32>
    %825 = tpu.concatenate %773, %790, %807, %824 in 1 : vector<8x8xf32>, vector<8x8xf32>, vector<8x8xf32>, vector<8x8xf32> -> vector<8x32xf32>
    %826 = tpu.concatenate %756, %825 in 0 : vector<8x32xf32>, vector<8x32xf32> -> vector<16x32xf32>
    %c3_274 = arith.constant 3 : index
    %c0_275 = arith.constant 0 : index
    %c0_276 = arith.constant 0 : index
    %827 = vector.load %arg4[%c3_274, %c0_275, %c0_276] : memref<4x32x32xf32, #tpu.memory_space<vmem>>, vector<1x32x32xf32>
    %828 = vector.shape_cast %827 : vector<1x32x32xf32> to vector<32x32xf32>
    %cst_277 = arith.constant dense<0.000000e+00> : vector<16x32xf32>
    %829 = tpu.matmul %826, %828, %cst_277 {dimension_numbers = #tpu.dot_dimension_numbers<[1], [0], [0], [1], [0, 0, 1, 1], [], []>} : vector<16x32xf32>, vector<32x32xf32>, vector<16x32xf32> -> vector<16x32xf32>
    %830 = vector.broadcast %669 : vector<1x32xf32> to vector<16x32xf32>
    %831 = arith.addf %829, %830 : vector<16x32xf32>
    %832 = arith.addf %663, %831 : vector<16x32xf32>
    %cst_278 = arith.constant dense<0.000000e+00> : vector<16xf32>
    %833 = vector.multi_reduction <add>, %832, %cst_278 [1] : vector<16x32xf32> to vector<16xf32>
    %834 = vector.shape_cast %833 : vector<16xf32> to vector<16x1xf32>
    %cst_279 = arith.constant 3.200000e+01 : f32
    %835 = vector.broadcast %cst_279 : f32 to vector<16x1xf32>
    %836 = arith.divf %834, %835 : vector<16x1xf32>
    %837 = vector.broadcast %836 : vector<16x1xf32> to vector<16x32xf32>
    %838 = arith.subf %832, %837 : vector<16x32xf32>
    %839 = arith.mulf %838, %838 : vector<16x32xf32>
    %cst_280 = arith.constant dense<0.000000e+00> : vector<16xf32>
    %840 = vector.multi_reduction <add>, %839, %cst_280 [1] : vector<16x32xf32> to vector<16xf32>
    %841 = vector.shape_cast %840 : vector<16xf32> to vector<16x1xf32>
    %cst_281 = arith.constant 3.200000e+01 : f32
    %842 = vector.broadcast %cst_281 : f32 to vector<16x1xf32>
    %843 = arith.divf %841, %842 : vector<16x1xf32>
    %844 = vector.broadcast %836 : vector<16x1xf32> to vector<16x32xf32>
    %845 = arith.subf %832, %844 : vector<16x32xf32>
    %cst_282 = arith.constant 9.99999974E-6 : f32
    %846 = vector.broadcast %cst_282 : f32 to vector<16x1xf32>
    %847 = arith.addf %843, %846 : vector<16x1xf32>
    %848 = math.rsqrt %847 : vector<16x1xf32>
    %849 = vector.broadcast %848 : vector<16x1xf32> to vector<16x32xf32>
    %850 = arith.mulf %845, %849 : vector<16x32xf32>
    %851 = vector.broadcast %671 : vector<1x32xf32> to vector<16x32xf32>
    %852 = arith.mulf %850, %851 : vector<16x32xf32>
    %853 = vector.broadcast %672 : vector<1x32xf32> to vector<16x32xf32>
    %854 = arith.addf %852, %853 : vector<16x32xf32>
    %c3_283 = arith.constant 3 : index
    %c0_284 = arith.constant 0 : index
    %c0_285 = arith.constant 0 : index
    %855 = vector.load %arg5[%c3_283, %c0_284, %c0_285] : memref<4x32x32xf32, #tpu.memory_space<vmem>>, vector<1x32x32xf32>
    %856 = vector.shape_cast %855 : vector<1x32x32xf32> to vector<32x32xf32>
    %cst_286 = arith.constant dense<0.000000e+00> : vector<16x32xf32>
    %857 = tpu.matmul %854, %856, %cst_286 {dimension_numbers = #tpu.dot_dimension_numbers<[1], [0], [0], [1], [0, 0, 1, 1], [], []>} : vector<16x32xf32>, vector<32x32xf32>, vector<16x32xf32> -> vector<16x32xf32>
    %858 = vector.broadcast %670 : vector<1x32xf32> to vector<16x32xf32>
    %859 = arith.addf %857, %858 : vector<16x32xf32>
    %cst_287 = arith.constant 0.000000e+00 : f32
    %860 = vector.broadcast %cst_287 : f32 to vector<16x32xf32>
    %861 = arith.maximumf %859, %860 : vector<16x32xf32>
    %862 = arith.addf %854, %861 : vector<16x32xf32>
    %cst_288 = arith.constant dense<0.000000e+00> : vector<16xf32>
    %863 = vector.multi_reduction <add>, %862, %cst_288 [1] : vector<16x32xf32> to vector<16xf32>
    %864 = vector.shape_cast %863 : vector<16xf32> to vector<16x1xf32>
    %cst_289 = arith.constant 3.200000e+01 : f32
    %865 = vector.broadcast %cst_289 : f32 to vector<16x1xf32>
    %866 = arith.divf %864, %865 : vector<16x1xf32>
    %867 = vector.broadcast %866 : vector<16x1xf32> to vector<16x32xf32>
    %868 = arith.subf %862, %867 : vector<16x32xf32>
    %869 = arith.mulf %868, %868 : vector<16x32xf32>
    %cst_290 = arith.constant dense<0.000000e+00> : vector<16xf32>
    %870 = vector.multi_reduction <add>, %869, %cst_290 [1] : vector<16x32xf32> to vector<16xf32>
    %871 = vector.shape_cast %870 : vector<16xf32> to vector<16x1xf32>
    %cst_291 = arith.constant 3.200000e+01 : f32
    %872 = vector.broadcast %cst_291 : f32 to vector<16x1xf32>
    %873 = arith.divf %871, %872 : vector<16x1xf32>
    %874 = vector.broadcast %866 : vector<16x1xf32> to vector<16x32xf32>
    %875 = arith.subf %862, %874 : vector<16x32xf32>
    %cst_292 = arith.constant 9.99999974E-6 : f32
    %876 = vector.broadcast %cst_292 : f32 to vector<16x1xf32>
    %877 = arith.addf %873, %876 : vector<16x1xf32>
    %878 = math.rsqrt %877 : vector<16x1xf32>
    %879 = vector.broadcast %878 : vector<16x1xf32> to vector<16x32xf32>
    %880 = arith.mulf %875, %879 : vector<16x32xf32>
    %881 = vector.broadcast %671 : vector<1x32xf32> to vector<16x32xf32>
    %882 = arith.mulf %880, %881 : vector<16x32xf32>
    %883 = vector.broadcast %672 : vector<1x32xf32> to vector<16x32xf32>
    %884 = arith.addf %882, %883 : vector<16x32xf32>
    %885 = vector.extract_strided_slice %884 {offsets = [0, 0], sizes = [8, 32], strides = [1, 1]} : vector<16x32xf32> to vector<8x32xf32>
    %886 = vector.extract_strided_slice %884 {offsets = [8, 0], sizes = [8, 32], strides = [1, 1]} : vector<16x32xf32> to vector<8x32xf32>
    %887 = arith.addf %885, %886 : vector<8x32xf32>
    %cst_293 = arith.constant 5.000000e-01 : f32
    %888 = vector.broadcast %cst_293 : f32 to vector<8x32xf32>
    %889 = arith.mulf %887, %888 : vector<8x32xf32>
    %c0_294 = arith.constant 0 : index
    %c0_295 = arith.constant 0 : index
    %890 = vector.load %arg7[%c0_294, %c0_295] : memref<32x1xf32, #tpu.memory_space<vmem>>, vector<32x1xf32>
    %cst_296 = arith.constant dense<0.000000e+00> : vector<8x1xf32>
    %891 = tpu.matmul %889, %890, %cst_296 {dimension_numbers = #tpu.dot_dimension_numbers<[1], [0], [0], [1], [0, 0, 1, 1], [], []>} : vector<8x32xf32>, vector<32x1xf32>, vector<8x1xf32> -> vector<8x1xf32>
    %c0_297 = arith.constant 0 : index
    %c0_298 = arith.constant 0 : index
    %892 = vector.load %arg8[%c0_297, %c0_298] : memref<1x1xf32, #tpu.memory_space<vmem>>, vector<1x1xf32>
    %893 = vector.broadcast %892 : vector<1x1xf32> to vector<8x1xf32>
    %894 = arith.addf %891, %893 : vector<8x1xf32>
    %895 = arith.negf %894 : vector<8x1xf32>
    %896 = math.exp %895 : vector<8x1xf32>
    %cst_299 = arith.constant 1.000000e+00 : f32
    %897 = vector.broadcast %cst_299 : f32 to vector<8x1xf32>
    %898 = arith.addf %897, %896 : vector<8x1xf32>
    %899 = arith.divf %897, %898 : vector<8x1xf32>
    %c0_300 = arith.constant 0 : index
    %c0_301 = arith.constant 0 : index
    %900 = vector.load %arg9[%c0_300, %c0_301] : memref<8x1xf32, #tpu.memory_space<vmem>>, vector<8x1xf32>
    tpu.vector_store %arg9[%c0_300, %c0_301], %899 {strides = array<i32>} : memref<8x1xf32, #tpu.memory_space<vmem>>, vector<8x1xf32>,
    return
  }
}

</mosaic_0001>

<bundles_post_ra>
// kernel: tpu_custom_call.1
= control target key start
LH: loop header
LB: loop body
LE: loop exit
PB: predicated region body
PF: predicated region fallthrough
CT: control target
= control target key end

     0   :  { %s9874_s0 = inlined_call_operand.hbm [shape: f32[16,32], index: 0, kind: input, shape index: {}]   ;;  %s9875_s1 = inlined_call_operand.hbm [shape: f32[4,32,32], index: 1, kind: input, shape index: {}]   ;;  %s9876_s2 = inlined_call_operand.hbm [shape: f32[4,32,32], index: 2, kind: input, shape index: {}]   ;;  %s9877_s3 = inlined_call_operand.hbm [shape: f32[4,32,32], index: 3, kind: input, shape index: {}]   ;;  %s9878_s4 = inlined_call_operand.hbm [shape: f32[4,32,32], index: 4, kind: input, shape index: {}]   ;;  %s9879_s5 = inlined_call_operand.hbm [shape: f32[4,32,32], index: 5, kind: input, shape index: {}]   ;;  %s9880_s6 = inlined_call_operand.vmem [shape: f32[4,8,32], index: 6, kind: input, shape index: {}]   ;;  %s9881_s7 = inlined_call_operand.vmem [shape: f32[32,1], index: 7, kind: input, shape index: {}]   ;;  %s9882_s8 = inlined_call_operand.<no memory space> [shape: f32[1,1], index: 8, kind: input, shape index: {}]   ;;  %s9883_s9 = inlined_call_operand.vmem [shape: f32[8,1], index: 9, kind: output, shape index: {}]  }
   0x1   :  { %v14_v0 = vstv %s9882_s8 }
   0x2   :  { %15 = vst [vmem:[#allocation2] sm:$0x1] %v14_v0 }
   0x3   :  { %16 = vsyncpa [#allocation4], 0 }
   0x4   :  { %17 = vsyncpa [#allocation6], 0 }
   0x5   :  { %18 = vsyncpa [#allocation9], 0 }
   0x6   :  { %19 = vsyncpa [#allocation12], 0  ;;  %s8904_s11 = smov [#allocation5]   ;;  %s8905_s13 = smov [#allocation8]  }
   0x7   :  { %s37_s12 = sshll.u32 %s8904_s11, 4  ;;  %s61_s14 = sshll.u32 %s8905_s13, 4  ;;  %s38_s12 = int_to_ptr.vmem [resolvable:$true] %s37_s12  ;;  %s62_s14 = int_to_ptr.vmem [resolvable:$true] %s61_s14 }
   0x8   :  { %s8784_s15 = scalar_lea.vmem %s38_s12, 2048  ;;  %p8789_p1 = scmp.lt.s32.totalorder %s38_s12, %s38_s12 }
   0x9   :  { %p8785_p0 = scmp.ne.s32.totalorder %s38_s12, %s8784_s15  ;;  %p8790_p2 = scmp.lt.s32.totalorder %s8784_s15, %s8784_s15 }
   0xb   :  { %p8791_p3 = por %p8790_p2, %p8789_p1 }
   0xd   :  { %p8792_p4 = pnand %p8791_p3, %p8785_p0 }
   0xf   :  { %8795 = shalt.err (!%p8792_p4)
}
  0x10   :  { %s8906_s16 = smov 128   ;;  %s8907_s8 = smov 8  }
  0x11   :  { %43 = dma.hbm_to_vmem [thread:$0]  %s9875_s1, 2048, %s38_s12, [#allocation6], %s8906_s16, %s8906_s16, %s8907_s8  }
  0x12   :  { %s8804_s19 = scalar_lea.vmem %s62_s14, 2048  ;;  %p8809_p6 = scmp.lt.s32.totalorder %s62_s14, %s62_s14 }
  0x13   :  { %p8805_p5 = scmp.ne.s32.totalorder %s62_s14, %s8804_s19  ;;  %p8810_p7 = scmp.lt.s32.totalorder %s8804_s19, %s8804_s19 }
  0x15   :  { %p8811_p8 = por %p8810_p7, %p8809_p6 }
  0x17   :  { %p8812_p9 = pnand %p8811_p8, %p8805_p5 }
  0x19   :  { %8815 = shalt.err (!%p8812_p9)
}
  0x1a   :  { %67 = dma.hbm_to_vmem [thread:$0]  %s9877_s3, 2048, %s62_s14, [#allocation9], %s8906_s16, %s8906_s16, %s8907_s8  }
  0x1b   :  { %s8908_s22 = smov [#allocation3]   ;;  %s8909_s24 = smov [#allocation7]  }
  0x1c   :  { %s25_s23 = sshll.u32 %s8908_s22, 4  ;;  %s49_s25 = sshll.u32 %s8909_s24, 4  ;;  %s26_s23 = int_to_ptr.vmem [resolvable:$true] %s25_s23  ;;  %s50_s25 = int_to_ptr.vmem [resolvable:$true] %s49_s25 }
  0x1d   :  { %s8824_s1 = scalar_lea.vmem %s26_s23, 256  ;;  %p8829_p11 = scmp.lt.s32.totalorder %s26_s23, %s26_s23 }
  0x1e   :  { %p8825_p10 = scmp.ne.s32.totalorder %s26_s23, %s8824_s1  ;;  %p8830_p12 = scmp.lt.s32.totalorder %s8824_s1, %s8824_s1 }
  0x20   :  { %p8831_p13 = por %p8830_p12, %p8829_p11 }
  0x22   :  { %p8832_p0 = pnand %p8831_p13, %p8825_p10 }
  0x24   :  { %8835 = shalt.err (!%p8832_p0)
}
  0x25   :  { %31 = dma.hbm_to_vmem [thread:$0]  %s9874_s0, 256, %s26_s23, [#allocation4], %s8906_s16, %s8906_s16, %s8907_s8  }
  0x26   :  { %s8844_s3 = scalar_lea.vmem %s50_s25, 2048  ;;  %p8849_p2 = scmp.lt.s32.totalorder %s50_s25, %s50_s25 }
  0x27   :  { %p8845_p1 = scmp.ne.s32.totalorder %s50_s25, %s8844_s3  ;;  %p8850_p3 = scmp.lt.s32.totalorder %s8844_s3, %s8844_s3 }
  0x29   :  { %p8851_p4 = por %p8850_p3, %p8849_p2 }
  0x2b   :  { %p8852_p5 = pnand %p8851_p4, %p8845_p1 }
  0x2d   :  { %8855 = shalt.err (!%p8852_p5)
}
  0x2e   :  { %55 = dma.hbm_to_vmem [thread:$0]  %s9876_s2, 2048, %s50_s25, [#allocation6], %s8906_s16, %s8906_s16, %s8907_s8  }
  0x2f   :  { %s8910_s30 = smov [#allocation10]   ;;  %s8911_s11 = smov [#allocation11]  }
  0x30   :  { %s73_s10 = sshll.u32 %s8910_s30, 4  ;;  %s85_s12 = sshll.u32 %s8911_s11, 4  ;;  %s74_s10 = int_to_ptr.vmem [resolvable:$true] %s73_s10  ;;  %s86_s12 = int_to_ptr.vmem [resolvable:$true] %s85_s12 }
  0x31   :  { %s8864_s0 = scalar_lea.vmem %s74_s10, 2048  ;;  %p8869_p7 = scmp.lt.s32.totalorder %s74_s10, %s74_s10 }
  0x32   :  { %p8865_p6 = scmp.ne.s32.totalorder %s74_s10, %s8864_s0  ;;  %p8870_p8 = scmp.lt.s32.totalorder %s8864_s0, %s8864_s0 }
  0x34   :  { %p8871_p9 = por %p8870_p8, %p8869_p7 }
  0x36   :  { %p8872_p10 = pnand %p8871_p9, %p8865_p6 }
  0x38   :  { %8875 = shalt.err (!%p8872_p10)
}
  0x39   :  { %79 = dma.hbm_to_vmem [thread:$0]  %s9878_s4, 2048, %s74_s10, [#allocation9], %s8906_s16, %s8906_s16, %s8907_s8  }
  0x3a   :  { %s8884_s2 = scalar_lea.vmem %s86_s12, 2048  ;;  %p8889_p12 = scmp.lt.s32.totalorder %s86_s12, %s86_s12 }
  0x3b   :  { %p8885_p11 = scmp.ne.s32.totalorder %s86_s12, %s8884_s2  ;;  %p8890_p13 = scmp.lt.s32.totalorder %s8884_s2, %s8884_s2 }
  0x3d   :  { %p8891_p0 = por %p8890_p13, %p8889_p12 }
  0x3f   :  { %p8892_p1 = pnand %p8891_p0, %p8885_p11 }
  0x41   :  { %8895 = shalt.err (!%p8892_p1)
}
  0x42   :  { %91 = dma.hbm_to_vmem [thread:$0]  %s9879_s5, 2048, %s86_s12, [#allocation12], %s8906_s16, %s8906_s16, %s8907_s8  }
  0x43   :  { %8896 = dma.done.wait [#allocation4], 256  }
  0x44   :  { %8897 = vsyncadd [#allocation4], 4294967040 }
  0x45   :  { %8898 = dma.done.wait [#allocation6], 4096  }
  0x46   :  { %8899 = vsyncadd [#allocation6], 4294963200 }
  0x47   :  { %8900 = dma.done.wait [#allocation9], 4096  }
  0x48   :  { %8901 = vsyncadd [#allocation9], 4294963200 }
  0x49   :  { %8902 = dma.done.wait [#allocation12], 2048  }
  0x4a   :  { %8903 = vsyncadd [#allocation12], 4294965248  ;;  %v122_v1 = vld [vmem:[#allocation5 + $0x18] sm:$0xff]  ;;  %v121_v3 = vld [vmem:[#allocation5 + $0x10] sm:$0xff]  ;;  %vm127_vm0 = vcmask 261120   ;;  %v8912_v11 = vmov 0.0   ;;  %v123_v12 = vlaneseq }
  0x4b   :  { %v212_v2 = vld [vmem:[#allocation7 + $0x18] sm:$0xff]  ;;  %8046 = vmatprep.subr.mxu0 %v122_v1  ;;  %v211_v4 = vld [vmem:[#allocation7 + $0x10] sm:$0xff]  ;;  %v120_v5 = vld [vmem:[#allocation5 + $0x8] sm:$0xff]  ;;  %vm8913_vm1 = vmmov 0   ;;  %vm376_vm2 = vcmask 64512   ;;  %s8914_s16 = smov 120  }
  0x4c   :  { %8057 = vmatprep.subr.mxu1 %v212_v2  ;;  %8047 = vmatpush3.msra.mxu0 %v122_v1  ;;  %v210_v6 = vld [vmem:[#allocation7 + $0x8] sm:$0xff]  ;;  %v119_v7 = vld [vmem:[#allocation5] sm:$0xff]  ;;  %v9008_v9 = vld [vmem:[#allocation3] sm:$0xff]  ;;  %v9025_v13 = vshrl.u32 %v123_v12, 7  ;;  %s8915_s18 = smov 112   ;;  %s8916_s19 = smov 104  }
  0x4d   :  { %8058 = vmatpush3.msra.mxu1 %v212_v2  ;;  %8048 = vmatprep.subr.mxu0 %v121_v3  ;;  %v209_v8 = vld [vmem:[#allocation7] sm:$0xff]  ;;  %v9010_v10 = vld [vmem:[#allocation3 + $0x8] sm:$0xff]  ;;  %v9033_v15 = vld [vmem:[%s9880_s6] sm:$0xff]  ;;  %s8917_s20 = smov 16   ;;  %s8918_s21 = smov 24   ;;  %vm1046_vm3 = vcmask 130048  }
  0x4e   :  { %8059 = vmatprep.subr.mxu1 %v211_v4  ;;  %8049 = vmatpush3.msra.mxu0 %v121_v3  ;;  %v9028_v14 = vsub.s32 0, %v9025_v13  ;;  %v9036_v16 = vsub.s32 1, %v9025_v13  ;;  %v295_v29 = vld [vmem:[#allocation8 + $0x18] sm:$0xff]  ;;  %v294_v30 = vld [vmem:[#allocation8 + $0x10] sm:$0xff]  ;;  %v293_v31 = vld [vmem:[#allocation8 + $0x8] sm:$0xff]  ;;  %v9067_v41 = vsub.s32 2, %v9025_v13 }
  0x4f   :  { %8060 = vmatpush3.msra.mxu1 %v211_v4  ;;  %8050 = vmatprep.subr.mxu0 %v120_v5  ;;  %v292_v32 = vld [vmem:[#allocation8] sm:$0xff]  ;;  %vm1048_vm4 = vcmask 195584   ;;  %vm7641_vm5 = vcmask 7168  }
  0x50   :  { %8061 = vmatprep.subr.mxu1 %v210_v6  ;;  %8051 = vmatpush3.msra.mxu0 %v120_v5  ;;  %v126_v17 = vrot.slane %v9033_v15, %v9028_v14  ;;  %v216_v20 = vrot.slane %v9033_v15, %v9036_v16  ;;  %v299_v43 = vrot.slane %v9033_v15, %v9067_v41 }
  0x51   :  { %8062 = vmatpush3.msra.mxu1 %v210_v6  ;;  %8052 = vmatprep.subr.mxu0 %v119_v7 }
  0x52   :  { %8063 = vmatprep.subr.mxu1 %v209_v8  ;;  %8053 = vmatpush3.msra.mxu0 %v119_v7 }
  0x53   :  { %8054 = vmatprep.mubr.msk.f32.mxu0 %vm127_vm0, %v9008_v9  ;;  %8064 = vmatpush3.msra.mxu1 %v209_v8 }
  0x54   :  { %8065 = vmatprep.mubr.msk.f32.mxu1 %vm127_vm0, %v9008_v9  ;;  %8055 = vmatmul.mubr.msk.f32.vlgmr.msra.gmra.mxu0 %vm127_vm0, %v9010_v10 }
  0x55   :  { %8066 = vmatmul.mubr.msk.f32.vlgmr.msra.gmra.mxu1 %vm127_vm0, %v9010_v10  ;;  %8076 = vmatprep.mubr.msk.f32.mxu0 %vm127_vm0, %v9008_v9 }
  0x56   :  { %8079 = vmatprep.subr.mxu1 %v8912_v11  ;;  %8081 = vmatprep.mubr.msk.f32.mxu1 %vm8913_vm1, %v8912_v11 }
  0x57   :  { %8068 = vmatprep.subr.mxu0 %v295_v29 }
  0x58   :  { %8069 = vmatpush3.msra.mxu0 %v295_v29 }
  0x59   :  { %8070 = vmatprep.subr.mxu0 %v294_v30 }
  0x5a   :  { %8071 = vmatpush3.msra.mxu0 %v294_v30 }
  0x5b   :  { %8072 = vmatprep.subr.mxu0 %v293_v31 }
  0x5c   :  { %8073 = vmatpush3.msra.mxu0 %v293_v31 }
  0x5d   :  { %8074 = vmatprep.subr.mxu0 %v292_v32 }
  0x5e   :  { %8075 = vmatpush3.msra.mxu0 %v292_v32 }
  0x5f   :  { %8077 = vmatmul.mubr.msk.f32.vlgmr.msra.gmra.mxu0 %vm127_vm0, %v9010_v10  ;;  %8099 = vmatprep.subr.mxu0 %v8912_v11 }
  0x60   :  { %8101 = vmatprep.mubr.msk.f32.mxu0 %vm8913_vm1, %v8912_v11 }
 0x114   :  { %v8056_v18 = vpop.f32.mrf.mxu0 }
 0x115   :  { %v8067_v19 = vpop.f32.mrf.mxu1  ;;  %v206_v26 = vadd.f32 %v8056_v18, %v126_v17 }
 0x116   :  { %v200_v21 = vpop.f32.mrf.mxu0  ;;  %v289_v27 = vadd.f32 %v8067_v19, %v216_v20 }
 0x117   :  { %v283_v22 = vpop.f32.mrf.mxu1  ;;  %v201_v23 = vadd.f32 %v200_v21, %v126_v17  ;;  %v9053_v28 = vmul.f32 0.35355338, %v206_v26 }
 0x118   :  { %v284_v24 = vadd.f32 %v283_v22, %v216_v20 }
 0x119   :  { %v375_v25 = vmul.f32 0.35355338, %v201_v23 }
 0x11a   :  { %539 = vrot.lane.b32.xlu1 %v284_v24, %s8914_s16  ;;  %8080 = vmatpush3.xpose.msk.msra.mxu1 %vm376_vm2, %v284_v24 }
 0x11b   :  { %8084 = vmatprep.subr.mxu1 %v8912_v11 }
 0x11d   :  { %8082 = vmatmul.mubr.msk.f32.vlgmr.msra.gmra.mxu1 %vm376_vm2, %v375_v25 }
 0x11e   :  { %537 = vrot.lane.b32.xlu1 %v375_v25, %s8914_s16  ;;  %8086 = vmatprep.mubr.msk.f32.mxu1 %vm8913_vm1, %v8912_v11 }
 0x11f   :  { %v8078_v42 = vpop.f32.mrf.mxu0 }
 0x120   :  { %v9072_v45 = vadd.f32 %v8078_v42, %v299_v43 }
 0x121   :  { %v366_v44 = vpop.f32.mrf.mxu0 }
 0x122   :  { %703 = vrot.lane.b32.xlu1 %v375_v25, %s8915_s18  ;;  %v9074_v46 = vadd.f32 %v366_v44, %v299_v43 }
 0x124   :  { %8085 = vmatpush3.msra.mxu1 %v9074_v46 }
 0x125   :  { %8089 = vmatprep.subr.mxu1 %v8912_v11 }
 0x126   :  { %870 = vrot.lane.b32.xlu1 %v284_v24, %s8916_s19 }
 0x12a   :  { %868 = vrot.lane.b32.xlu1 %v375_v25, %s8916_s19 }
 0x12e   :  { %1213 = vrot.lane.b32.xlu1 %v289_v27, %s8914_s16 }
 0x132   :  { %1211 = vrot.lane.b32.xlu1 %v9053_v28, %s8914_s16 }
 0x136   :  { %1379 = vrot.lane.b32.xlu1 %v289_v27, %s8915_s18 }
 0x13a   :  { %1544 = vrot.lane.b32.xlu1 %v289_v27, %s8916_s19 }
 0x18c   :  { %v540_v47 = vpop.permute.xlu1 %539 }
 0x190   :  { %v538_v48 = vpop.permute.xlu1 %537 }
 0x194   :  { %v704_v49 = vpop.permute.xlu1 %703 }
 0x198   :  { %v871_v50 = vpop.permute.xlu1 %870 }
 0x19c   :  { %v869_v51 = vpop.permute.xlu1 %868 }
 0x1a0   :  { %v1214_v54 = vpop.permute.xlu1 %1213 }
 0x1a4   :  { %v1212_v55 = vpop.permute.xlu1 %1211 }
 0x1a8   :  { %v1380_v58 = vpop.permute.xlu1 %1379 }
 0x1ac   :  { %v1545_v60 = vpop.permute.xlu1 %1544 }
 0x1dd   :  { %v449_v33 = vpop.f32.mrf.mxu1 }
 0x1de   :  { %v453_v34 = vsel %vm376_vm2, %v449_v33, -inf }
 0x1df   :  { %454 = vmax.xlane.f32.xlu0 %v453_v34  ;;  %v8083_v35 = vpop.f32.mrf.mxu1 }
 0x268   :  { %v455_v36 = vpop.xlane.xlu0 %454 }
 0x269   :  { %v456_v37 = vsub.f32 %v449_v33, %v455_v36 }
 0x26b   :  { %v457_v38 = vmul.f32 1.442695, %v456_v37 }
 0x26d   :  { %8612 = vpow2.f32 %v457_v38 }
 0x27a   :  { %v8613_v39 = vpop.eup %8612 }
 0x27b   :  { %v459_v40 = vsel %vm376_vm2, %v8613_v39, 0.0 }
 0x27c   :  { %460 = vadd.xlane.f32.xlu0 %v459_v40 }
 0x292   :  { %705 = vrot.lane.b32.xlu0 %v284_v24, %s8915_s18 }
 0x296   :  { %1377 = vrot.lane.b32.xlu0 %v9053_v28, %s8915_s18 }
 0x29a   :  { %1542 = vrot.lane.b32.xlu0 %v9053_v28, %s8916_s19 }
 0x305   :  { %v461_v52 = vpop.xlane.xlu0 %460 }
 0x306   :  { %8614 = vrcp.f32 %v461_v52 }
 0x309   :  { %v706_v53 = vpop.permute.xlu0 %705 }
 0x30a   :  { %8100 = vmatpush3.xpose.msk.msra.mxu0 %vm376_vm2, %v706_v53 }
 0x30b   :  { %8109 = vmatprep.subr.mxu0 %v8912_v11 }
 0x30d   :  { %8102 = vmatmul.mubr.msk.f32.vlgmr.msra.gmra.mxu0 %vm376_vm2, %v704_v49  ;;  %v1378_v59 = vpop.permute.xlu0 %1377 }
 0x30e   :  { %8110 = vmatpush3.xpose.msk.msra.mxu0 %vm376_vm2, %v871_v50  ;;  %8111 = vmatprep.mubr.msk.f32.mxu0 %vm8913_vm1, %v8912_v11 }
 0x30f   :  { %8119 = vmatprep.subr.mxu0 %v8912_v11 }
 0x311   :  { %8112 = vmatmul.mubr.msk.f32.vlgmr.msra.gmra.mxu0 %vm376_vm2, %v869_v51  ;;  %v1543_v61 = vpop.permute.xlu0 %1542 }
 0x312   :  { %8120 = vmatpush3.xpose.msk.msra.mxu0 %vm376_vm2, %v289_v27  ;;  %8121 = vmatprep.mubr.msk.f32.mxu0 %vm8913_vm1, %v8912_v11 }
 0x313   :  { %v8615_v56 = vpop.eup %8614  ;;  %8129 = vmatprep.subr.mxu0 %v8912_v11 }
 0x314   :  { %v463_v57 = vmul.f32 %v8615_v56, %v8613_v39 }
 0x315   :  { %8122 = vmatmul.mubr.msk.f32.vlgmr.msra.gmra.mxu0 %vm376_vm2, %v9053_v28 }
 0x316   :  { %8087 = vmatmul.mubr.msk.f32.vlgmr.msra.gmra.mxu1 %vm376_vm2, %v463_v57  ;;  %8130 = vmatpush3.xpose.msk.msra.mxu0 %vm376_vm2, %v1214_v54 }
 0x317   :  { %8090 = vmatpush3.xpose.msk.msra.mxu1 %vm376_vm2, %v540_v47  ;;  %8131 = vmatprep.mubr.msk.f32.mxu0 %vm8913_vm1, %v8912_v11 }
 0x318   :  { %8091 = vmatprep.mubr.msk.f32.mxu1 %vm8913_vm1, %v8912_v11  ;;  %8139 = vmatprep.subr.mxu0 %v8912_v11 }
 0x319   :  { %8132 = vmatmul.mubr.msk.f32.vlgmr.msra.gmra.mxu0 %vm376_vm2, %v1212_v55  ;;  %8094 = vmatprep.subr.mxu1 %v8912_v11 }
 0x31a   :  { %8092 = vmatmul.mubr.msk.f32.vlgmr.msra.gmra.mxu1 %vm376_vm2, %v538_v48  ;;  %8140 = vmatpush3.xpose.msk.msra.mxu0 %vm376_vm2, %v1380_v58 }
 0x31b   :  { %8141 = vmatprep.mubr.msk.f32.mxu0 %vm8913_vm1, %v8912_v11  ;;  %8149 = vmatprep.subr.mxu0 %v8912_v11 }
 0x31c   :  { %8096 = vmatprep.mubr.msk.f32.mxu1 %vm8913_vm1, %v8912_v11 }
 0x31d   :  { %8142 = vmatmul.mubr.msk.f32.vlgmr.msra.gmra.mxu0 %vm376_vm2, %v1378_v59 }
 0x31e   :  { %8150 = vmatpush3.xpose.msk.msra.mxu0 %vm376_vm2, %v1545_v60  ;;  %8151 = vmatprep.mubr.msk.f32.mxu0 %vm8913_vm1, %v8912_v11 }
 0x321   :  { %8152 = vmatmul.mubr.msk.f32.vlgmr.msra.gmra.mxu0 %vm376_vm2, %v1543_v61 }
 0x3cd   :  { %v777_v62 = vpop.f32.mrf.mxu0 }
 0x3ce   :  { %v781_v63 = vsel %vm376_vm2, %v777_v62, -inf }
 0x3cf   :  { %782 = vmax.xlane.f32.xlu0 %v781_v63  ;;  %v8103_v0 = vpop.f32.mrf.mxu0 }
 0x3d1   :  { %v942_v1 = vpop.f32.mrf.mxu0 }
 0x3d2   :  { %v946_v2 = vsel %vm376_vm2, %v942_v1, -inf }
 0x3d3   :  { %947 = vmax.xlane.f32.xlu0 %v946_v2  ;;  %v8113_v3 = vpop.f32.mrf.mxu0 }
 0x3d5   :  { %v1123_v4 = vpop.f32.mrf.mxu0 }
 0x3d6   :  { %v9120_v5 = vpop.f32.mrf.mxu1  ;;  %v1127_v23 = vsel %vm376_vm2, %v1123_v4, -inf }
 0x3d7   :  { %v8123_v6 = vpop.f32.mrf.mxu0 }
 0x3d8   :  { %v8088_v7 = vpop.f32.mrf.mxu1 }
 0x3d9   :  { %v1285_v8 = vpop.f32.mrf.mxu0 }
 0x3da   :  { %v9122_v12 = vpop.f32.mrf.mxu1  ;;  %v1289_v17 = vsel %vm376_vm2, %v1285_v8, -inf }
 0x3db   :  { %1290 = vmax.xlane.f32.xlu0 %v1289_v17  ;;  %v8133_v18 = vpop.f32.mrf.mxu0  ;;  %v615_v19 = vsel %vm376_vm2, %v9122_v12, -inf }
 0x3dc   :  { %616 = vmax.xlane.f32.xlu1 %v615_v19  ;;  %v8093_v20 = vpop.f32.mrf.mxu1 }
 0x3dd   :  { %v1451_v21 = vpop.f32.mrf.mxu0 }
 0x3de   :  { %v1455_v27 = vsel %vm376_vm2, %v1451_v21, -inf }
 0x3df   :  { %v8143_v22 = vpop.f32.mrf.mxu0 }
 0x3e0   :  { %1128 = vmax.xlane.f32.xlu1 %v1127_v23 }
 0x3e1   :  { %v1616_v24 = vpop.f32.mrf.mxu0 }
 0x3e2   :  { %v1620_v25 = vsel %vm376_vm2, %v1616_v24, -inf }
 0x3e3   :  { %1621 = vmax.xlane.f32.xlu0 %v1620_v25  ;;  %v8153_v26 = vpop.f32.mrf.mxu0 }
 0x3e4   :  { %1456 = vmax.xlane.f32.xlu1 %v1455_v27 }
 0x458   :  { %v783_v28 = vpop.xlane.xlu0 %782 }
 0x459   :  { %v784_v29 = vsub.f32 %v777_v62, %v783_v28 }
 0x45b   :  { %v785_v30 = vmul.f32 1.442695, %v784_v29 }
 0x45c   :  { %v948_v31 = vpop.xlane.xlu0 %947 }
 0x45d   :  { %8616 = vpow2.f32 %v785_v30  ;;  %v949_v32 = vsub.f32 %v942_v1, %v948_v31 }
 0x45f   :  { %v950_v33 = vmul.f32 1.442695, %v949_v32 }
 0x461   :  { %8618 = vpow2.f32 %v950_v33 }
 0x464   :  { %v1291_v34 = vpop.xlane.xlu0 %1290 }
 0x465   :  { %v1292_v35 = vsub.f32 %v1285_v8, %v1291_v34  ;;  %v617_v36 = vpop.xlane.xlu1 %616 }
 0x466   :  { %v618_v62 = vsub.f32 %v9122_v12, %v617_v36 }
 0x467   :  { %v1293_v37 = vmul.f32 1.442695, %v1292_v35 }
 0x468   :  { %v619_v63 = vmul.f32 1.442695, %v618_v62 }
 0x469   :  { %8620 = vpow2.f32 %v1293_v37  ;;  %v1129_v38 = vpop.xlane.xlu1 %1128 }
 0x46a   :  { %v9130_v39 = vpop.eup %8616  ;;  %v1130_v40 = vsub.f32 %v1123_v4, %v1129_v38  ;;  %v1725_v38 = vld [vmem:[#allocation10 + $0x18] sm:$0xff] }
 0x46b   :  { %v787_v42 = vsel %vm376_vm2, %v9130_v39, 0.0  ;;  %8159 = vmatprep.subr.mxu0 %v1725_v38 }
 0x46c   :  { %v1131_v43 = vmul.f32 1.442695, %v1130_v40  ;;  %788 = vadd.xlane.f32.xlu0 %v787_v42  ;;  %v1622_v44 = vpop.xlane.xlu0 %1621  ;;  %8160 = vmatpush3.msra.mxu0 %v1725_v38 }
 0x46d   :  { %v1623_v47 = vsub.f32 %v1616_v24, %v1622_v44  ;;  %v1457_v48 = vpop.xlane.xlu1 %1456  ;;  %v1722_v44 = vld [vmem:[#allocation10] sm:$0xff] }
 0x46e   :  { %v9134_v49 = vpop.eup %8618  ;;  %8622 = vpow2.f32 %v1131_v43  ;;  %v1458_v50 = vsub.f32 %v1451_v21, %v1457_v48  ;;  %v1723_v43 = vld [vmem:[#allocation10 + $0x8] sm:$0xff] }
 0x46f   :  { %v1624_v51 = vmul.f32 1.442695, %v1623_v47  ;;  %v952_v52 = vsel %vm376_vm2, %v9134_v49, 0.0 }
 0x470   :  { %v1459_v53 = vmul.f32 1.442695, %v1458_v50  ;;  %953 = vadd.xlane.f32.xlu1 %v952_v52 }
 0x471   :  { %8624 = vpow2.f32 %v1624_v51 }
 0x472   :  { %8626 = vpow2.f32 %v1459_v53 }
 0x473   :  { %8628 = vpow2.f32 %v619_v63 }
 0x476   :  { %v9138_v54 = vpop.eup %8620 }
 0x477   :  { %v1295_v55 = vsel %vm376_vm2, %v9138_v54, 0.0 }
 0x478   :  { %1296 = vadd.xlane.f32.xlu1 %v1295_v55 }
 0x47b   :  { %v8623_v56 = vpop.eup %8622 }
 0x47c   :  { %v1133_v57 = vsel %vm376_vm2, %v8623_v56, 0.0 }
 0x47d   :  { %1134 = vadd.xlane.f32.xlu0 %v1133_v57 }
 0x47e   :  { %v9143_v58 = vpop.eup %8624 }
 0x47f   :  { %v9145_v59 = vpop.eup %8626  ;;  %v1626_v60 = vsel %vm376_vm2, %v9143_v58, 0.0 }
 0x480   :  { %1627 = vadd.xlane.f32.xlu1 %v1626_v60  ;;  %v1461_v61 = vsel %vm376_vm2, %v9145_v59, 0.0  ;;  %v8629_v0 = vpop.eup %8628 }
 0x481   :  { %1462 = vadd.xlane.f32.xlu0 %v1461_v61  ;;  %v621_v1 = vsel %vm376_vm2, %v8629_v0, 0.0 }
 0x491   :  { %792 = vrot.lane.b32.xlu1 %v9074_v46, %s8915_s18 }
 0x497   :  { %627 = vrot.lane.b32.xlu0 %v9074_v46, %s8914_s16 }
 0x49b   :  { %1301 = vrot.lane.b32.xlu0 %v9072_v45, %s8914_s16 }
 0x49f   :  { %1631 = vrot.lane.b32.xlu0 %v9072_v45, %s8916_s19 }
 0x4b5   :  { %622 = vadd.xlane.f32.xlu1 %v621_v1 }
 0x4c6   :  { %957 = vrot.lane.b32.xlu1 %v9074_v46, %s8916_s19 }
 0x4ca   :  { %1466 = vrot.lane.b32.xlu1 %v9072_v45, %s8915_s18 }
 0x4f5   :  { %v789_v2 = vpop.xlane.xlu0 %788 }
 0x4f9   :  { %v954_v7 = vpop.xlane.xlu1 %953 }
 0x501   :  { %v1297_v8 = vpop.xlane.xlu1 %1296 }
 0x506   :  { %v1135_v3 = vpop.xlane.xlu0 %1134 }
 0x509   :  { %v1628_v12 = vpop.xlane.xlu1 %1627 }
 0x50a   :  { %v1463_v4 = vpop.xlane.xlu0 %1462 }
 0x50d   :  { %v793_v17 = vpop.permute.xlu1 %792 }
 0x50e   :  { %v628_v6 = vpop.permute.xlu0 %627 }
 0x50f   :  { %8095 = vmatpush3.msra.mxu1 %v628_v6 }
 0x510   :  { %8104 = vmatprep.subr.mxu1 %v8912_v11 }
 0x512   :  { %v1302_v28 = vpop.permute.xlu0 %1301 }
 0x516   :  { %v1632_v33 = vpop.permute.xlu0 %1631 }
 0x53e   :  { %v623_v18 = vpop.xlane.xlu1 %622 }
 0x53f   :  { %8630 = vrcp.f32 %v623_v18 }
 0x540   :  { %8632 = vrcp.f32 %v789_v2 }
 0x541   :  { %8634 = vrcp.f32 %v954_v7 }
 0x542   :  { %8636 = vrcp.f32 %v1135_v3  ;;  %v958_v23 = vpop.permute.xlu1 %957 }
 0x543   :  { %8638 = vrcp.f32 %v1297_v8 }
 0x544   :  { %8640 = vrcp.f32 %v1463_v4 }
 0x545   :  { %8642 = vrcp.f32 %v1628_v12 }
 0x54c   :  { %v8631_v46 = vpop.eup %8630 }
 0x54d   :  { %v625_v19 = vmul.f32 %v8631_v46, %v8629_v0  ;;  %v8633_v20 = vpop.eup %8632 }
 0x54e   :  { %v791_v21 = vmul.f32 %v8633_v20, %v9130_v39  ;;  %v8635_v22 = vpop.eup %8634  ;;  %v1724_v39 = vld [vmem:[#allocation10 + $0x10] sm:$0xff] }
 0x54f   :  { %8097 = vmatmul.mubr.msk.f32.vlgmr.msra.gmra.mxu1 %vm376_vm2, %v625_v19  ;;  %v956_v24 = vmul.f32 %v8635_v22, %v9134_v49  ;;  %v8637_v25 = vpop.eup %8636  ;;  %8161 = vmatprep.subr.mxu0 %v1724_v39 }
 0x550   :  { %8105 = vmatpush3.msra.mxu1 %v793_v17  ;;  %8106 = vmatprep.mubr.msk.f32.mxu1 %vm8913_vm1, %v8912_v11  ;;  %v1137_v26 = vmul.f32 %v8637_v25, %v8623_v56  ;;  %v8639_v27 = vpop.eup %8638 }
 0x551   :  { %8114 = vmatprep.subr.mxu1 %v8912_v11  ;;  %v1299_v29 = vmul.f32 %v8639_v27, %v9138_v54  ;;  %v8641_v30 = vpop.eup %8640  ;;  %8162 = vmatpush3.msra.mxu0 %v1724_v39 }
 0x552   :  { %v1465_v31 = vmul.f32 %v8641_v30, %v9145_v59  ;;  %v8643_v32 = vpop.eup %8642  ;;  %8163 = vmatprep.subr.mxu0 %v1723_v43  ;;  %v1853_v30 = vld [vmem:[#allocation11 + $0x8] sm:$0xff] }
 0x553   :  { %8107 = vmatmul.mubr.msk.f32.vlgmr.msra.gmra.mxu1 %vm376_vm2, %v791_v21  ;;  %v1630_v34 = vmul.f32 %v8643_v32, %v9143_v58  ;;  %8164 = vmatpush3.msra.mxu0 %v1723_v43 }
 0x554   :  { %8115 = vmatpush3.msra.mxu1 %v958_v23  ;;  %8116 = vmatprep.mubr.msk.f32.mxu1 %vm8913_vm1, %v8912_v11 }
 0x555   :  { %8124 = vmatprep.subr.mxu1 %v8912_v11  ;;  %8165 = vmatprep.subr.mxu0 %v1722_v44 }
 0x556   :  { %8166 = vmatpush3.msra.mxu0 %v1722_v44 }
 0x557   :  { %8117 = vmatmul.mubr.msk.f32.vlgmr.msra.gmra.mxu1 %vm376_vm2, %v956_v24 }
 0x558   :  { %8125 = vmatpush3.msra.mxu1 %v9072_v45  ;;  %8126 = vmatprep.mubr.msk.f32.mxu1 %vm8913_vm1, %v8912_v11  ;;  %v1467_v45 = vpop.permute.xlu1 %1466 }
 0x559   :  { %8134 = vmatprep.subr.mxu1 %v8912_v11 }
 0x55b   :  { %8127 = vmatmul.mubr.msk.f32.vlgmr.msra.gmra.mxu1 %vm376_vm2, %v1137_v26 }
 0x55c   :  { %8135 = vmatpush3.msra.mxu1 %v1302_v28  ;;  %8136 = vmatprep.mubr.msk.f32.mxu1 %vm8913_vm1, %v8912_v11 }
 0x55d   :  { %8144 = vmatprep.subr.mxu1 %v8912_v11 }
 0x55f   :  { %8137 = vmatmul.mubr.msk.f32.vlgmr.msra.gmra.mxu1 %vm376_vm2, %v1299_v29  ;;  %v1855_v29 = vld [vmem:[#allocation11 + $0x18] sm:$0xff] }
 0x560   :  { %8145 = vmatpush3.msra.mxu1 %v1467_v45  ;;  %8146 = vmatprep.mubr.msk.f32.mxu1 %vm8913_vm1, %v8912_v11  ;;  %v1852_v45 = vld [vmem:[#allocation11] sm:$0xff] }
 0x561   :  { %8154 = vmatprep.subr.mxu1 %v8912_v11 }
 0x563   :  { %8147 = vmatmul.mubr.msk.f32.vlgmr.msra.gmra.mxu1 %vm376_vm2, %v1465_v31 }
 0x564   :  { %8155 = vmatpush3.msra.mxu1 %v1632_v33  ;;  %8156 = vmatprep.mubr.msk.f32.mxu1 %vm8913_vm1, %v8912_v11 }
 0x565   :  { %8170 = vmatprep.subr.mxu1 %v1855_v29 }
 0x567   :  { %8157 = vmatmul.mubr.msk.f32.vlgmr.msra.gmra.mxu1 %vm376_vm2, %v1630_v34 }
 0x568   :  { %8171 = vmatpush3.msra.mxu1 %v1855_v29 }
 0x60f   :  { %v699_v35 = vpop.f32.mrf.mxu1 }
 0x610   :  { %1034 = vrot.lane.b32.xlu1 %v699_v35, %s8907_s8 }
 0x611   :  { %v8098_v36 = vpop.f32.mrf.mxu1 }
 0x613   :  { %v864_v37 = vpop.f32.mrf.mxu1 }
 0x614   :  { %1038 = vrot.lane.b32.xlu0 %v864_v37, %s8917_s20  ;;  %v9223_v37 = vsub.s32 5, %v9025_v13 }
 0x615   :  { %v8108_v40 = vpop.f32.mrf.mxu1 }
 0x616   :  { %v9227_v39 = vrot.slane %v9033_v15, %v9223_v37  ;;  %v9230_v40 = vsub.s32 6, %v9025_v13 }
 0x617   :  { %v1029_v42 = vpop.f32.mrf.mxu1 }
 0x618   :  { %1042 = vrot.lane.b32.xlu0 %v1029_v42, %s8918_s21 }
 0x619   :  { %v8118_v47 = vpop.f32.mrf.mxu1 }
 0x61a   :  { %v9234_v47 = vrot.slane %v9033_v15, %v9230_v40 }
 0x61b   :  { %v1207_v48 = vpop.f32.mrf.mxu1 }
 0x61d   :  { %v8128_v49 = vpop.f32.mrf.mxu1 }
 0x61f   :  { %v1373_v50 = vpop.f32.mrf.mxu1 }
 0x620   :  { %1708 = vrot.lane.b32.xlu1 %v1373_v50, %s8907_s8 }
 0x621   :  { %v8138_v51 = vpop.f32.mrf.mxu1 }
 0x623   :  { %v1538_v52 = vpop.f32.mrf.mxu1 }
 0x624   :  { %1712 = vrot.lane.b32.xlu1 %v1538_v52, %s8917_s20  ;;  %v9243_v52 = vsub.s32 4, %v9025_v13 }
 0x625   :  { %v8148_v53 = vpop.f32.mrf.mxu1 }
 0x626   :  { %v1859_v53 = vrot.slane %v9033_v15, %v9243_v52 }
 0x627   :  { %v1703_v54 = vpop.f32.mrf.mxu1 }
 0x628   :  { %1716 = vrot.lane.b32.xlu0 %v1703_v54, %s8918_s21 }
 0x629   :  { %v8158_v55 = vpop.f32.mrf.mxu1 }
 0x682   :  { %v1035_v56 = vpop.permute.xlu1 %1034 }
 0x683   :  { %v1045_v58 = vsel %vm376_vm2, %v9120_v5, %v1035_v56  ;;  %v9212_v5 = vsub.s32 3, %v9025_v13 }
 0x685   :  { %v1729_v4 = vrot.slane %v9033_v15, %v9212_v5 }
 0x686   :  { %v1039_v57 = vpop.permute.xlu0 %1038 }
 0x687   :  { %v1047_v59 = vsel %vm1046_vm3, %v1045_v58, %v1039_v57 }
 0x68a   :  { %v1043_v60 = vpop.permute.xlu0 %1042 }
 0x68b   :  { %v1049_v61 = vsel %vm1048_vm4, %v1047_v59, %v1043_v60 }
 0x68c   :  { %8167 = vmatprep.mubr.msk.f32.mxu0 %vm127_vm0, %v1049_v61 }
 0x692   :  { %v1709_v62 = vpop.permute.xlu1 %1708 }
 0x693   :  { %v1719_v0 = vsel %vm376_vm2, %v1207_v48, %v1709_v62 }
 0x696   :  { %v1713_v63 = vpop.permute.xlu1 %1712 }
 0x697   :  { %v1720_v1 = vsel %vm1046_vm3, %v1719_v0, %v1713_v63 }
 0x69a   :  { %v1717_v2 = vpop.permute.xlu0 %1716 }
 0x69b   :  { %v1721_v3 = vsel %vm1048_vm4, %v1720_v1, %v1717_v2 }
 0x69c   :  { %8168 = vmatmul.mubr.msk.f32.vlgmr.msra.gmra.mxu0 %vm127_vm0, %v1721_v3 }
 0x75c   :  { %v8169_v6 = vpop.f32.mrf.mxu0 }
 0x75d   :  { %v1808_v7 = vadd.f32 %v8169_v6, %v1729_v4 }
 0x75e   :  { %v1802_v8 = vpop.f32.mrf.mxu0 }
 0x75f   :  { %v1803_v12 = vadd.f32 %v1802_v8, %v1729_v4  ;;  %v1812_v17 = vadd.f32 %v1808_v7, %v9010_v10 }
 0x761   :  { %v1816_v18 = vsel %vm127_vm0, %v1812_v17, 0.0  ;;  %v1811_v46 = vadd.f32 %v1803_v12, %v9008_v9  ;;  %v1854_v9 = vld [vmem:[#allocation11 + $0x10] sm:$0xff]  ;;  %v1981_v12 = vld [vmem:[#allocation5 + $0x38] sm:$0xff] }
 0x762   :  { %1817 = vadd.xlane.f32.xlu0 %v1816_v18  ;;  %8172 = vmatprep.subr.mxu1 %v1854_v9  ;;  %v1980_v18 = vld [vmem:[#allocation5 + $0x30] sm:$0xff] }
 0x763   :  { %v1813_v19 = vsel %vm127_vm0, %v1811_v46, 0.0  ;;  %8173 = vmatpush3.msra.mxu1 %v1854_v9  ;;  %8181 = vmatprep.subr.mxu0 %v1981_v12 }
 0x764   :  { %1814 = vadd.xlane.f32.xlu1 %v1813_v19  ;;  %8174 = vmatprep.subr.mxu1 %v1853_v30  ;;  %v1979_v19 = vld [vmem:[#allocation5 + $0x28] sm:$0xff] }
 0x765   :  { %8175 = vmatpush3.msra.mxu1 %v1853_v30  ;;  %8182 = vmatpush3.msra.mxu0 %v1981_v12 }
 0x766   :  { %8176 = vmatprep.subr.mxu1 %v1852_v45  ;;  %8183 = vmatprep.subr.mxu0 %v1980_v18 }
 0x767   :  { %8177 = vmatpush3.msra.mxu1 %v1852_v45  ;;  %8184 = vmatpush3.msra.mxu0 %v1980_v18 }
 0x768   :  { %8185 = vmatprep.subr.mxu0 %v1979_v19 }
 0x769   :  { %8186 = vmatpush3.msra.mxu0 %v1979_v19 }
 0x7eb   :  { %v1818_v20 = vpop.xlane.xlu0 %1817 }
 0x7ec   :  { %v1821_v21 = vmul.f32 0.03125, %v1818_v20  ;;  %v2069_v20 = vld [vmem:[#allocation7 + $0x28] sm:$0xff] }
 0x7ed   :  { %v1815_v22 = vpop.xlane.xlu1 %1814 }
 0x7ee   :  { %v1823_v23 = vsub.f32 %v1812_v17, %v1821_v21  ;;  %v1820_v24 = vmul.f32 0.03125, %v1815_v22  ;;  %v2071_v17 = vld [vmem:[#allocation7 + $0x38] sm:$0xff]  ;;  %v1978_v21 = vld [vmem:[#allocation5 + $0x20] sm:$0xff] }
 0x7ef   :  { %8192 = vmatprep.subr.mxu1 %v2071_v17  ;;  %v2068_v22 = vld [vmem:[#allocation7 + $0x20] sm:$0xff]  ;;  %8187 = vmatprep.subr.mxu0 %v1978_v21 }
 0x7f0   :  { %v1822_v25 = vsub.f32 %v1811_v46, %v1820_v24  ;;  %v1825_v26 = vmul.f32 %v1823_v23, %v1823_v23  ;;  %v2070_v46 = vld [vmem:[#allocation7 + $0x30] sm:$0xff]  ;;  %8188 = vmatpush3.msra.mxu0 %v1978_v21 }
 0x7f2   :  { %v1829_v27 = vsel %vm127_vm0, %v1825_v26, 0.0  ;;  %v1824_v28 = vmul.f32 %v1822_v25, %v1822_v25 }
 0x7f3   :  { %1830 = vadd.xlane.f32.xlu1 %v1829_v27 }
 0x7f4   :  { %v1826_v10 = vsel %vm127_vm0, %v1824_v28, 0.0 }
 0x7f5   :  { %1827 = vadd.xlane.f32.xlu0 %v1826_v10 }
 0x87c   :  { %v1831_v31 = vpop.xlane.xlu1 %1830 }
 0x87d   :  { %v1833_v32 = vmul.f32 0.03125, %v1831_v31 }
 0x87e   :  { %v1828_v33 = vpop.xlane.xlu0 %1827 }
 0x87f   :  { %v1835_v34 = vadd.f32 1e-05, %v1833_v32  ;;  %v1832_v35 = vmul.f32 0.03125, %v1828_v33 }
 0x881   :  { %8644 = vrsqrt.f32 %v1835_v34  ;;  %v1834_v36 = vadd.f32 1e-05, %v1832_v35  ;;  %v2154_v35 = vld [vmem:[#allocation8 + $0x30] sm:$0xff] }
 0x883   :  { %8646 = vrsqrt.f32 %v1834_v36  ;;  %v2153_v36 = vld [vmem:[#allocation8 + $0x28] sm:$0xff] }
 0x88e   :  { %v8645_v38 = vpop.eup %8644 }
 0x88f   :  { %v1839_v42 = vmul.f32 %v8645_v38, %v1823_v23  ;;  %v2155_v23 = vld [vmem:[#allocation8 + $0x38] sm:$0xff]  ;;  %v2152_v38 = vld [vmem:[#allocation8 + $0x20] sm:$0xff] }
 0x890   :  { %v8647_v43 = vpop.eup %8646  ;;  %8203 = vmatprep.subr.mxu0 %v2155_v23 }
 0x891   :  { %v1838_v44 = vmul.f32 %v8647_v43, %v1822_v25  ;;  %v1845_v48 = vmul.f32 %v9227_v39, %v1839_v42 }
 0x893   :  { %v1844_v49 = vmul.f32 %v9227_v39, %v1838_v44  ;;  %v1851_v51 = vadd.f32 %v9234_v47, %v1845_v48 }
 0x895   :  { %v1850_v50 = vadd.f32 %v9234_v47, %v1844_v49 }
 0x897   :  { %8178 = vmatprep.mubr.msk.f32.mxu1 %vm127_vm0, %v1850_v50 }
 0x898   :  { %8179 = vmatmul.mubr.msk.f32.vlgmr.msra.gmra.mxu1 %vm127_vm0, %v1851_v51 }
 0x899   :  { %8193 = vmatpush3.msra.mxu1 %v2071_v17 }
 0x89a   :  { %8194 = vmatprep.subr.mxu1 %v2070_v46 }
 0x89b   :  { %8195 = vmatpush3.msra.mxu1 %v2070_v46 }
 0x89c   :  { %8196 = vmatprep.subr.mxu1 %v2069_v20 }
 0x89d   :  { %8197 = vmatpush3.msra.mxu1 %v2069_v20 }
 0x89e   :  { %8198 = vmatprep.subr.mxu1 %v2068_v22 }
 0x89f   :  { %8199 = vmatpush3.msra.mxu1 %v2068_v22 }
 0x8a0   :  { %8214 = vmatprep.subr.mxu1 %v8912_v11 }
 0x958   :  { %v8180_v54 = vpop.f32.mrf.mxu1 }
 0x959   :  { %v1938_v55 = vadd.f32 %v8180_v54, %v1859_v53 }
 0x95a   :  { %v1932_v56 = vpop.f32.mrf.mxu1 }
 0x95b   :  { %v1942_v57 = vmax.f32 %v1938_v55, 0.0  ;;  %v1933_v58 = vadd.f32 %v1932_v56, %v1859_v53 }
 0x95d   :  { %v1941_v59 = vmax.f32 %v1933_v58, 0.0  ;;  %v1944_v60 = vadd.f32 %v1942_v57, %v1851_v51 }
 0x95f   :  { %v1948_v61 = vsel %vm127_vm0, %v1944_v60, 0.0  ;;  %v1943_v62 = vadd.f32 %v1941_v59, %v1850_v50 }
 0x960   :  { %1949 = vadd.xlane.f32.xlu1 %v1948_v61 }
 0x961   :  { %v1945_v63 = vsel %vm127_vm0, %v1943_v62, 0.0 }
 0x962   :  { %1946 = vadd.xlane.f32.xlu0 %v1945_v63 }
 0x9e9   :  { %v1950_v0 = vpop.xlane.xlu1 %1949 }
 0x9ea   :  { %v1952_v13 = vmul.f32 0.03125, %v1950_v0 }
 0x9eb   :  { %v1947_v1 = vpop.xlane.xlu0 %1946 }
 0x9ec   :  { %v1954_v2 = vsub.f32 %v1944_v60, %v1952_v13  ;;  %v1951_v3 = vmul.f32 0.03125, %v1947_v1 }
 0x9ee   :  { %v1953_v15 = vsub.f32 %v1943_v62, %v1951_v3  ;;  %v1956_v4 = vmul.f32 %v1954_v2, %v1954_v2 }
 0x9f0   :  { %v1960_v6 = vsel %vm127_vm0, %v1956_v4, 0.0  ;;  %v1955_v7 = vmul.f32 %v1953_v15, %v1953_v15 }
 0x9f1   :  { %1961 = vadd.xlane.f32.xlu1 %v1960_v6 }
 0x9f2   :  { %v1957_v8 = vsel %vm127_vm0, %v1955_v7, 0.0 }
 0x9f3   :  { %1958 = vadd.xlane.f32.xlu0 %v1957_v8 }
 0xa7a   :  { %v1962_v24 = vpop.xlane.xlu1 %1961 }
 0xa7b   :  { %v1964_v25 = vmul.f32 0.03125, %v1962_v24 }
 0xa7c   :  { %v1959_v26 = vpop.xlane.xlu0 %1958 }
 0xa7d   :  { %v1966_v27 = vadd.f32 1e-05, %v1964_v25  ;;  %v1963_v28 = vmul.f32 0.03125, %v1959_v26 }
 0xa7f   :  { %8648 = vrsqrt.f32 %v1966_v27  ;;  %v1965_v10 = vadd.f32 1e-05, %v1963_v28 }
 0xa81   :  { %8650 = vrsqrt.f32 %v1965_v10 }
 0xa8c   :  { %v8649_v29 = vpop.eup %8648 }
 0xa8d   :  { %v1970_v9 = vmul.f32 %v8649_v29, %v1954_v2 }
 0xa8e   :  { %v8651_v30 = vpop.eup %8650 }
 0xa8f   :  { %v1969_v45 = vmul.f32 %v8651_v30, %v1953_v15  ;;  %v1972_v31 = vmul.f32 %v1970_v9, %v9227_v39 }
 0xa91   :  { %v1971_v32 = vmul.f32 %v1969_v45, %v9227_v39  ;;  %v9258_v34 = vadd.f32 %v1972_v31, %v9234_v47  ;;  %v9280_v39 = vld [vmem:[%s9880_s6 + $0x8] sm:$0xff] }
 0xa92   :  { %v1985_v44 = vrot.slane %v9280_v39, %v9028_v14  ;;  %v2159_v54 = vrot.slane %v9280_v39, %v9067_v41 }
 0xa93   :  { %v9255_v33 = vadd.f32 %v1971_v32, %v9234_v47  ;;  %v2075_v47 = vrot.slane %v9280_v39, %v9036_v16 }
 0xa95   :  { %8189 = vmatprep.mubr.msk.f32.mxu0 %vm127_vm0, %v9255_v33  ;;  %8200 = vmatprep.mubr.msk.f32.mxu1 %vm127_vm0, %v9255_v33 }
 0xa96   :  { %8190 = vmatmul.mubr.msk.f32.vlgmr.msra.gmra.mxu0 %vm127_vm0, %v9258_v34  ;;  %8201 = vmatmul.mubr.msk.f32.vlgmr.msra.gmra.mxu1 %vm127_vm0, %v9258_v34 }
 0xa97   :  { %8204 = vmatpush3.msra.mxu0 %v2155_v23  ;;  %8211 = vmatprep.mubr.msk.f32.mxu0 %vm127_vm0, %v9255_v33 }
 0xa98   :  { %8205 = vmatprep.subr.mxu0 %v2154_v35  ;;  %8216 = vmatprep.mubr.msk.f32.mxu1 %vm8913_vm1, %v8912_v11 }
 0xa99   :  { %8206 = vmatpush3.msra.mxu0 %v2154_v35 }
 0xa9a   :  { %8207 = vmatprep.subr.mxu0 %v2153_v36 }
 0xa9b   :  { %8208 = vmatpush3.msra.mxu0 %v2153_v36 }
 0xa9c   :  { %8209 = vmatprep.subr.mxu0 %v2152_v38 }
 0xa9d   :  { %8210 = vmatpush3.msra.mxu0 %v2152_v38 }
 0xa9e   :  { %8212 = vmatmul.mubr.msk.f32.vlgmr.msra.gmra.mxu0 %vm127_vm0, %v9258_v34  ;;  %8224 = vmatprep.subr.mxu0 %v8912_v11 }
 0xa9f   :  { %8226 = vmatprep.mubr.msk.f32.mxu0 %vm8913_vm1, %v8912_v11 }
 0xb56   :  { %v8191_v42 = vpop.f32.mrf.mxu0  ;;  %v8202_v43 = vpop.f32.mrf.mxu1 }
 0xb57   :  { %v2064_v58 = vadd.f32 %v8191_v42, %v1985_v44  ;;  %v2148_v61 = vadd.f32 %v8202_v43, %v2075_v47 }
 0xb58   :  { %v2058_v48 = vpop.f32.mrf.mxu0  ;;  %v2142_v49 = vpop.f32.mrf.mxu1 }
 0xb59   :  { %v2059_v50 = vadd.f32 %v2058_v48, %v1985_v44  ;;  %v2143_v51 = vadd.f32 %v2142_v49, %v2075_v47  ;;  %v2907_v60 = vmul.f32 0.35355338, %v2064_v58 }
 0xb5b   :  { %v2235_v53 = vmul.f32 0.35355338, %v2059_v50  ;;  %2398 = vrot.lane.b32.xlu0 %v2143_v51, %s8914_s16  ;;  %8215 = vmatpush3.xpose.msk.msra.mxu1 %vm376_vm2, %v2143_v51 }
 0xb5c   :  { %8219 = vmatprep.subr.mxu1 %v8912_v11 }
 0xb5d   :  { %2396 = vrot.lane.b32.xlu1 %v2235_v53, %s8914_s16 }
 0xb5e   :  { %v8213_v55 = vpop.f32.mrf.mxu0  ;;  %8217 = vmatmul.mubr.msk.f32.vlgmr.msra.gmra.mxu1 %vm376_vm2, %v2235_v53 }
 0xb5f   :  { %v9293_v56 = vadd.f32 %v8213_v55, %v2159_v54  ;;  %2562 = vrot.lane.b32.xlu0 %v2235_v53, %s8915_s18  ;;  %8221 = vmatprep.mubr.msk.f32.mxu1 %vm8913_vm1, %v8912_v11 }
 0xb60   :  { %v2226_v57 = vpop.f32.mrf.mxu0 }
 0xb61   :  { %v9298_v59 = vadd.f32 %v2226_v57, %v2159_v54  ;;  %2564 = vrot.lane.b32.xlu1 %v2143_v51, %s8915_s18 }
 0xb63   :  { %8220 = vmatpush3.msra.mxu1 %v9298_v59  ;;  %2727 = vrot.lane.b32.xlu0 %v2235_v53, %s8916_s19 }
 0xb64   :  { %8229 = vmatprep.subr.mxu1 %v8912_v11 }
 0xb65   :  { %2729 = vrot.lane.b32.xlu1 %v2143_v51, %s8916_s19 }
 0xb67   :  { %3068 = vrot.lane.b32.xlu0 %v2907_v60, %s8914_s16 }
 0xb69   :  { %3070 = vrot.lane.b32.xlu1 %v2148_v61, %s8914_s16 }
 0xb6b   :  { %3234 = vrot.lane.b32.xlu0 %v2907_v60, %s8915_s18 }
 0xb6d   :  { %3236 = vrot.lane.b32.xlu1 %v2148_v61, %s8915_s18 }
 0xb6f   :  { %3399 = vrot.lane.b32.xlu0 %v2907_v60, %s8916_s19 }
 0xb71   :  { %3401 = vrot.lane.b32.xlu1 %v2148_v61, %s8916_s19 }
 0xbcd   :  { %v2399_v62 = vpop.permute.xlu0 %2398 }
 0xbce   :  { %8225 = vmatpush3.xpose.msk.msra.mxu0 %vm376_vm2, %v2399_v62 }
 0xbcf   :  { %v2397_v63 = vpop.permute.xlu1 %2396  ;;  %8234 = vmatprep.subr.mxu0 %v8912_v11 }
 0xbd1   :  { %8227 = vmatmul.mubr.msk.f32.vlgmr.msra.gmra.mxu0 %vm376_vm2, %v2397_v63  ;;  %v2563_v0 = vpop.permute.xlu0 %2562 }
 0xbd2   :  { %8236 = vmatprep.mubr.msk.f32.mxu0 %vm8913_vm1, %v8912_v11 }
 0xbd3   :  { %v2565_v13 = vpop.permute.xlu1 %2564 }
 0xbd4   :  { %8235 = vmatpush3.xpose.msk.msra.mxu0 %vm376_vm2, %v2565_v13 }
 0xbd5   :  { %8244 = vmatprep.subr.mxu0 %v8912_v11  ;;  %v2728_v2 = vpop.permute.xlu0 %2727 }
 0xbd7   :  { %8237 = vmatmul.mubr.msk.f32.vlgmr.msra.gmra.mxu0 %vm376_vm2, %v2563_v0  ;;  %v2730_v1 = vpop.permute.xlu1 %2729 }
 0xbd8   :  { %8245 = vmatpush3.xpose.msk.msra.mxu0 %vm376_vm2, %v2730_v1  ;;  %8246 = vmatprep.mubr.msk.f32.mxu0 %vm8913_vm1, %v8912_v11 }
 0xbd9   :  { %8254 = vmatprep.subr.mxu0 %v8912_v11  ;;  %v3069_v15 = vpop.permute.xlu0 %3068 }
 0xbdb   :  { %8247 = vmatmul.mubr.msk.f32.vlgmr.msra.gmra.mxu0 %vm376_vm2, %v2728_v2  ;;  %v3071_v3 = vpop.permute.xlu1 %3070 }
 0xbdc   :  { %8255 = vmatpush3.xpose.msk.msra.mxu0 %vm376_vm2, %v2148_v61  ;;  %8256 = vmatprep.mubr.msk.f32.mxu0 %vm8913_vm1, %v8912_v11 }
 0xbdd   :  { %8264 = vmatprep.subr.mxu0 %v8912_v11  ;;  %v3235_v6 = vpop.permute.xlu0 %3234 }
 0xbdf   :  { %8257 = vmatmul.mubr.msk.f32.vlgmr.msra.gmra.mxu0 %vm376_vm2, %v2907_v60  ;;  %v3237_v4 = vpop.permute.xlu1 %3236 }
 0xbe0   :  { %8265 = vmatpush3.xpose.msk.msra.mxu0 %vm376_vm2, %v3071_v3  ;;  %8266 = vmatprep.mubr.msk.f32.mxu0 %vm8913_vm1, %v8912_v11 }
 0xbe1   :  { %8274 = vmatprep.subr.mxu0 %v8912_v11  ;;  %v3400_v8 = vpop.permute.xlu0 %3399 }
 0xbe3   :  { %8267 = vmatmul.mubr.msk.f32.vlgmr.msra.gmra.mxu0 %vm376_vm2, %v3069_v15  ;;  %v3402_v7 = vpop.permute.xlu1 %3401 }
 0xbe4   :  { %8275 = vmatpush3.xpose.msk.msra.mxu0 %vm376_vm2, %v3237_v4  ;;  %8276 = vmatprep.mubr.msk.f32.mxu0 %vm8913_vm1, %v8912_v11 }
 0xbe5   :  { %8284 = vmatprep.subr.mxu0 %v8912_v11 }
 0xbe7   :  { %8277 = vmatmul.mubr.msk.f32.vlgmr.msra.gmra.mxu0 %vm376_vm2, %v3235_v6 }
 0xbe8   :  { %8285 = vmatpush3.xpose.msk.msra.mxu0 %vm376_vm2, %v3402_v7  ;;  %8286 = vmatprep.mubr.msk.f32.mxu0 %vm8913_vm1, %v8912_v11 }
 0xbeb   :  { %8287 = vmatmul.mubr.msk.f32.vlgmr.msra.gmra.mxu0 %vm376_vm2, %v3400_v8 }
 0xc1e   :  { %v2308_v12 = vpop.f32.mrf.mxu1 }
 0xc1f   :  { %v2312_v17 = vsel %vm376_vm2, %v2308_v12, -inf }
 0xc20   :  { %2313 = vmax.xlane.f32.xlu1 %v2312_v17  ;;  %v8218_v18 = vpop.f32.mrf.mxu1 }
 0xc91   :  { %v2470_v46 = vpop.f32.mrf.mxu0 }
 0xc92   :  { %v2474_v19 = vsel %vm376_vm2, %v2470_v46, -inf }
 0xc93   :  { %2475 = vmax.xlane.f32.xlu0 %v2474_v19  ;;  %v8228_v20 = vpop.f32.mrf.mxu0 }
 0xc97   :  { %v2636_v21 = vpop.f32.mrf.mxu0 }
 0xc98   :  { %v2640_v22 = vsel %vm376_vm2, %v2636_v21, -inf }
 0xc99   :  { %2641 = vmax.xlane.f32.xlu0 %v2640_v22  ;;  %v8238_v23 = vpop.f32.mrf.mxu0 }
 0xc9b   :  { %v2801_v24 = vpop.f32.mrf.mxu0 }
 0xc9c   :  { %v2805_v25 = vsel %vm376_vm2, %v2801_v24, -inf }
 0xc9d   :  { %v8248_v26 = vpop.f32.mrf.mxu0  ;;  %2806 = vmax.xlane.f32.xlu1 %v2805_v25 }
 0xc9f   :  { %v2980_v27 = vpop.f32.mrf.mxu0 }
 0xca0   :  { %v2984_v28 = vsel %vm376_vm2, %v2980_v27, -inf }
 0xca1   :  { %2985 = vmax.xlane.f32.xlu0 %v2984_v28  ;;  %v8258_v10 = vpop.f32.mrf.mxu0 }
 0xca3   :  { %v3142_v29 = vpop.f32.mrf.mxu0 }
 0xca4   :  { %v3146_v9 = vsel %vm376_vm2, %v3142_v29, -inf }
 0xca5   :  { %v8268_v30 = vpop.f32.mrf.mxu0  ;;  %3147 = vmax.xlane.f32.xlu1 %v3146_v9 }
 0xca7   :  { %v9349_v45 = vpop.f32.mrf.mxu0 }
 0xca8   :  { %v3312_v31 = vsel %vm376_vm2, %v9349_v45, -inf }
 0xca9   :  { %3313 = vmax.xlane.f32.xlu0 %v3312_v31  ;;  %v8278_v32 = vpop.f32.mrf.mxu0  ;;  %v2314_v42 = vpop.xlane.xlu1 %2313 }
 0xcaa   :  { %v2315_v43 = vsub.f32 %v2308_v12, %v2314_v42 }
 0xcab   :  { %v3473_v35 = vpop.f32.mrf.mxu0 }
 0xcac   :  { %v3477_v36 = vsel %vm376_vm2, %v3473_v35, -inf  ;;  %v2316_v44 = vmul.f32 1.442695, %v2315_v43 }
 0xcad   :  { %v8288_v38 = vpop.f32.mrf.mxu0  ;;  %3478 = vmax.xlane.f32.xlu1 %v3477_v36 }
 0xcae   :  { %8652 = vpow2.f32 %v2316_v44 }
 0xcbb   :  { %v8653_v47 = vpop.eup %8652 }
 0xcbc   :  { %v2318_v48 = vsel %vm376_vm2, %v8653_v47, 0.0 }
 0xcbe   :  { %2651 = vrot.lane.b32.xlu1 %v9298_v59, %s8915_s18 }
 0xcbf   :  { %2486 = vrot.lane.b32.xlu0 %v9298_v59, %s8914_s16 }
 0xcc2   :  { %2816 = vrot.lane.b32.xlu1 %v9298_v59, %s8916_s19 }
 0xcde   :  { %2319 = vadd.xlane.f32.xlu0 %v2318_v48 }
 0xd1c   :  { %v2476_v49 = vpop.xlane.xlu0 %2475 }
 0xd1d   :  { %v2477_v50 = vsub.f32 %v2470_v46, %v2476_v49 }
 0xd1f   :  { %v2478_v51 = vmul.f32 1.442695, %v2477_v50 }
 0xd21   :  { %8654 = vpow2.f32 %v2478_v51 }
 0xd22   :  { %v2642_v53 = vpop.xlane.xlu0 %2641 }
 0xd23   :  { %v2643_v54 = vsub.f32 %v2636_v21, %v2642_v53 }
 0xd25   :  { %v2644_v55 = vmul.f32 1.442695, %v2643_v54 }
 0xd26   :  { %v2807_v57 = vpop.xlane.xlu1 %2806 }
 0xd27   :  { %8656 = vpow2.f32 %v2644_v55  ;;  %v2808_v58 = vsub.f32 %v2801_v24, %v2807_v57 }
 0xd29   :  { %v2809_v60 = vmul.f32 1.442695, %v2808_v58 }
 0xd2a   :  { %v2986_v61 = vpop.xlane.xlu0 %2985 }
 0xd2b   :  { %8658 = vpow2.f32 %v2809_v60  ;;  %v2987_v59 = vsub.f32 %v2980_v27, %v2986_v61 }
 0xd2d   :  { %v2988_v62 = vmul.f32 1.442695, %v2987_v59 }
 0xd2e   :  { %v8655_v63 = vpop.eup %8654  ;;  %v3148_v0 = vpop.xlane.xlu1 %3147 }
 0xd2f   :  { %8660 = vpow2.f32 %v2988_v62  ;;  %v3149_v13 = vsub.f32 %v3142_v29, %v3148_v0  ;;  %v2480_v1 = vsel %vm376_vm2, %v8655_v63, 0.0 }
 0xd30   :  { %2481 = vadd.xlane.f32.xlu1 %v2480_v1 }
 0xd31   :  { %v3150_v2 = vmul.f32 1.442695, %v3149_v13 }
 0xd32   :  { %v3314_v22 = vpop.xlane.xlu0 %3313 }
 0xd33   :  { %8662 = vpow2.f32 %v3150_v2  ;;  %v3315_v23 = vsub.f32 %v9349_v45, %v3314_v22 }
 0xd34   :  { %v8657_v3 = vpop.eup %8656 }
 0xd35   :  { %v2646_v15 = vsel %vm376_vm2, %v8657_v3, 0.0  ;;  %v3316_v24 = vmul.f32 1.442695, %v3315_v23 }
 0xd36   :  { %2647 = vadd.xlane.f32.xlu0 %v2646_v15  ;;  %v3479_v4 = vpop.xlane.xlu1 %3478  ;;  %v2487_v25 = vpop.permute.xlu0 %2486  ;;  %v3582_v15 = vld [vmem:[#allocation10 + $0x30] sm:$0xff] }
 0xd37   :  { %v3480_v6 = vsub.f32 %v3473_v35, %v3479_v4 }
 0xd38   :  { %v8659_v7 = vpop.eup %8658 }
 0xd39   :  { %v3481_v8 = vmul.f32 1.442695, %v3480_v6  ;;  %v2811_v12 = vsel %vm376_vm2, %v8659_v7, 0.0 }
 0xd3a   :  { %2812 = vadd.xlane.f32.xlu1 %v2811_v12  ;;  %v2652_v9 = vpop.permute.xlu1 %2651 }
 0xd3b   :  { %8664 = vpow2.f32 %v3481_v8 }
 0xd3c   :  { %v8661_v17 = vpop.eup %8660  ;;  %8666 = vpow2.f32 %v3316_v24 }
 0xd3d   :  { %v2990_v18 = vsel %vm376_vm2, %v8661_v17, 0.0 }
 0xd3e   :  { %2991 = vadd.xlane.f32.xlu0 %v2990_v18  ;;  %v2817_v30 = vpop.permute.xlu1 %2816 }
 0xd40   :  { %v9365_v46 = vpop.eup %8662 }
 0xd41   :  { %v3152_v19 = vsel %vm376_vm2, %v9365_v46, 0.0 }
 0xd42   :  { %3153 = vadd.xlane.f32.xlu1 %v3152_v19  ;;  %v3580_v19 = vld [vmem:[#allocation10 + $0x20] sm:$0xff] }
 0xd48   :  { %v9369_v20 = vpop.eup %8664 }
 0xd49   :  { %v3483_v21 = vsel %vm376_vm2, %v9369_v20, 0.0  ;;  %v8667_v27 = vpop.eup %8666 }
 0xd4a   :  { %3484 = vadd.xlane.f32.xlu1 %v3483_v21  ;;  %v3318_v28 = vsel %vm376_vm2, %v8667_v27, 0.0 }
 0xd54   :  { %3158 = vrot.lane.b32.xlu0 %v9293_v56, %s8914_s16 }
 0xd5b   :  { %3323 = vrot.lane.b32.xlu1 %v9293_v56, %s8915_s18 }
 0xd67   :  { %v2320_v26 = vpop.xlane.xlu0 %2319 }
 0xd68   :  { %8668 = vrcp.f32 %v2320_v26 }
 0xd73   :  { %3319 = vadd.xlane.f32.xlu0 %v3318_v28 }
 0xd75   :  { %v8669_v10 = vpop.eup %8668 }
 0xd76   :  { %v2322_v29 = vmul.f32 %v8669_v10, %v8653_v47 }
 0xd78   :  { %8222 = vmatmul.mubr.msk.f32.vlgmr.msra.gmra.mxu1 %vm376_vm2, %v2322_v29 }
 0xd79   :  { %8230 = vmatpush3.msra.mxu1 %v2487_v25  ;;  %8231 = vmatprep.mubr.msk.f32.mxu1 %vm8913_vm1, %v8912_v11 }
 0xd7a   :  { %8239 = vmatprep.subr.mxu1 %v8912_v11 }
 0xd89   :  { %3488 = vrot.lane.b32.xlu0 %v9293_v56, %s8916_s19 }
 0xdb9   :  { %v2482_v45 = vpop.xlane.xlu1 %2481 }
 0xdba   :  { %8670 = vrcp.f32 %v2482_v45 }
 0xdbf   :  { %v2648_v31 = vpop.xlane.xlu0 %2647 }
 0xdc0   :  { %8672 = vrcp.f32 %v2648_v31 }
 0xdc3   :  { %v2813_v32 = vpop.xlane.xlu1 %2812 }
 0xdc4   :  { %8674 = vrcp.f32 %v2813_v32 }
 0xdc7   :  { %v8671_v35 = vpop.eup %8670  ;;  %v2992_v36 = vpop.xlane.xlu0 %2991 }
 0xdc8   :  { %8676 = vrcp.f32 %v2992_v36  ;;  %v2484_v38 = vmul.f32 %v8671_v35, %v8655_v63  ;;  %v3587_v35 = vrot.slane %v9280_v39, %v9212_v5 }
 0xdca   :  { %8232 = vmatmul.mubr.msk.f32.vlgmr.msra.gmra.mxu1 %vm376_vm2, %v2484_v38 }
 0xdcb   :  { %8240 = vmatpush3.msra.mxu1 %v2652_v9  ;;  %v3154_v42 = vpop.xlane.xlu1 %3153  ;;  %8241 = vmatprep.mubr.msk.f32.mxu1 %vm8913_vm1, %v8912_v11  ;;  %v3159_v53 = vpop.permute.xlu0 %3158 }
 0xdcc   :  { %8678 = vrcp.f32 %v3154_v42  ;;  %8249 = vmatprep.subr.mxu1 %v8912_v11 }
 0xdcd   :  { %v8673_v43 = vpop.eup %8672 }
 0xdce   :  { %v2650_v44 = vmul.f32 %v8673_v43, %v8657_v3  ;;  %v3583_v3 = vld [vmem:[#allocation10 + $0x38] sm:$0xff] }
 0xdcf   :  { %8294 = vmatprep.subr.mxu0 %v3583_v3 }
 0xdd0   :  { %8242 = vmatmul.mubr.msk.f32.vlgmr.msra.gmra.mxu1 %vm376_vm2, %v2650_v44  ;;  %8295 = vmatpush3.msra.mxu0 %v3583_v3 }
 0xdd1   :  { %v8675_v47 = vpop.eup %8674  ;;  %8250 = vmatpush3.msra.mxu1 %v2817_v30  ;;  %8251 = vmatprep.mubr.msk.f32.mxu1 %vm8913_vm1, %v8912_v11 }
 0xdd2   :  { %8259 = vmatprep.subr.mxu1 %v8912_v11  ;;  %v2815_v48 = vmul.f32 %v8675_v47, %v8659_v7  ;;  %8296 = vmatprep.subr.mxu0 %v3582_v15 }
 0xdd3   :  { %v3485_v50 = vpop.xlane.xlu1 %3484  ;;  %8297 = vmatpush3.msra.mxu0 %v3582_v15 }
 0xdd4   :  { %8252 = vmatmul.mubr.msk.f32.vlgmr.msra.gmra.mxu1 %vm376_vm2, %v2815_v48 }
 0xdd5   :  { %v8677_v49 = vpop.eup %8676  ;;  %8260 = vmatpush3.msra.mxu1 %v9293_v56  ;;  %8261 = vmatprep.mubr.msk.f32.mxu1 %vm8913_vm1, %v8912_v11 }
 0xdd6   :  { %8269 = vmatprep.subr.mxu1 %v8912_v11  ;;  %v2994_v51 = vmul.f32 %v8677_v49, %v8661_v17 }
 0xdd7   :  { %v3324_v56 = vpop.permute.xlu1 %3323 }
 0xdd8   :  { %8262 = vmatmul.mubr.msk.f32.vlgmr.msra.gmra.mxu1 %vm376_vm2, %v2994_v51 }
 0xdd9   :  { %v8679_v54 = vpop.eup %8678  ;;  %8270 = vmatpush3.msra.mxu1 %v3159_v53  ;;  %8271 = vmatprep.mubr.msk.f32.mxu1 %vm8913_vm1, %v8912_v11 }
 0xdda   :  { %8279 = vmatprep.subr.mxu1 %v8912_v11  ;;  %v3156_v55 = vmul.f32 %v8679_v54, %v9365_v46  ;;  %v3581_v46 = vld [vmem:[#allocation10 + $0x28] sm:$0xff] }
 0xddb   :  { %8298 = vmatprep.subr.mxu0 %v3581_v46 }
 0xddc   :  { %8272 = vmatmul.mubr.msk.f32.vlgmr.msra.gmra.mxu1 %vm376_vm2, %v3156_v55  ;;  %8299 = vmatpush3.msra.mxu0 %v3581_v46 }
 0xddd   :  { %8280 = vmatpush3.msra.mxu1 %v3324_v56  ;;  %8281 = vmatprep.mubr.msk.f32.mxu1 %vm8913_vm1, %v8912_v11 }
 0xdde   :  { %8289 = vmatprep.subr.mxu1 %v8912_v11  ;;  %8300 = vmatprep.subr.mxu0 %v3580_v19 }
 0xddf   :  { %8301 = vmatpush3.msra.mxu0 %v3580_v19 }
 0xdfc   :  { %v3320_v57 = vpop.xlane.xlu0 %3319 }
 0xdfd   :  { %8680 = vrcp.f32 %v3320_v57 }
 0xdfe   :  { %8682 = vrcp.f32 %v3485_v50 }
 0xe00   :  { %v3489_v59 = vpop.permute.xlu0 %3488 }
 0xe0a   :  { %v8681_v58 = vpop.eup %8680 }
 0xe0b   :  { %v3322_v60 = vmul.f32 %v8681_v58, %v8667_v27  ;;  %v8683_v61 = vpop.eup %8682 }
 0xe0c   :  { %v3487_v62 = vmul.f32 %v8683_v61, %v9369_v20  ;;  %v3713_v61 = vld [vmem:[#allocation11 + $0x38] sm:$0xff] }
 0xe0d   :  { %8282 = vmatmul.mubr.msk.f32.vlgmr.msra.gmra.mxu1 %vm376_vm2, %v3322_v60 }
 0xe0e   :  { %8290 = vmatpush3.msra.mxu1 %v3489_v59  ;;  %8291 = vmatprep.mubr.msk.f32.mxu1 %vm8913_vm1, %v8912_v11  ;;  %v3711_v59 = vld [vmem:[#allocation11 + $0x28] sm:$0xff] }
 0xe0f   :  { %8305 = vmatprep.subr.mxu1 %v3713_v61 }
 0xe11   :  { %8292 = vmatmul.mubr.msk.f32.vlgmr.msra.gmra.mxu1 %vm376_vm2, %v3487_v62  ;;  %v3710_v62 = vld [vmem:[#allocation11 + $0x20] sm:$0xff] }
 0xe12   :  { %8306 = vmatpush3.msra.mxu1 %v3713_v61 }
 0xe38   :  { %v2392_v63 = vpop.f32.mrf.mxu1 }
 0xe3a   :  { %v8223_v0 = vpop.f32.mrf.mxu1 }
 0xe8a   :  { %v2558_v13 = vpop.f32.mrf.mxu1 }
 0xe8b   :  { %2893 = vrot.lane.b32.xlu1 %v2558_v13, %s8907_s8 }
 0xe8c   :  { %v8233_v1 = vpop.f32.mrf.mxu1 }
 0xe90   :  { %v2723_v2 = vpop.f32.mrf.mxu1 }
 0xe91   :  { %2897 = vrot.lane.b32.xlu0 %v2723_v2, %s8917_s20 }
 0xe92   :  { %v8243_v4 = vpop.f32.mrf.mxu1 }
 0xe93   :  { %v9436_v4 = vrot.slane %v9280_v39, %v9223_v37 }
 0xe94   :  { %v2888_v6 = vpop.f32.mrf.mxu1 }
 0xe95   :  { %2901 = vrot.lane.b32.xlu0 %v2888_v6, %s8918_s21 }
 0xe96   :  { %v8253_v7 = vpop.f32.mrf.mxu1 }
 0xe98   :  { %v3064_v8 = vpop.f32.mrf.mxu1 }
 0xe9a   :  { %v8263_v12 = vpop.f32.mrf.mxu1 }
 0xe9b   :  { %v9440_v12 = vrot.slane %v9280_v39, %v9230_v40 }
 0xe9c   :  { %v3230_v17 = vpop.f32.mrf.mxu1 }
 0xe9d   :  { %3565 = vrot.lane.b32.xlu1 %v3230_v17, %s8907_s8 }
 0xe9e   :  { %v8273_v18 = vpop.f32.mrf.mxu1 }
 0xecd   :  { %v3395_v20 = vpop.f32.mrf.mxu1 }
 0xece   :  { %3569 = vrot.lane.b32.xlu1 %v3395_v20, %s8917_s20  ;;  %v3717_v20 = vrot.slane %v9280_v39, %v9243_v52 }
 0xecf   :  { %v8283_v21 = vpop.f32.mrf.mxu1 }
 0xed1   :  { %v3560_v22 = vpop.f32.mrf.mxu1 }
 0xed2   :  { %3573 = vrot.lane.b32.xlu0 %v3560_v22, %s8918_s21 }
 0xed3   :  { %v8293_v23 = vpop.f32.mrf.mxu1 }
 0xefd   :  { %v2894_v24 = vpop.permute.xlu1 %2893 }
 0xefe   :  { %v2904_v26 = vsel %vm376_vm2, %v2392_v63, %v2894_v24 }
 0xf03   :  { %v2898_v25 = vpop.permute.xlu0 %2897 }
 0xf04   :  { %v2905_v27 = vsel %vm1046_vm3, %v2904_v26, %v2898_v25 }
 0xf07   :  { %v2902_v28 = vpop.permute.xlu0 %2901 }
 0xf08   :  { %v2906_v10 = vsel %vm1048_vm4, %v2905_v27, %v2902_v28 }
 0xf09   :  { %8302 = vmatprep.mubr.msk.f32.mxu0 %vm127_vm0, %v2906_v10 }
 0xf0f   :  { %v3566_v29 = vpop.permute.xlu1 %3565 }
 0xf10   :  { %v3576_v30 = vsel %vm376_vm2, %v3064_v8, %v3566_v29 }
 0xf40   :  { %v3570_v9 = vpop.permute.xlu1 %3569 }
 0xf41   :  { %v3577_v45 = vsel %vm1046_vm3, %v3576_v30, %v3570_v9 }
 0xf44   :  { %v3574_v31 = vpop.permute.xlu0 %3573 }
 0xf45   :  { %v3578_v32 = vsel %vm1048_vm4, %v3577_v45, %v3574_v31 }
 0xf46   :  { %8303 = vmatmul.mubr.msk.f32.vlgmr.msra.gmra.mxu0 %vm127_vm0, %v3578_v32 }
0x1006   :  { %v8304_v36 = vpop.f32.mrf.mxu0 }
0x1007   :  { %v3666_v38 = vadd.f32 %v8304_v36, %v3587_v35 }
0x1008   :  { %v3660_v42 = vpop.f32.mrf.mxu0 }
0x1009   :  { %v3661_v43 = vadd.f32 %v3660_v42, %v3587_v35  ;;  %v3670_v44 = vadd.f32 %v3666_v38, %v9258_v34 }
0x100b   :  { %v3674_v47 = vsel %vm127_vm0, %v3670_v44, 0.0  ;;  %v3669_v48 = vadd.f32 %v3661_v43, %v9255_v33  ;;  %v3712_v33 = vld [vmem:[#allocation11 + $0x30] sm:$0xff]  ;;  %v3839_v43 = vld [vmem:[#allocation5 + $0x58] sm:$0xff] }
0x100c   :  { %3675 = vadd.xlane.f32.xlu0 %v3674_v47  ;;  %8307 = vmatprep.subr.mxu1 %v3712_v33  ;;  %v3838_v47 = vld [vmem:[#allocation5 + $0x50] sm:$0xff] }
0x100d   :  { %v3671_v49 = vsel %vm127_vm0, %v3669_v48, 0.0  ;;  %8308 = vmatpush3.msra.mxu1 %v3712_v33  ;;  %8316 = vmatprep.subr.mxu0 %v3839_v43 }
0x100e   :  { %3672 = vadd.xlane.f32.xlu1 %v3671_v49  ;;  %8309 = vmatprep.subr.mxu1 %v3711_v59  ;;  %v3837_v49 = vld [vmem:[#allocation5 + $0x48] sm:$0xff] }
0x100f   :  { %8310 = vmatpush3.msra.mxu1 %v3711_v59  ;;  %8317 = vmatpush3.msra.mxu0 %v3839_v43 }
0x1010   :  { %8311 = vmatprep.subr.mxu1 %v3710_v62  ;;  %8318 = vmatprep.subr.mxu0 %v3838_v47 }
0x1011   :  { %8312 = vmatpush3.msra.mxu1 %v3710_v62  ;;  %8319 = vmatpush3.msra.mxu0 %v3838_v47 }
0x1012   :  { %8320 = vmatprep.subr.mxu0 %v3837_v49 }
0x1013   :  { %8321 = vmatpush3.msra.mxu0 %v3837_v49 }
0x1095   :  { %v3676_v50 = vpop.xlane.xlu0 %3675 }
0x1096   :  { %v3678_v51 = vmul.f32 0.03125, %v3676_v50  ;;  %v3927_v50 = vld [vmem:[#allocation7 + $0x48] sm:$0xff] }
0x1097   :  { %v3673_v53 = vpop.xlane.xlu1 %3672 }
0x1098   :  { %v3680_v54 = vsub.f32 %v3670_v44, %v3678_v51  ;;  %v3677_v55 = vmul.f32 0.03125, %v3673_v53  ;;  %v3929_v44 = vld [vmem:[#allocation7 + $0x58] sm:$0xff]  ;;  %v3836_v51 = vld [vmem:[#allocation5 + $0x40] sm:$0xff] }
0x1099   :  { %8327 = vmatprep.subr.mxu1 %v3929_v44  ;;  %v3926_v53 = vld [vmem:[#allocation7 + $0x40] sm:$0xff]  ;;  %8322 = vmatprep.subr.mxu0 %v3836_v51 }
0x109a   :  { %v3679_v56 = vsub.f32 %v3669_v48, %v3677_v55  ;;  %v3682_v57 = vmul.f32 %v3680_v54, %v3680_v54  ;;  %v3928_v48 = vld [vmem:[#allocation7 + $0x50] sm:$0xff]  ;;  %8323 = vmatpush3.msra.mxu0 %v3836_v51 }
0x109c   :  { %v3686_v58 = vsel %vm127_vm0, %v3682_v57, 0.0  ;;  %v3681_v60 = vmul.f32 %v3679_v56, %v3679_v56 }
0x109d   :  { %3687 = vadd.xlane.f32.xlu1 %v3686_v58 }
0x109e   :  { %v3683_v34 = vsel %vm127_vm0, %v3681_v60, 0.0 }
0x109f   :  { %3684 = vadd.xlane.f32.xlu0 %v3683_v34 }
0x1126   :  { %v3688_v63 = vpop.xlane.xlu1 %3687 }
0x1127   :  { %v3690_v0 = vmul.f32 0.03125, %v3688_v63 }
0x1128   :  { %v3685_v13 = vpop.xlane.xlu0 %3684 }
0x1129   :  { %v3692_v1 = vadd.f32 1e-05, %v3690_v0  ;;  %v3689_v2 = vmul.f32 0.03125, %v3685_v13 }
0x112b   :  { %8684 = vrsqrt.f32 %v3692_v1  ;;  %v3691_v3 = vadd.f32 1e-05, %v3689_v2  ;;  %v4012_v2 = vld [vmem:[#allocation8 + $0x50] sm:$0xff] }
0x112d   :  { %8686 = vrsqrt.f32 %v3691_v3  ;;  %v4011_v3 = vld [vmem:[#allocation8 + $0x48] sm:$0xff] }
0x1138   :  { %v8685_v15 = vpop.eup %8684 }
0x1139   :  { %v3696_v6 = vmul.f32 %v8685_v15, %v3680_v54  ;;  %v4013_v54 = vld [vmem:[#allocation8 + $0x58] sm:$0xff]  ;;  %v4010_v15 = vld [vmem:[#allocation8 + $0x40] sm:$0xff] }
0x113a   :  { %v8687_v7 = vpop.eup %8686  ;;  %8338 = vmatprep.subr.mxu0 %v4013_v54 }
0x113b   :  { %v3695_v8 = vmul.f32 %v8687_v7, %v3679_v56  ;;  %v3702_v17 = vmul.f32 %v9436_v4, %v3696_v6 }
0x113d   :  { %v3701_v18 = vmul.f32 %v9436_v4, %v3695_v8  ;;  %v3708_v19 = vadd.f32 %v9440_v12, %v3702_v17 }
0x113f   :  { %v3707_v46 = vadd.f32 %v9440_v12, %v3701_v18 }
0x1141   :  { %8313 = vmatprep.mubr.msk.f32.mxu1 %vm127_vm0, %v3707_v46 }
0x1142   :  { %8314 = vmatmul.mubr.msk.f32.vlgmr.msra.gmra.mxu1 %vm127_vm0, %v3708_v19 }
0x1143   :  { %8328 = vmatpush3.msra.mxu1 %v3929_v44 }
0x1144   :  { %8329 = vmatprep.subr.mxu1 %v3928_v48 }
0x1145   :  { %8330 = vmatpush3.msra.mxu1 %v3928_v48 }
0x1146   :  { %8331 = vmatprep.subr.mxu1 %v3927_v50 }
0x1147   :  { %8332 = vmatpush3.msra.mxu1 %v3927_v50 }
0x1148   :  { %8333 = vmatprep.subr.mxu1 %v3926_v53 }
0x1149   :  { %8334 = vmatpush3.msra.mxu1 %v3926_v53 }
0x114a   :  { %8349 = vmatprep.subr.mxu1 %v8912_v11 }
0x1202   :  { %v8315_v21 = vpop.f32.mrf.mxu1 }
0x1203   :  { %v3796_v22 = vadd.f32 %v8315_v21, %v3717_v20 }
0x1204   :  { %v3790_v23 = vpop.f32.mrf.mxu1 }
0x1205   :  { %v3800_v24 = vmax.f32 %v3796_v22, 0.0  ;;  %v3791_v25 = vadd.f32 %v3790_v23, %v3717_v20 }
0x1207   :  { %v3799_v26 = vmax.f32 %v3791_v25, 0.0  ;;  %v3802_v27 = vadd.f32 %v3800_v24, %v3708_v19 }
0x1209   :  { %v3806_v28 = vsel %vm127_vm0, %v3802_v27, 0.0  ;;  %v3801_v10 = vadd.f32 %v3799_v26, %v3707_v46 }
0x120a   :  { %3807 = vadd.xlane.f32.xlu1 %v3806_v28 }
0x120b   :  { %v3803_v29 = vsel %vm127_vm0, %v3801_v10, 0.0 }
0x120c   :  { %3804 = vadd.xlane.f32.xlu0 %v3803_v29 }
0x1293   :  { %v3808_v9 = vpop.xlane.xlu1 %3807 }
0x1294   :  { %v3810_v30 = vmul.f32 0.03125, %v3808_v9 }
0x1295   :  { %v3805_v45 = vpop.xlane.xlu0 %3804 }
0x1296   :  { %v3812_v31 = vsub.f32 %v3802_v27, %v3810_v30  ;;  %v3809_v32 = vmul.f32 0.03125, %v3805_v45 }
0x1298   :  { %v3811_v39 = vsub.f32 %v3801_v10, %v3809_v32  ;;  %v3814_v35 = vmul.f32 %v3812_v31, %v3812_v31 }
0x129a   :  { %v3818_v36 = vsel %vm127_vm0, %v3814_v35, 0.0  ;;  %v3813_v38 = vmul.f32 %v3811_v39, %v3811_v39 }
0x129b   :  { %3819 = vadd.xlane.f32.xlu1 %v3818_v36 }
0x129c   :  { %v3815_v42 = vsel %vm127_vm0, %v3813_v38, 0.0 }
0x129d   :  { %3816 = vadd.xlane.f32.xlu0 %v3815_v42 }
0x1324   :  { %v3820_v55 = vpop.xlane.xlu1 %3819 }
0x1325   :  { %v3822_v56 = vmul.f32 0.03125, %v3820_v55 }
0x1326   :  { %v3817_v57 = vpop.xlane.xlu0 %3816 }
0x1327   :  { %v3824_v58 = vadd.f32 1e-05, %v3822_v56  ;;  %v3821_v60 = vmul.f32 0.03125, %v3817_v57 }
0x1329   :  { %8688 = vrsqrt.f32 %v3824_v58  ;;  %v3823_v34 = vadd.f32 1e-05, %v3821_v60 }
0x132b   :  { %8690 = vrsqrt.f32 %v3823_v34 }
0x1336   :  { %v8689_v61 = vpop.eup %8688 }
0x1337   :  { %v3828_v33 = vmul.f32 %v8689_v61, %v3812_v31 }
0x1338   :  { %v8691_v59 = vpop.eup %8690 }
0x1339   :  { %v3827_v62 = vmul.f32 %v8691_v59, %v3811_v39  ;;  %v3830_v63 = vmul.f32 %v3828_v33, %v9436_v4 }
0x133b   :  { %v3829_v0 = vmul.f32 %v3827_v62, %v9436_v4  ;;  %v9461_v1 = vadd.f32 %v3830_v63, %v9440_v12  ;;  %v9483_v4 = vld [vmem:[%s9880_s6 + $0x10] sm:$0xff] }
0x133c   :  { %v3843_v8 = vrot.slane %v9483_v4, %v9028_v14  ;;  %v4017_v21 = vrot.slane %v9483_v4, %v9067_v41 }
0x133d   :  { %v9458_v13 = vadd.f32 %v3829_v0, %v9440_v12  ;;  %v3933_v12 = vrot.slane %v9483_v4, %v9036_v16 }
0x133f   :  { %8324 = vmatprep.mubr.msk.f32.mxu0 %vm127_vm0, %v9458_v13  ;;  %8335 = vmatprep.mubr.msk.f32.mxu1 %vm127_vm0, %v9458_v13 }
0x1340   :  { %8325 = vmatmul.mubr.msk.f32.vlgmr.msra.gmra.mxu0 %vm127_vm0, %v9461_v1  ;;  %8336 = vmatmul.mubr.msk.f32.vlgmr.msra.gmra.mxu1 %vm127_vm0, %v9461_v1 }
0x1341   :  { %8339 = vmatpush3.msra.mxu0 %v4013_v54  ;;  %8346 = vmatprep.mubr.msk.f32.mxu0 %vm127_vm0, %v9458_v13 }
0x1342   :  { %8340 = vmatprep.subr.mxu0 %v4012_v2  ;;  %8351 = vmatprep.mubr.msk.f32.mxu1 %vm8913_vm1, %v8912_v11 }
0x1343   :  { %8341 = vmatpush3.msra.mxu0 %v4012_v2 }
0x1344   :  { %8342 = vmatprep.subr.mxu0 %v4011_v3 }
0x1345   :  { %8343 = vmatpush3.msra.mxu0 %v4011_v3 }
0x1346   :  { %8344 = vmatprep.subr.mxu0 %v4010_v15 }
0x1347   :  { %8345 = vmatpush3.msra.mxu0 %v4010_v15 }
0x1348   :  { %8347 = vmatmul.mubr.msk.f32.vlgmr.msra.gmra.mxu0 %vm127_vm0, %v9461_v1  ;;  %8359 = vmatprep.subr.mxu0 %v8912_v11 }
0x1349   :  { %8361 = vmatprep.mubr.msk.f32.mxu0 %vm8913_vm1, %v8912_v11 }
0x1400   :  { %v8326_v6 = vpop.f32.mrf.mxu0  ;;  %v8337_v7 = vpop.f32.mrf.mxu1 }
0x1401   :  { %v3922_v25 = vadd.f32 %v8326_v6, %v3843_v8  ;;  %v4006_v28 = vadd.f32 %v8337_v7, %v3933_v12 }
0x1402   :  { %v3916_v17 = vpop.f32.mrf.mxu0  ;;  %v4000_v18 = vpop.f32.mrf.mxu1 }
0x1403   :  { %v3917_v46 = vadd.f32 %v3916_v17, %v3843_v8  ;;  %v4001_v19 = vadd.f32 %v4000_v18, %v3933_v12  ;;  %v4765_v27 = vmul.f32 0.35355338, %v3922_v25 }
0x1405   :  { %v4093_v20 = vmul.f32 0.35355338, %v3917_v46  ;;  %4256 = vrot.lane.b32.xlu0 %v4001_v19, %s8914_s16  ;;  %8350 = vmatpush3.xpose.msk.msra.mxu1 %vm376_vm2, %v4001_v19 }
0x1406   :  { %8354 = vmatprep.subr.mxu1 %v8912_v11 }
0x1407   :  { %4254 = vrot.lane.b32.xlu1 %v4093_v20, %s8914_s16 }
0x1408   :  { %v8348_v22 = vpop.f32.mrf.mxu0  ;;  %8352 = vmatmul.mubr.msk.f32.vlgmr.msra.gmra.mxu1 %vm376_vm2, %v4093_v20 }
0x1409   :  { %v9496_v23 = vadd.f32 %v8348_v22, %v4017_v21  ;;  %4420 = vrot.lane.b32.xlu0 %v4093_v20, %s8915_s18  ;;  %8356 = vmatprep.mubr.msk.f32.mxu1 %vm8913_vm1, %v8912_v11 }
0x140a   :  { %v4084_v24 = vpop.f32.mrf.mxu0 }
0x140b   :  { %v9501_v26 = vadd.f32 %v4084_v24, %v4017_v21  ;;  %4422 = vrot.lane.b32.xlu1 %v4001_v19, %s8915_s18 }
0x140d   :  { %8355 = vmatpush3.msra.mxu1 %v9501_v26  ;;  %4585 = vrot.lane.b32.xlu0 %v4093_v20, %s8916_s19 }
0x140e   :  { %8364 = vmatprep.subr.mxu1 %v8912_v11 }
0x140f   :  { %4587 = vrot.lane.b32.xlu1 %v4001_v19, %s8916_s19 }
0x1411   :  { %4926 = vrot.lane.b32.xlu0 %v4765_v27, %s8914_s16 }
0x1413   :  { %4928 = vrot.lane.b32.xlu1 %v4006_v28, %s8914_s16 }
0x1415   :  { %5092 = vrot.lane.b32.xlu0 %v4765_v27, %s8915_s18 }
0x1417   :  { %5094 = vrot.lane.b32.xlu1 %v4006_v28, %s8915_s18 }
0x1419   :  { %5257 = vrot.lane.b32.xlu0 %v4765_v27, %s8916_s19 }
0x141b   :  { %5259 = vrot.lane.b32.xlu1 %v4006_v28, %s8916_s19 }
0x1477   :  { %v4257_v10 = vpop.permute.xlu0 %4256 }
0x1478   :  { %8360 = vmatpush3.xpose.msk.msra.mxu0 %vm376_vm2, %v4257_v10 }
0x1479   :  { %v4255_v29 = vpop.permute.xlu1 %4254  ;;  %8369 = vmatprep.subr.mxu0 %v8912_v11 }
0x147b   :  { %8362 = vmatmul.mubr.msk.f32.vlgmr.msra.gmra.mxu0 %vm376_vm2, %v4255_v29  ;;  %v4421_v9 = vpop.permute.xlu0 %4420 }
0x147c   :  { %8371 = vmatprep.mubr.msk.f32.mxu0 %vm8913_vm1, %v8912_v11 }
0x147d   :  { %v4423_v30 = vpop.permute.xlu1 %4422 }
0x147e   :  { %8370 = vmatpush3.xpose.msk.msra.mxu0 %vm376_vm2, %v4423_v30 }
0x147f   :  { %8379 = vmatprep.subr.mxu0 %v8912_v11  ;;  %v4586_v31 = vpop.permute.xlu0 %4585 }
0x1481   :  { %8372 = vmatmul.mubr.msk.f32.vlgmr.msra.gmra.mxu0 %vm376_vm2, %v4421_v9  ;;  %v4588_v45 = vpop.permute.xlu1 %4587 }
0x1482   :  { %8380 = vmatpush3.xpose.msk.msra.mxu0 %vm376_vm2, %v4588_v45  ;;  %8381 = vmatprep.mubr.msk.f32.mxu0 %vm8913_vm1, %v8912_v11 }
0x1483   :  { %8389 = vmatprep.subr.mxu0 %v8912_v11  ;;  %v4927_v39 = vpop.permute.xlu0 %4926 }
0x1485   :  { %8382 = vmatmul.mubr.msk.f32.vlgmr.msra.gmra.mxu0 %vm376_vm2, %v4586_v31  ;;  %v4929_v32 = vpop.permute.xlu1 %4928 }
0x1486   :  { %8390 = vmatpush3.xpose.msk.msra.mxu0 %vm376_vm2, %v4006_v28  ;;  %8391 = vmatprep.mubr.msk.f32.mxu0 %vm8913_vm1, %v8912_v11 }
0x1487   :  { %8399 = vmatprep.subr.mxu0 %v8912_v11  ;;  %v5093_v36 = vpop.permute.xlu0 %5092 }
0x1489   :  { %8392 = vmatmul.mubr.msk.f32.vlgmr.msra.gmra.mxu0 %vm376_vm2, %v4765_v27  ;;  %v5095_v35 = vpop.permute.xlu1 %5094 }
0x148a   :  { %8400 = vmatpush3.xpose.msk.msra.mxu0 %vm376_vm2, %v4929_v32  ;;  %8401 = vmatprep.mubr.msk.f32.mxu0 %vm8913_vm1, %v8912_v11 }
0x148b   :  { %8409 = vmatprep.subr.mxu0 %v8912_v11  ;;  %v5258_v42 = vpop.permute.xlu0 %5257 }
0x148d   :  { %8402 = vmatmul.mubr.msk.f32.vlgmr.msra.gmra.mxu0 %vm376_vm2, %v4927_v39  ;;  %v5260_v38 = vpop.permute.xlu1 %5259 }
0x148e   :  { %8410 = vmatpush3.xpose.msk.msra.mxu0 %vm376_vm2, %v5095_v35  ;;  %8411 = vmatprep.mubr.msk.f32.mxu0 %vm8913_vm1, %v8912_v11 }
0x148f   :  { %8419 = vmatprep.subr.mxu0 %v8912_v11 }
0x1491   :  { %8412 = vmatmul.mubr.msk.f32.vlgmr.msra.gmra.mxu0 %vm376_vm2, %v5093_v36 }
0x1492   :  { %8420 = vmatpush3.xpose.msk.msra.mxu0 %vm376_vm2, %v5260_v38  ;;  %8421 = vmatprep.mubr.msk.f32.mxu0 %vm8913_vm1, %v8912_v11 }
0x1495   :  { %8422 = vmatmul.mubr.msk.f32.vlgmr.msra.gmra.mxu0 %vm376_vm2, %v5258_v42 }
0x14c8   :  { %v4166_v43 = vpop.f32.mrf.mxu1 }
0x14c9   :  { %v4170_v44 = vsel %vm376_vm2, %v4166_v43, -inf }
0x14ca   :  { %4171 = vmax.xlane.f32.xlu1 %v4170_v44  ;;  %v8353_v47 = vpop.f32.mrf.mxu1 }
0x153b   :  { %v4328_v48 = vpop.f32.mrf.mxu0 }
0x153c   :  { %v4332_v49 = vsel %vm376_vm2, %v4328_v48, -inf }
0x153d   :  { %4333 = vmax.xlane.f32.xlu0 %v4332_v49  ;;  %v8363_v50 = vpop.f32.mrf.mxu0 }
0x1541   :  { %v4494_v51 = vpop.f32.mrf.mxu0 }
0x1542   :  { %v4498_v53 = vsel %vm376_vm2, %v4494_v51, -inf }
0x1543   :  { %4499 = vmax.xlane.f32.xlu0 %v4498_v53  ;;  %v8373_v54 = vpop.f32.mrf.mxu0 }
0x1545   :  { %v4659_v55 = vpop.f32.mrf.mxu0 }
0x1546   :  { %v4663_v56 = vsel %vm376_vm2, %v4659_v55, -inf }
0x1547   :  { %v8383_v57 = vpop.f32.mrf.mxu0  ;;  %4664 = vmax.xlane.f32.xlu1 %v4663_v56 }
0x1549   :  { %v4838_v58 = vpop.f32.mrf.mxu0 }
0x154a   :  { %v4842_v60 = vsel %vm376_vm2, %v4838_v58, -inf }
0x154b   :  { %4843 = vmax.xlane.f32.xlu0 %v4842_v60  ;;  %v8393_v34 = vpop.f32.mrf.mxu0 }
0x154d   :  { %v5000_v61 = vpop.f32.mrf.mxu0 }
0x154e   :  { %v5004_v33 = vsel %vm376_vm2, %v5000_v61, -inf }
0x154f   :  { %v8403_v59 = vpop.f32.mrf.mxu0  ;;  %5005 = vmax.xlane.f32.xlu1 %v5004_v33 }
0x1551   :  { %v9552_v62 = vpop.f32.mrf.mxu0 }
0x1552   :  { %v5170_v63 = vsel %vm376_vm2, %v9552_v62, -inf }
0x1553   :  { %5171 = vmax.xlane.f32.xlu0 %v5170_v63  ;;  %v8413_v0 = vpop.f32.mrf.mxu0  ;;  %v4172_v6 = vpop.xlane.xlu1 %4171 }
0x1554   :  { %v4173_v7 = vsub.f32 %v4166_v43, %v4172_v6 }
0x1555   :  { %v5331_v2 = vpop.f32.mrf.mxu0 }
0x1556   :  { %v5335_v3 = vsel %vm376_vm2, %v5331_v2, -inf  ;;  %v4174_v8 = vmul.f32 1.442695, %v4173_v7 }
0x1557   :  { %v8423_v15 = vpop.f32.mrf.mxu0  ;;  %5336 = vmax.xlane.f32.xlu1 %v5335_v3 }
0x1558   :  { %8692 = vpow2.f32 %v4174_v8 }
0x1565   :  { %v8693_v12 = vpop.eup %8692 }
0x1566   :  { %v4176_v17 = vsel %vm376_vm2, %v8693_v12, 0.0 }
0x1568   :  { %4509 = vrot.lane.b32.xlu1 %v9501_v26, %s8915_s18 }
0x1569   :  { %4344 = vrot.lane.b32.xlu0 %v9501_v26, %s8914_s16 }
0x156c   :  { %4674 = vrot.lane.b32.xlu1 %v9501_v26, %s8916_s19 }
0x1588   :  { %4177 = vadd.xlane.f32.xlu0 %v4176_v17 }
0x15c6   :  { %v4334_v18 = vpop.xlane.xlu0 %4333 }
0x15c7   :  { %v4335_v46 = vsub.f32 %v4328_v48, %v4334_v18 }
0x15c9   :  { %v4336_v19 = vmul.f32 1.442695, %v4335_v46 }
0x15cb   :  { %8694 = vpow2.f32 %v4336_v19 }
0x15cc   :  { %v4500_v20 = vpop.xlane.xlu0 %4499 }
0x15cd   :  { %v4501_v21 = vsub.f32 %v4494_v51, %v4500_v20 }
0x15cf   :  { %v4502_v22 = vmul.f32 1.442695, %v4501_v21 }
0x15d0   :  { %v4665_v24 = vpop.xlane.xlu1 %4664 }
0x15d1   :  { %8696 = vpow2.f32 %v4502_v22  ;;  %v4666_v25 = vsub.f32 %v4659_v55, %v4665_v24 }
0x15d3   :  { %v4667_v27 = vmul.f32 1.442695, %v4666_v25 }
0x15d4   :  { %v4844_v28 = vpop.xlane.xlu0 %4843 }
0x15d5   :  { %8698 = vpow2.f32 %v4667_v27  ;;  %v4845_v26 = vsub.f32 %v4838_v58, %v4844_v28 }
0x15d7   :  { %v4846_v10 = vmul.f32 1.442695, %v4845_v26 }
0x15d8   :  { %v8695_v29 = vpop.eup %8694  ;;  %v5006_v9 = vpop.xlane.xlu1 %5005 }
0x15d9   :  { %8700 = vpow2.f32 %v4846_v10  ;;  %v5007_v30 = vsub.f32 %v5000_v61, %v5006_v9  ;;  %v4338_v45 = vsel %vm376_vm2, %v8695_v29, 0.0 }
0x15da   :  { %4339 = vadd.xlane.f32.xlu1 %v4338_v45 }
0x15db   :  { %v5008_v31 = vmul.f32 1.442695, %v5007_v30 }
0x15dc   :  { %v5172_v53 = vpop.xlane.xlu0 %5171 }
0x15dd   :  { %8702 = vpow2.f32 %v5008_v31  ;;  %v5173_v54 = vsub.f32 %v9552_v62, %v5172_v53 }
0x15de   :  { %v8697_v32 = vpop.eup %8696 }
0x15df   :  { %v4504_v39 = vsel %vm376_vm2, %v8697_v32, 0.0  ;;  %v5174_v55 = vmul.f32 1.442695, %v5173_v54 }
0x15e0   :  { %4505 = vadd.xlane.f32.xlu0 %v4504_v39  ;;  %v5337_v35 = vpop.xlane.xlu1 %5336  ;;  %v4345_v56 = vpop.permute.xlu0 %4344  ;;  %v5440_v39 = vld [vmem:[#allocation10 + $0x50] sm:$0xff] }
0x15e1   :  { %v5338_v36 = vsub.f32 %v5331_v2, %v5337_v35 }
0x15e2   :  { %v8699_v38 = vpop.eup %8698 }
0x15e3   :  { %v5339_v42 = vmul.f32 1.442695, %v5338_v36  ;;  %v4669_v43 = vsel %vm376_vm2, %v8699_v38, 0.0 }
0x15e4   :  { %4670 = vadd.xlane.f32.xlu1 %v4669_v43  ;;  %v4510_v33 = vpop.permute.xlu1 %4509 }
0x15e5   :  { %8704 = vpow2.f32 %v5339_v42 }
0x15e6   :  { %v8701_v44 = vpop.eup %8700  ;;  %8706 = vpow2.f32 %v5174_v55 }
0x15e7   :  { %v4848_v47 = vsel %vm376_vm2, %v8701_v44, 0.0 }
0x15e8   :  { %4849 = vadd.xlane.f32.xlu0 %v4848_v47  ;;  %v4675_v59 = vpop.permute.xlu1 %4674 }
0x15ea   :  { %v9568_v48 = vpop.eup %8702 }
0x15eb   :  { %v5010_v49 = vsel %vm376_vm2, %v9568_v48, 0.0 }
0x15ec   :  { %5011 = vadd.xlane.f32.xlu1 %v5010_v49  ;;  %v5438_v49 = vld [vmem:[#allocation10 + $0x40] sm:$0xff] }
0x15f2   :  { %v9572_v50 = vpop.eup %8704 }
0x15f3   :  { %v5341_v51 = vsel %vm376_vm2, %v9572_v50, 0.0  ;;  %v8707_v58 = vpop.eup %8706 }
0x15f4   :  { %5342 = vadd.xlane.f32.xlu1 %v5341_v51  ;;  %v5176_v60 = vsel %vm376_vm2, %v8707_v58, 0.0 }
0x15fe   :  { %5016 = vrot.lane.b32.xlu0 %v9496_v23, %s8914_s16 }
0x1605   :  { %5181 = vrot.lane.b32.xlu1 %v9496_v23, %s8915_s18 }
0x1611   :  { %v4178_v57 = vpop.xlane.xlu0 %4177 }
0x1612   :  { %8708 = vrcp.f32 %v4178_v57 }
0x161d   :  { %5177 = vadd.xlane.f32.xlu0 %v5176_v60 }
0x161f   :  { %v8709_v34 = vpop.eup %8708 }
0x1620   :  { %v4180_v61 = vmul.f32 %v8709_v34, %v8693_v12 }
0x1622   :  { %8357 = vmatmul.mubr.msk.f32.vlgmr.msra.gmra.mxu1 %vm376_vm2, %v4180_v61 }
0x1623   :  { %8365 = vmatpush3.msra.mxu1 %v4345_v56  ;;  %8366 = vmatprep.mubr.msk.f32.mxu1 %vm8913_vm1, %v8912_v11 }
0x1624   :  { %8374 = vmatprep.subr.mxu1 %v8912_v11 }
0x1633   :  { %5346 = vrot.lane.b32.xlu0 %v9496_v23, %s8916_s19 }
0x1663   :  { %v4340_v62 = vpop.xlane.xlu1 %4339 }
0x1664   :  { %8710 = vrcp.f32 %v4340_v62 }
0x1669   :  { %v4506_v63 = vpop.xlane.xlu0 %4505 }
0x166a   :  { %8712 = vrcp.f32 %v4506_v63 }
0x166d   :  { %v4671_v0 = vpop.xlane.xlu1 %4670 }
0x166e   :  { %8714 = vrcp.f32 %v4671_v0 }
0x1671   :  { %v8711_v2 = vpop.eup %8710  ;;  %v4850_v3 = vpop.xlane.xlu0 %4849 }
0x1672   :  { %8716 = vrcp.f32 %v4850_v3  ;;  %v4342_v15 = vmul.f32 %v8711_v2, %v8695_v29  ;;  %v5445_v2 = vrot.slane %v9483_v4, %v9212_v5 }
0x1674   :  { %8367 = vmatmul.mubr.msk.f32.vlgmr.msra.gmra.mxu1 %vm376_vm2, %v4342_v15 }
0x1675   :  { %8375 = vmatpush3.msra.mxu1 %v4510_v33  ;;  %v5012_v6 = vpop.xlane.xlu1 %5011  ;;  %8376 = vmatprep.mubr.msk.f32.mxu1 %vm8913_vm1, %v8912_v11  ;;  %v5017_v20 = vpop.permute.xlu0 %5016 }
0x1676   :  { %8718 = vrcp.f32 %v5012_v6  ;;  %8384 = vmatprep.subr.mxu1 %v8912_v11 }
0x1677   :  { %v8713_v7 = vpop.eup %8712 }
0x1678   :  { %v4508_v8 = vmul.f32 %v8713_v7, %v8697_v32  ;;  %v5441_v32 = vld [vmem:[#allocation10 + $0x58] sm:$0xff] }
0x1679   :  { %8429 = vmatprep.subr.mxu0 %v5441_v32 }
0x167a   :  { %8377 = vmatmul.mubr.msk.f32.vlgmr.msra.gmra.mxu1 %vm376_vm2, %v4508_v8  ;;  %8430 = vmatpush3.msra.mxu0 %v5441_v32 }
0x167b   :  { %v8715_v12 = vpop.eup %8714  ;;  %8385 = vmatpush3.msra.mxu1 %v4675_v59  ;;  %8386 = vmatprep.mubr.msk.f32.mxu1 %vm8913_vm1, %v8912_v11 }
0x167c   :  { %8394 = vmatprep.subr.mxu1 %v8912_v11  ;;  %v4673_v17 = vmul.f32 %v8715_v12, %v8699_v38  ;;  %8431 = vmatprep.subr.mxu0 %v5440_v39 }
0x167d   :  { %v5343_v46 = vpop.xlane.xlu1 %5342  ;;  %8432 = vmatpush3.msra.mxu0 %v5440_v39 }
0x167e   :  { %8387 = vmatmul.mubr.msk.f32.vlgmr.msra.gmra.mxu1 %vm376_vm2, %v4673_v17 }
0x167f   :  { %v8717_v18 = vpop.eup %8716  ;;  %8395 = vmatpush3.msra.mxu1 %v9496_v23  ;;  %8396 = vmatprep.mubr.msk.f32.mxu1 %vm8913_vm1, %v8912_v11 }
0x1680   :  { %8404 = vmatprep.subr.mxu1 %v8912_v11  ;;  %v4852_v19 = vmul.f32 %v8717_v18, %v8701_v44 }
0x1681   :  { %v5182_v23 = vpop.permute.xlu1 %5181 }
0x1682   :  { %8397 = vmatmul.mubr.msk.f32.vlgmr.msra.gmra.mxu1 %vm376_vm2, %v4852_v19 }
0x1683   :  { %v8719_v21 = vpop.eup %8718  ;;  %8405 = vmatpush3.msra.mxu1 %v5017_v20  ;;  %8406 = vmatprep.mubr.msk.f32.mxu1 %vm8913_vm1, %v8912_v11 }
0x1684   :  { %8414 = vmatprep.subr.mxu1 %v8912_v11  ;;  %v5014_v22 = vmul.f32 %v8719_v21, %v9568_v48  ;;  %v5439_v48 = vld [vmem:[#allocation10 + $0x48] sm:$0xff] }
0x1685   :  { %8433 = vmatprep.subr.mxu0 %v5439_v48 }
0x1686   :  { %8407 = vmatmul.mubr.msk.f32.vlgmr.msra.gmra.mxu1 %vm376_vm2, %v5014_v22  ;;  %8434 = vmatpush3.msra.mxu0 %v5439_v48 }
0x1687   :  { %8415 = vmatpush3.msra.mxu1 %v5182_v23  ;;  %8416 = vmatprep.mubr.msk.f32.mxu1 %vm8913_vm1, %v8912_v11 }
0x1688   :  { %8424 = vmatprep.subr.mxu1 %v8912_v11  ;;  %8435 = vmatprep.subr.mxu0 %v5438_v49 }
0x1689   :  { %8436 = vmatpush3.msra.mxu0 %v5438_v49 }
0x16a6   :  { %v5178_v24 = vpop.xlane.xlu0 %5177 }
0x16a7   :  { %8720 = vrcp.f32 %v5178_v24 }
0x16a8   :  { %8722 = vrcp.f32 %v5343_v46 }
0x16aa   :  { %v5347_v26 = vpop.permute.xlu0 %5346 }
0x16b4   :  { %v8721_v25 = vpop.eup %8720 }
0x16b5   :  { %v5180_v27 = vmul.f32 %v8721_v25, %v8707_v58  ;;  %v8723_v28 = vpop.eup %8722 }
0x16b6   :  { %v5345_v10 = vmul.f32 %v8723_v28, %v9572_v50  ;;  %v5570_v28 = vld [vmem:[#allocation11 + $0x50] sm:$0xff] }
0x16b7   :  { %8417 = vmatmul.mubr.msk.f32.vlgmr.msra.gmra.mxu1 %vm376_vm2, %v5180_v27 }
0x16b8   :  { %8425 = vmatpush3.msra.mxu1 %v5347_v26  ;;  %8426 = vmatprep.mubr.msk.f32.mxu1 %vm8913_vm1, %v8912_v11  ;;  %v5569_v26 = vld [vmem:[#allocation11 + $0x48] sm:$0xff] }
0x16bb   :  { %8427 = vmatmul.mubr.msk.f32.vlgmr.msra.gmra.mxu1 %vm376_vm2, %v5345_v10  ;;  %v5568_v10 = vld [vmem:[#allocation11 + $0x40] sm:$0xff] }
0x16e2   :  { %v4250_v29 = vpop.f32.mrf.mxu1 }
0x16e4   :  { %v8358_v9 = vpop.f32.mrf.mxu1 }
0x1734   :  { %v4416_v30 = vpop.f32.mrf.mxu1 }
0x1735   :  { %4751 = vrot.lane.b32.xlu1 %v4416_v30, %s8907_s8 }
0x1736   :  { %v8368_v45 = vpop.f32.mrf.mxu1 }
0x173a   :  { %v4581_v31 = vpop.f32.mrf.mxu1 }
0x173b   :  { %4755 = vrot.lane.b32.xlu0 %v4581_v31, %s8917_s20 }
0x173c   :  { %v8378_v35 = vpop.f32.mrf.mxu1 }
0x173d   :  { %v9639_v35 = vrot.slane %v9483_v4, %v9223_v37 }
0x173e   :  { %v4746_v36 = vpop.f32.mrf.mxu1 }
0x173f   :  { %4759 = vrot.lane.b32.xlu0 %v4746_v36, %s8918_s21 }
0x1740   :  { %v8388_v38 = vpop.f32.mrf.mxu1 }
0x1742   :  { %v4922_v42 = vpop.f32.mrf.mxu1 }
0x1744   :  { %v8398_v43 = vpop.f32.mrf.mxu1 }
0x1745   :  { %v9643_v43 = vrot.slane %v9483_v4, %v9230_v40 }
0x1746   :  { %v5088_v44 = vpop.f32.mrf.mxu1 }
0x1747   :  { %5423 = vrot.lane.b32.xlu1 %v5088_v44, %s8907_s8 }
0x1748   :  { %v8408_v47 = vpop.f32.mrf.mxu1 }
0x1777   :  { %v5253_v50 = vpop.f32.mrf.mxu1 }
0x1778   :  { %5427 = vrot.lane.b32.xlu1 %v5253_v50, %s8917_s20  ;;  %v5575_v50 = vrot.slane %v9483_v4, %v9243_v52 }
0x1779   :  { %v8418_v51 = vpop.f32.mrf.mxu1 }
0x177b   :  { %v5418_v53 = vpop.f32.mrf.mxu1 }
0x177c   :  { %5431 = vrot.lane.b32.xlu0 %v5418_v53, %s8918_s21 }
0x177d   :  { %v8428_v54 = vpop.f32.mrf.mxu1 }
0x17a7   :  { %v4752_v55 = vpop.permute.xlu1 %4751 }
0x17a8   :  { %v4762_v57 = vsel %vm376_vm2, %v4250_v29, %v4752_v55 }
0x17ad   :  { %v4756_v56 = vpop.permute.xlu0 %4755 }
0x17ae   :  { %v4763_v58 = vsel %vm1046_vm3, %v4762_v57, %v4756_v56 }
0x17b1   :  { %v4760_v60 = vpop.permute.xlu0 %4759 }
0x17b2   :  { %v4764_v34 = vsel %vm1048_vm4, %v4763_v58, %v4760_v60 }
0x17b3   :  { %8437 = vmatprep.mubr.msk.f32.mxu0 %vm127_vm0, %v4764_v34 }
0x17b9   :  { %v5424_v61 = vpop.permute.xlu1 %5423 }
0x17ba   :  { %v5434_v59 = vsel %vm376_vm2, %v4922_v42, %v5424_v61 }
0x17ea   :  { %v5428_v33 = vpop.permute.xlu1 %5427 }
0x17eb   :  { %v5435_v62 = vsel %vm1046_vm3, %v5434_v59, %v5428_v33 }
0x17ee   :  { %v5432_v63 = vpop.permute.xlu0 %5431 }
0x17ef   :  { %v5436_v0 = vsel %vm1048_vm4, %v5435_v62, %v5432_v63 }
0x17f0   :  { %8438 = vmatmul.mubr.msk.f32.vlgmr.msra.gmra.mxu0 %vm127_vm0, %v5436_v0 }
0x18b0   :  { %v8439_v3 = vpop.f32.mrf.mxu0 }
0x18b1   :  { %v5524_v15 = vadd.f32 %v8439_v3, %v5445_v2 }
0x18b2   :  { %v5518_v6 = vpop.f32.mrf.mxu0 }
0x18b3   :  { %v5528_v7 = vadd.f32 %v5524_v15, %v9461_v1  ;;  %v5519_v8 = vadd.f32 %v5518_v6, %v5445_v2 }
0x18b5   :  { %v5527_v12 = vadd.f32 %v5519_v8, %v9458_v13  ;;  %v5532_v17 = vsel %vm127_vm0, %v5528_v7, 0.0  ;;  %v5571_v13 = vld [vmem:[#allocation11 + $0x58] sm:$0xff] }
0x18b6   :  { %5533 = vadd.xlane.f32.xlu0 %v5532_v17  ;;  %8440 = vmatprep.subr.mxu1 %v5571_v13  ;;  %v5787_v8 = vld [vmem:[#allocation7 + $0x78] sm:$0xff]  ;;  %v5786_v17 = vld [vmem:[#allocation7 + $0x70] sm:$0xff] }
0x18b7   :  { %v5529_v18 = vsel %vm127_vm0, %v5527_v12, 0.0  ;;  %8441 = vmatpush3.msra.mxu1 %v5571_v13 }
0x18b8   :  { %5530 = vadd.xlane.f32.xlu1 %v5529_v18  ;;  %8442 = vmatprep.subr.mxu1 %v5570_v28  ;;  %v5695_v18 = vld [vmem:[#allocation5 + $0x68] sm:$0xff] }
0x18b9   :  { %8443 = vmatpush3.msra.mxu1 %v5570_v28 }
0x18ba   :  { %8444 = vmatprep.subr.mxu1 %v5569_v26 }
0x18bb   :  { %8445 = vmatpush3.msra.mxu1 %v5569_v26 }
0x18bc   :  { %8446 = vmatprep.subr.mxu1 %v5568_v10 }
0x18bd   :  { %8447 = vmatpush3.msra.mxu1 %v5568_v10 }
0x18be   :  { %8462 = vmatprep.subr.mxu1 %v5787_v8 }
0x193f   :  { %v5534_v46 = vpop.xlane.xlu0 %5533 }
0x1940   :  { %v5536_v19 = vmul.f32 0.03125, %v5534_v46  ;;  %v5785_v46 = vld [vmem:[#allocation7 + $0x68] sm:$0xff] }
0x1941   :  { %v5531_v20 = vpop.xlane.xlu1 %5530 }
0x1942   :  { %v5538_v21 = vsub.f32 %v5528_v7, %v5536_v19  ;;  %v5535_v22 = vmul.f32 0.03125, %v5531_v20  ;;  %v5697_v7 = vld [vmem:[#allocation5 + $0x78] sm:$0xff]  ;;  %v5694_v19 = vld [vmem:[#allocation5 + $0x60] sm:$0xff] }
0x1943   :  { %8451 = vmatprep.subr.mxu0 %v5697_v7  ;;  %v5784_v20 = vld [vmem:[#allocation7 + $0x60] sm:$0xff] }
0x1944   :  { %v5537_v23 = vsub.f32 %v5527_v12, %v5535_v22  ;;  %v5540_v24 = vmul.f32 %v5538_v21, %v5538_v21  ;;  %v5696_v12 = vld [vmem:[#allocation5 + $0x70] sm:$0xff]  ;;  %8452 = vmatpush3.msra.mxu0 %v5697_v7 }
0x1945   :  { %8453 = vmatprep.subr.mxu0 %v5696_v12 }
0x1946   :  { %v5544_v25 = vsel %vm127_vm0, %v5540_v24, 0.0  ;;  %v5539_v27 = vmul.f32 %v5537_v23, %v5537_v23  ;;  %8454 = vmatpush3.msra.mxu0 %v5696_v12 }
0x1947   :  { %5545 = vadd.xlane.f32.xlu1 %v5544_v25  ;;  %8455 = vmatprep.subr.mxu0 %v5695_v18 }
0x1948   :  { %v5541_v1 = vsel %vm127_vm0, %v5539_v27, 0.0  ;;  %8456 = vmatpush3.msra.mxu0 %v5695_v18 }
0x1949   :  { %5542 = vadd.xlane.f32.xlu0 %v5541_v1  ;;  %8457 = vmatprep.subr.mxu0 %v5694_v19 }
0x194a   :  { %8458 = vmatpush3.msra.mxu0 %v5694_v19 }
0x19d0   :  { %v5546_v29 = vpop.xlane.xlu1 %5545 }
0x19d1   :  { %v5548_v9 = vmul.f32 0.03125, %v5546_v29 }
0x19d2   :  { %v5543_v30 = vpop.xlane.xlu0 %5542 }
0x19d3   :  { %v5550_v45 = vadd.f32 1e-05, %v5548_v9  ;;  %v5547_v31 = vmul.f32 0.03125, %v5543_v30 }
0x19d5   :  { %8724 = vrsqrt.f32 %v5550_v45  ;;  %v5549_v32 = vadd.f32 1e-05, %v5547_v31  ;;  %v5870_v31 = vld [vmem:[#allocation8 + $0x70] sm:$0xff] }
0x19d7   :  { %8726 = vrsqrt.f32 %v5549_v32  ;;  %v5869_v32 = vld [vmem:[#allocation8 + $0x68] sm:$0xff] }
0x19e2   :  { %v8725_v39 = vpop.eup %8724 }
0x19e3   :  { %v5554_v36 = vmul.f32 %v8725_v39, %v5538_v21  ;;  %v5871_v21 = vld [vmem:[#allocation8 + $0x78] sm:$0xff]  ;;  %v5868_v39 = vld [vmem:[#allocation8 + $0x60] sm:$0xff] }
0x19e4   :  { %v8727_v38 = vpop.eup %8726  ;;  %8473 = vmatprep.subr.mxu0 %v5871_v21 }
0x19e5   :  { %v5553_v42 = vmul.f32 %v8727_v38, %v5537_v23  ;;  %v5560_v44 = vmul.f32 %v9639_v35, %v5554_v36 }
0x19e7   :  { %v5559_v47 = vmul.f32 %v9639_v35, %v5553_v42  ;;  %v5566_v49 = vadd.f32 %v9643_v43, %v5560_v44 }
0x19e9   :  { %v5565_v48 = vadd.f32 %v9643_v43, %v5559_v47 }
0x19eb   :  { %8448 = vmatprep.mubr.msk.f32.mxu1 %vm127_vm0, %v5565_v48 }
0x19ec   :  { %8449 = vmatmul.mubr.msk.f32.vlgmr.msra.gmra.mxu1 %vm127_vm0, %v5566_v49 }
0x19ed   :  { %8463 = vmatpush3.msra.mxu1 %v5787_v8 }
0x19ee   :  { %8464 = vmatprep.subr.mxu1 %v5786_v17 }
0x19ef   :  { %8465 = vmatpush3.msra.mxu1 %v5786_v17 }
0x19f0   :  { %8466 = vmatprep.subr.mxu1 %v5785_v46 }
0x19f1   :  { %8467 = vmatpush3.msra.mxu1 %v5785_v46 }
0x19f2   :  { %8468 = vmatprep.subr.mxu1 %v5784_v20 }
0x19f3   :  { %8469 = vmatpush3.msra.mxu1 %v5784_v20 }
0x19f4   :  { %8484 = vmatprep.subr.mxu1 %v8912_v11 }
0x1aac   :  { %v8450_v51 = vpop.f32.mrf.mxu1 }
0x1aad   :  { %v5654_v53 = vadd.f32 %v8450_v51, %v5575_v50 }
0x1aae   :  { %v5648_v54 = vpop.f32.mrf.mxu1 }
0x1aaf   :  { %v5658_v55 = vmax.f32 %v5654_v53, 0.0  ;;  %v5649_v56 = vadd.f32 %v5648_v54, %v5575_v50 }
0x1ab1   :  { %v5660_v57 = vadd.f32 %v5658_v55, %v5566_v49  ;;  %v5657_v58 = vmax.f32 %v5649_v56, 0.0 }
0x1ab3   :  { %v5659_v60 = vadd.f32 %v5657_v58, %v5565_v48  ;;  %v5664_v34 = vsel %vm127_vm0, %v5660_v57, 0.0 }
0x1ab4   :  { %5665 = vadd.xlane.f32.xlu1 %v5664_v34 }
0x1ab5   :  { %v5661_v61 = vsel %vm127_vm0, %v5659_v60, 0.0 }
0x1ab6   :  { %5662 = vadd.xlane.f32.xlu0 %v5661_v61 }
0x1b3d   :  { %v5666_v33 = vpop.xlane.xlu1 %5665 }
0x1b3e   :  { %v5668_v59 = vmul.f32 0.03125, %v5666_v33 }
0x1b3f   :  { %v5663_v62 = vpop.xlane.xlu0 %5662 }
0x1b40   :  { %v5670_v63 = vsub.f32 %v5660_v57, %v5668_v59  ;;  %v5667_v0 = vmul.f32 0.03125, %v5663_v62 }
0x1b42   :  { %v5669_v4 = vsub.f32 %v5659_v60, %v5667_v0  ;;  %v5672_v2 = vmul.f32 %v5670_v63, %v5670_v63 }
0x1b44   :  { %v5676_v3 = vsel %vm127_vm0, %v5672_v2, 0.0  ;;  %v5671_v15 = vmul.f32 %v5669_v4, %v5669_v4 }
0x1b45   :  { %5677 = vadd.xlane.f32.xlu1 %v5676_v3 }
0x1b46   :  { %v5673_v6 = vsel %vm127_vm0, %v5671_v15, 0.0 }
0x1b47   :  { %5674 = vadd.xlane.f32.xlu0 %v5673_v6 }
0x1bce   :  { %v5678_v22 = vpop.xlane.xlu1 %5677 }
0x1bcf   :  { %v5680_v23 = vmul.f32 0.03125, %v5678_v22 }
0x1bd0   :  { %v5675_v24 = vpop.xlane.xlu0 %5674 }
0x1bd1   :  { %v5682_v25 = vadd.f32 1e-05, %v5680_v23  ;;  %v5679_v27 = vmul.f32 0.03125, %v5675_v24 }
0x1bd3   :  { %8728 = vrsqrt.f32 %v5682_v25  ;;  %v5681_v1 = vadd.f32 1e-05, %v5679_v27 }
0x1bd5   :  { %8730 = vrsqrt.f32 %v5681_v1 }
0x1be0   :  { %v8729_v13 = vpop.eup %8728 }
0x1be1   :  { %v5686_v28 = vmul.f32 %v8729_v13, %v5670_v63 }
0x1be2   :  { %v8731_v26 = vpop.eup %8730 }
0x1be3   :  { %v5685_v10 = vmul.f32 %v8731_v26, %v5669_v4  ;;  %v5688_v29 = vmul.f32 %v5686_v28, %v9639_v35 }
0x1be5   :  { %v5687_v9 = vmul.f32 %v5685_v10, %v9639_v35  ;;  %v9664_v45 = vadd.f32 %v5688_v29, %v9643_v43  ;;  %v9686_v35 = vld [vmem:[%s9880_s6 + $0x18] sm:$0xff] }
0x1be6   :  { %v5701_v42 = vrot.slane %v9686_v35, %v9028_v14  ;;  %v5875_v51 = vrot.slane %v9686_v35, %v9067_v41 }
0x1be7   :  { %v9661_v30 = vadd.f32 %v5687_v9, %v9643_v43  ;;  %v5791_v43 = vrot.slane %v9686_v35, %v9036_v16 }
0x1be9   :  { %8459 = vmatprep.mubr.msk.f32.mxu0 %vm127_vm0, %v9661_v30  ;;  %8470 = vmatprep.mubr.msk.f32.mxu1 %vm127_vm0, %v9661_v30 }
0x1bea   :  { %8460 = vmatmul.mubr.msk.f32.vlgmr.msra.gmra.mxu0 %vm127_vm0, %v9664_v45  ;;  %8471 = vmatmul.mubr.msk.f32.vlgmr.msra.gmra.mxu1 %vm127_vm0, %v9664_v45 }
0x1beb   :  { %8474 = vmatpush3.msra.mxu0 %v5871_v21  ;;  %8481 = vmatprep.mubr.msk.f32.mxu0 %vm127_vm0, %v9661_v30 }
0x1bec   :  { %8475 = vmatprep.subr.mxu0 %v5870_v31  ;;  %8486 = vmatprep.mubr.msk.f32.mxu1 %vm8913_vm1, %v8912_v11 }
0x1bed   :  { %8476 = vmatpush3.msra.mxu0 %v5870_v31 }
0x1bee   :  { %8477 = vmatprep.subr.mxu0 %v5869_v32 }
0x1bef   :  { %8478 = vmatpush3.msra.mxu0 %v5869_v32 }
0x1bf0   :  { %8479 = vmatprep.subr.mxu0 %v5868_v39 }
0x1bf1   :  { %8480 = vmatpush3.msra.mxu0 %v5868_v39 }
0x1bf2   :  { %8482 = vmatmul.mubr.msk.f32.vlgmr.msra.gmra.mxu0 %vm127_vm0, %v9664_v45  ;;  %8494 = vmatprep.subr.mxu0 %v8912_v11 }
0x1bf3   :  { %8496 = vmatprep.mubr.msk.f32.mxu0 %vm8913_vm1, %v8912_v11 }
0x1caa   :  { %v8461_v36 = vpop.f32.mrf.mxu0  ;;  %v8472_v38 = vpop.f32.mrf.mxu1 }
0x1cab   :  { %v5780_v54 = vadd.f32 %v8461_v36, %v5701_v42  ;;  %v5864_v56 = vadd.f32 %v8472_v38, %v5791_v43 }
0x1cac   :  { %v5774_v44 = vpop.f32.mrf.mxu0  ;;  %v5858_v47 = vpop.f32.mrf.mxu1 }
0x1cad   :  { %v5775_v48 = vadd.f32 %v5774_v44, %v5701_v42  ;;  %v5859_v49 = vadd.f32 %v5858_v47, %v5791_v43  ;;  %v6623_v41 = vmul.f32 0.35355338, %v5780_v54 }
0x1caf   :  { %v5951_v50 = vmul.f32 0.35355338, %v5775_v48  ;;  %6114 = vrot.lane.b32.xlu0 %v5859_v49, %s8914_s16  ;;  %8485 = vmatpush3.xpose.msk.msra.mxu1 %vm376_vm2, %v5859_v49 }
0x1cb0   :  { %8489 = vmatprep.subr.mxu1 %v8912_v11 }
0x1cb1   :  { %6112 = vrot.lane.b32.xlu1 %v5951_v50, %s8914_s16 }
0x1cb2   :  { %v8483_v14 = vpop.f32.mrf.mxu0  ;;  %8487 = vmatmul.mubr.msk.f32.vlgmr.msra.gmra.mxu1 %vm376_vm2, %v5951_v50 }
0x1cb3   :  { %v9699_v16 = vadd.f32 %v8483_v14, %v5875_v51  ;;  %6278 = vrot.lane.b32.xlu0 %v5951_v50, %s8915_s18  ;;  %8491 = vmatprep.mubr.msk.f32.mxu1 %vm8913_vm1, %v8912_v11 }
0x1cb4   :  { %v5942_v53 = vpop.f32.mrf.mxu0 }
0x1cb5   :  { %v9704_v55 = vadd.f32 %v5942_v53, %v5875_v51  ;;  %6280 = vrot.lane.b32.xlu1 %v5859_v49, %s8915_s18 }
0x1cb7   :  { %8490 = vmatpush3.msra.mxu1 %v9704_v55  ;;  %6443 = vrot.lane.b32.xlu0 %v5951_v50, %s8916_s19 }
0x1cb8   :  { %8499 = vmatprep.subr.mxu1 %v8912_v11 }
0x1cb9   :  { %6445 = vrot.lane.b32.xlu1 %v5859_v49, %s8916_s19 }
0x1cbb   :  { %6784 = vrot.lane.b32.xlu0 %v6623_v41, %s8914_s16 }
0x1cbd   :  { %6786 = vrot.lane.b32.xlu1 %v5864_v56, %s8914_s16 }
0x1cbf   :  { %6950 = vrot.lane.b32.xlu0 %v6623_v41, %s8915_s18 }
0x1cc1   :  { %6952 = vrot.lane.b32.xlu1 %v5864_v56, %s8915_s18 }
0x1cc3   :  { %7115 = vrot.lane.b32.xlu0 %v6623_v41, %s8916_s19 }
0x1cc5   :  { %7117 = vrot.lane.b32.xlu1 %v5864_v56, %s8916_s19 }
0x1d21   :  { %v6115_v57 = vpop.permute.xlu0 %6114 }
0x1d22   :  { %8495 = vmatpush3.xpose.msk.msra.mxu0 %vm376_vm2, %v6115_v57 }
0x1d23   :  { %v6113_v58 = vpop.permute.xlu1 %6112  ;;  %8504 = vmatprep.subr.mxu0 %v8912_v11 }
0x1d25   :  { %8497 = vmatmul.mubr.msk.f32.vlgmr.msra.gmra.mxu0 %vm376_vm2, %v6113_v58  ;;  %v6279_v60 = vpop.permute.xlu0 %6278 }
0x1d26   :  { %8506 = vmatprep.mubr.msk.f32.mxu0 %vm8913_vm1, %v8912_v11 }
0x1d27   :  { %v6281_v34 = vpop.permute.xlu1 %6280 }
0x1d28   :  { %8505 = vmatpush3.xpose.msk.msra.mxu0 %vm376_vm2, %v6281_v34 }
0x1d29   :  { %8514 = vmatprep.subr.mxu0 %v8912_v11  ;;  %v6444_v33 = vpop.permute.xlu0 %6443 }
0x1d2b   :  { %8507 = vmatmul.mubr.msk.f32.vlgmr.msra.gmra.mxu0 %vm376_vm2, %v6279_v60  ;;  %v6446_v61 = vpop.permute.xlu1 %6445 }
0x1d2c   :  { %8515 = vmatpush3.xpose.msk.msra.mxu0 %vm376_vm2, %v6446_v61  ;;  %8516 = vmatprep.mubr.msk.f32.mxu0 %vm8913_vm1, %v8912_v11 }
0x1d2d   :  { %8524 = vmatprep.subr.mxu0 %v8912_v11  ;;  %v6785_v62 = vpop.permute.xlu0 %6784 }
0x1d2f   :  { %8517 = vmatmul.mubr.msk.f32.vlgmr.msra.gmra.mxu0 %vm376_vm2, %v6444_v33  ;;  %v6787_v59 = vpop.permute.xlu1 %6786 }
0x1d30   :  { %8525 = vmatpush3.xpose.msk.msra.mxu0 %vm376_vm2, %v5864_v56  ;;  %8526 = vmatprep.mubr.msk.f32.mxu0 %vm8913_vm1, %v8912_v11 }
0x1d31   :  { %8534 = vmatprep.subr.mxu0 %v8912_v11  ;;  %v6951_v0 = vpop.permute.xlu0 %6950 }
0x1d33   :  { %8527 = vmatmul.mubr.msk.f32.vlgmr.msra.gmra.mxu0 %vm376_vm2, %v6623_v41  ;;  %v6953_v63 = vpop.permute.xlu1 %6952 }
0x1d34   :  { %8535 = vmatpush3.xpose.msk.msra.mxu0 %vm376_vm2, %v6787_v59  ;;  %8536 = vmatprep.mubr.msk.f32.mxu0 %vm8913_vm1, %v8912_v11 }
0x1d35   :  { %8544 = vmatprep.subr.mxu0 %v8912_v11  ;;  %v7116_v2 = vpop.permute.xlu0 %7115 }
0x1d37   :  { %8537 = vmatmul.mubr.msk.f32.vlgmr.msra.gmra.mxu0 %vm376_vm2, %v6785_v62  ;;  %v7118_v4 = vpop.permute.xlu1 %7117 }
0x1d38   :  { %8545 = vmatpush3.xpose.msk.msra.mxu0 %vm376_vm2, %v6953_v63  ;;  %8546 = vmatprep.mubr.msk.f32.mxu0 %vm8913_vm1, %v8912_v11 }
0x1d39   :  { %8554 = vmatprep.subr.mxu0 %v8912_v11 }
0x1d3b   :  { %8547 = vmatmul.mubr.msk.f32.vlgmr.msra.gmra.mxu0 %vm376_vm2, %v6951_v0 }
0x1d3c   :  { %8555 = vmatpush3.xpose.msk.msra.mxu0 %vm376_vm2, %v7118_v4  ;;  %8556 = vmatprep.mubr.msk.f32.mxu0 %vm8913_vm1, %v8912_v11 }
0x1d3f   :  { %8557 = vmatmul.mubr.msk.f32.vlgmr.msra.gmra.mxu0 %vm376_vm2, %v7116_v2 }
0x1d72   :  { %v6024_v3 = vpop.f32.mrf.mxu1 }
0x1d73   :  { %v6028_v15 = vsel %vm376_vm2, %v6024_v3, -inf }
0x1d74   :  { %6029 = vmax.xlane.f32.xlu1 %v6028_v15  ;;  %v8488_v6 = vpop.f32.mrf.mxu1 }
0x1de5   :  { %v6186_v7 = vpop.f32.mrf.mxu0 }
0x1de6   :  { %v6190_v8 = vsel %vm376_vm2, %v6186_v7, -inf }
0x1de7   :  { %6191 = vmax.xlane.f32.xlu0 %v6190_v8  ;;  %v8498_v12 = vpop.f32.mrf.mxu0 }
0x1deb   :  { %v6352_v17 = vpop.f32.mrf.mxu0 }
0x1dec   :  { %v6356_v18 = vsel %vm376_vm2, %v6352_v17, -inf }
0x1ded   :  { %6357 = vmax.xlane.f32.xlu0 %v6356_v18  ;;  %v8508_v46 = vpop.f32.mrf.mxu0 }
0x1def   :  { %v6517_v19 = vpop.f32.mrf.mxu0 }
0x1df0   :  { %v6521_v20 = vsel %vm376_vm2, %v6517_v19, -inf }
0x1df1   :  { %v8518_v21 = vpop.f32.mrf.mxu0  ;;  %6522 = vmax.xlane.f32.xlu1 %v6521_v20 }
0x1df3   :  { %v6696_v22 = vpop.f32.mrf.mxu0 }
0x1df4   :  { %v6700_v23 = vsel %vm376_vm2, %v6696_v22, -inf }
0x1df5   :  { %6701 = vmax.xlane.f32.xlu0 %v6700_v23  ;;  %v8528_v24 = vpop.f32.mrf.mxu0 }
0x1df7   :  { %v6858_v25 = vpop.f32.mrf.mxu0 }
0x1df8   :  { %v6862_v27 = vsel %vm376_vm2, %v6858_v25, -inf }
0x1df9   :  { %v8538_v1 = vpop.f32.mrf.mxu0  ;;  %6863 = vmax.xlane.f32.xlu1 %v6862_v27 }
0x1dfb   :  { %v9755_v13 = vpop.f32.mrf.mxu0 }
0x1dfc   :  { %v7028_v28 = vsel %vm376_vm2, %v9755_v13, -inf }
0x1dfd   :  { %7029 = vmax.xlane.f32.xlu0 %v7028_v28  ;;  %v8548_v26 = vpop.f32.mrf.mxu0  ;;  %v6030_v31 = vpop.xlane.xlu1 %6029 }
0x1dfe   :  { %v6031_v32 = vsub.f32 %v6024_v3, %v6030_v31 }
0x1dff   :  { %v7189_v10 = vpop.f32.mrf.mxu0 }
0x1e00   :  { %v7193_v29 = vsel %vm376_vm2, %v7189_v10, -inf  ;;  %v6032_v39 = vmul.f32 1.442695, %v6031_v32 }
0x1e01   :  { %v8558_v9 = vpop.f32.mrf.mxu0  ;;  %7194 = vmax.xlane.f32.xlu1 %v7193_v29 }
0x1e02   :  { %8732 = vpow2.f32 %v6032_v39 }
0x1e0f   :  { %v8733_v36 = vpop.eup %8732 }
0x1e10   :  { %v6034_v38 = vsel %vm376_vm2, %v8733_v36, 0.0 }
0x1e12   :  { %6367 = vrot.lane.b32.xlu1 %v9704_v55, %s8915_s18 }
0x1e13   :  { %6202 = vrot.lane.b32.xlu0 %v9704_v55, %s8914_s16 }
0x1e16   :  { %6532 = vrot.lane.b32.xlu1 %v9704_v55, %s8916_s19 }
0x1e32   :  { %6035 = vadd.xlane.f32.xlu0 %v6034_v38 }
0x1e70   :  { %v6192_v42 = vpop.xlane.xlu0 %6191 }
0x1e71   :  { %v6193_v43 = vsub.f32 %v6186_v7, %v6192_v42 }
0x1e73   :  { %v6194_v44 = vmul.f32 1.442695, %v6193_v43 }
0x1e75   :  { %8734 = vpow2.f32 %v6194_v44 }
0x1e76   :  { %v6358_v47 = vpop.xlane.xlu0 %6357 }
0x1e77   :  { %v6359_v48 = vsub.f32 %v6352_v17, %v6358_v47 }
0x1e79   :  { %v6360_v49 = vmul.f32 1.442695, %v6359_v48 }
0x1e7a   :  { %v6523_v50 = vpop.xlane.xlu1 %6522 }
0x1e7b   :  { %8736 = vpow2.f32 %v6360_v49  ;;  %v6524_v51 = vsub.f32 %v6517_v19, %v6523_v50 }
0x1e7d   :  { %v6525_v14 = vmul.f32 1.442695, %v6524_v51 }
0x1e7e   :  { %v6702_v53 = vpop.xlane.xlu0 %6701 }
0x1e7f   :  { %8738 = vpow2.f32 %v6525_v14  ;;  %v6703_v54 = vsub.f32 %v6696_v22, %v6702_v53 }
0x1e81   :  { %v6704_v55 = vmul.f32 1.442695, %v6703_v54 }
0x1e82   :  { %v8735_v41 = vpop.eup %8734  ;;  %v6864_v56 = vpop.xlane.xlu1 %6863 }
0x1e83   :  { %8740 = vpow2.f32 %v6704_v55  ;;  %v6865_v57 = vsub.f32 %v6858_v25, %v6864_v56  ;;  %v6196_v58 = vsel %vm376_vm2, %v8735_v41, 0.0 }
0x1e84   :  { %6197 = vadd.xlane.f32.xlu1 %v6196_v58  ;;  %v7298_v58 = vld [vmem:[#allocation10 + $0x70] sm:$0xff] }
0x1e85   :  { %v6866_v60 = vmul.f32 1.442695, %v6865_v57  ;;  %v7299_v57 = vld [vmem:[#allocation10 + $0x78] sm:$0xff] }
0x1e86   :  { %v7030_v8 = vpop.xlane.xlu0 %7029  ;;  %8564 = vmatprep.subr.mxu0 %v7299_v57 }
0x1e87   :  { %8742 = vpow2.f32 %v6866_v60  ;;  %v7031_v12 = vsub.f32 %v9755_v13, %v7030_v8  ;;  %8565 = vmatpush3.msra.mxu0 %v7299_v57 }
0x1e88   :  { %v8737_v34 = vpop.eup %8736  ;;  %8566 = vmatprep.subr.mxu0 %v7298_v58 }
0x1e89   :  { %v6362_v61 = vsel %vm376_vm2, %v8737_v34, 0.0  ;;  %v7032_v17 = vmul.f32 1.442695, %v7031_v12  ;;  %8567 = vmatpush3.msra.mxu0 %v7298_v58 }
0x1e8a   :  { %6363 = vadd.xlane.f32.xlu0 %v6362_v61  ;;  %v7195_v33 = vpop.xlane.xlu1 %7194  ;;  %v6203_v18 = vpop.permute.xlu0 %6202 }
0x1e8b   :  { %v7196_v59 = vsub.f32 %v7189_v10, %v7195_v33 }
0x1e8c   :  { %v8739_v62 = vpop.eup %8738 }
0x1e8d   :  { %v7197_v63 = vmul.f32 1.442695, %v7196_v59  ;;  %v6527_v0 = vsel %vm376_vm2, %v8739_v62, 0.0 }
0x1e8e   :  { %6528 = vadd.xlane.f32.xlu1 %v6527_v0  ;;  %v6368_v23 = vpop.permute.xlu1 %6367  ;;  %v7297_v0 = vld [vmem:[#allocation10 + $0x68] sm:$0xff] }
0x1e8f   :  { %8744 = vpow2.f32 %v7197_v63  ;;  %8568 = vmatprep.subr.mxu0 %v7297_v0 }
0x1e90   :  { %v8741_v4 = vpop.eup %8740  ;;  %8746 = vpow2.f32 %v7032_v17  ;;  %8569 = vmatpush3.msra.mxu0 %v7297_v0 }
0x1e91   :  { %v6706_v2 = vsel %vm376_vm2, %v8741_v4, 0.0 }
0x1e92   :  { %6707 = vadd.xlane.f32.xlu0 %v6706_v2  ;;  %v6533_v24 = vpop.permute.xlu1 %6532 }
0x1e94   :  { %v9771_v3 = vpop.eup %8742 }
0x1e95   :  { %v6868_v15 = vsel %vm376_vm2, %v9771_v3, 0.0 }
0x1e96   :  { %6869 = vadd.xlane.f32.xlu1 %v6868_v15 }
0x1e9c   :  { %v9775_v6 = vpop.eup %8744 }
0x1e9d   :  { %v7199_v7 = vsel %vm376_vm2, %v9775_v6, 0.0  ;;  %v8747_v19 = vpop.eup %8746 }
0x1e9e   :  { %7200 = vadd.xlane.f32.xlu1 %v7199_v7  ;;  %v7034_v20 = vsel %vm376_vm2, %v8747_v19, 0.0 }
0x1ea8   :  { %6874 = vrot.lane.b32.xlu0 %v9699_v16, %s8914_s16 }
0x1eaf   :  { %7039 = vrot.lane.b32.xlu1 %v9699_v16, %s8915_s18 }
0x1ebb   :  { %v6036_v46 = vpop.xlane.xlu0 %6035 }
0x1ebc   :  { %8748 = vrcp.f32 %v6036_v46 }
0x1ec7   :  { %7035 = vadd.xlane.f32.xlu0 %v7034_v20 }
0x1ec9   :  { %v8749_v21 = vpop.eup %8748 }
0x1eca   :  { %v6038_v22 = vmul.f32 %v8749_v21, %v8733_v36 }
0x1ecc   :  { %8492 = vmatmul.mubr.msk.f32.vlgmr.msra.gmra.mxu1 %vm376_vm2, %v6038_v22 }
0x1ecd   :  { %8500 = vmatpush3.msra.mxu1 %v6203_v18  ;;  %8501 = vmatprep.mubr.msk.f32.mxu1 %vm8913_vm1, %v8912_v11 }
0x1ece   :  { %8509 = vmatprep.subr.mxu1 %v8912_v11 }
0x1edd   :  { %7204 = vrot.lane.b32.xlu0 %v9699_v16, %s8916_s19 }
0x1f0d   :  { %v6198_v25 = vpop.xlane.xlu1 %6197 }
0x1f0e   :  { %8750 = vrcp.f32 %v6198_v25  ;;  %v7303_v25 = vrot.slane %v9686_v35, %v9212_v5 }
0x1f13   :  { %v6364_v27 = vpop.xlane.xlu0 %6363 }
0x1f14   :  { %8752 = vrcp.f32 %v6364_v27 }
0x1f17   :  { %v6529_v1 = vpop.xlane.xlu1 %6528 }
0x1f18   :  { %8754 = vrcp.f32 %v6529_v1 }
0x1f1b   :  { %v8751_v13 = vpop.eup %8750  ;;  %v6708_v28 = vpop.xlane.xlu0 %6707 }
0x1f1c   :  { %8756 = vrcp.f32 %v6708_v28  ;;  %v6200_v26 = vmul.f32 %v8751_v13, %v8735_v41 }
0x1f1e   :  { %8502 = vmatmul.mubr.msk.f32.vlgmr.msra.gmra.mxu1 %vm376_vm2, %v6200_v26 }
0x1f1f   :  { %8510 = vmatpush3.msra.mxu1 %v6368_v23  ;;  %v6870_v10 = vpop.xlane.xlu1 %6869  ;;  %8511 = vmatprep.mubr.msk.f32.mxu1 %vm8913_vm1, %v8912_v11  ;;  %v6875_v42 = vpop.permute.xlu0 %6874 }
0x1f20   :  { %8758 = vrcp.f32 %v6870_v10  ;;  %8519 = vmatprep.subr.mxu1 %v8912_v11 }
0x1f21   :  { %v8753_v29 = vpop.eup %8752 }
0x1f22   :  { %v6366_v9 = vmul.f32 %v8753_v29, %v8737_v34 }
0x1f24   :  { %8512 = vmatmul.mubr.msk.f32.vlgmr.msra.gmra.mxu1 %vm376_vm2, %v6366_v9 }
0x1f25   :  { %v8755_v31 = vpop.eup %8754  ;;  %8520 = vmatpush3.msra.mxu1 %v6533_v24  ;;  %8521 = vmatprep.mubr.msk.f32.mxu1 %vm8913_vm1, %v8912_v11 }
0x1f26   :  { %8529 = vmatprep.subr.mxu1 %v8912_v11  ;;  %v6531_v32 = vmul.f32 %v8755_v31, %v8739_v62 }
0x1f27   :  { %v7201_v36 = vpop.xlane.xlu1 %7200 }
0x1f28   :  { %8522 = vmatmul.mubr.msk.f32.vlgmr.msra.gmra.mxu1 %vm376_vm2, %v6531_v32 }
0x1f29   :  { %v8757_v39 = vpop.eup %8756  ;;  %8530 = vmatpush3.msra.mxu1 %v9699_v16  ;;  %8531 = vmatprep.mubr.msk.f32.mxu1 %vm8913_vm1, %v8912_v11 }
0x1f2a   :  { %8539 = vmatprep.subr.mxu1 %v8912_v11  ;;  %v6710_v38 = vmul.f32 %v8757_v39, %v8741_v4  ;;  %v7296_v4 = vld [vmem:[#allocation10 + $0x60] sm:$0xff] }
0x1f2b   :  { %v7040_v16 = vpop.permute.xlu1 %7039  ;;  %8570 = vmatprep.subr.mxu0 %v7296_v4 }
0x1f2c   :  { %8532 = vmatmul.mubr.msk.f32.vlgmr.msra.gmra.mxu1 %vm376_vm2, %v6710_v38  ;;  %8571 = vmatpush3.msra.mxu0 %v7296_v4 }
0x1f2d   :  { %v8759_v43 = vpop.eup %8758  ;;  %8540 = vmatpush3.msra.mxu1 %v6875_v42  ;;  %8541 = vmatprep.mubr.msk.f32.mxu1 %vm8913_vm1, %v8912_v11 }
0x1f2e   :  { %8549 = vmatprep.subr.mxu1 %v8912_v11  ;;  %v6872_v44 = vmul.f32 %v8759_v43, %v9771_v3  ;;  %8586 = vmatprep.subr.mxu0 %v8912_v11 }
0x1f30   :  { %8542 = vmatmul.mubr.msk.f32.vlgmr.msra.gmra.mxu1 %vm376_vm2, %v6872_v44 }
0x1f31   :  { %8550 = vmatpush3.msra.mxu1 %v7040_v16  ;;  %8551 = vmatprep.mubr.msk.f32.mxu1 %vm8913_vm1, %v8912_v11  ;;  %v7428_v16 = vld [vmem:[#allocation11 + $0x70] sm:$0xff] }
0x1f32   :  { %8559 = vmatprep.subr.mxu1 %v8912_v11 }
0x1f50   :  { %v7036_v47 = vpop.xlane.xlu0 %7035 }
0x1f51   :  { %8760 = vrcp.f32 %v7036_v47  ;;  %v7427_v47 = vld [vmem:[#allocation11 + $0x68] sm:$0xff] }
0x1f52   :  { %8762 = vrcp.f32 %v7201_v36 }
0x1f54   :  { %v7205_v51 = vpop.permute.xlu0 %7204 }
0x1f5e   :  { %v8761_v48 = vpop.eup %8760 }
0x1f5f   :  { %v7038_v49 = vmul.f32 %v8761_v48, %v8747_v19  ;;  %v8763_v50 = vpop.eup %8762  ;;  %v7426_v48 = vld [vmem:[#allocation11 + $0x60] sm:$0xff] }
0x1f60   :  { %v7203_v14 = vmul.f32 %v8763_v50, %v9775_v6 }
0x1f61   :  { %8552 = vmatmul.mubr.msk.f32.vlgmr.msra.gmra.mxu1 %vm376_vm2, %v7038_v49 }
0x1f62   :  { %8560 = vmatpush3.msra.mxu1 %v7205_v51  ;;  %8561 = vmatprep.mubr.msk.f32.mxu1 %vm8913_vm1, %v8912_v11 }
0x1f65   :  { %8562 = vmatmul.mubr.msk.f32.vlgmr.msra.gmra.mxu1 %vm376_vm2, %v7203_v14 }
0x1f8c   :  { %v6108_v53 = vpop.f32.mrf.mxu1 }
0x1f8e   :  { %v8493_v54 = vpop.f32.mrf.mxu1 }
0x1fde   :  { %v6274_v55 = vpop.f32.mrf.mxu1 }
0x1fdf   :  { %6609 = vrot.lane.b32.xlu1 %v6274_v55, %s8907_s8 }
0x1fe0   :  { %v8503_v41 = vpop.f32.mrf.mxu1 }
0x1fe1   :  { %v7416_v41 = vrot.slane %v9686_v35, %v9223_v37 }
0x1fe4   :  { %v6439_v56 = vpop.f32.mrf.mxu1 }
0x1fe5   :  { %6613 = vrot.lane.b32.xlu0 %v6439_v56, %s8917_s20 }
0x1fe6   :  { %v8513_v60 = vpop.f32.mrf.mxu1 }
0x1fe7   :  { %v7422_v60 = vrot.slane %v9686_v35, %v9230_v40 }
0x1fe8   :  { %v6604_v34 = vpop.f32.mrf.mxu1 }
0x1fe9   :  { %6617 = vrot.lane.b32.xlu0 %v6604_v34, %s8918_s21 }
0x1fea   :  { %v8523_v61 = vpop.f32.mrf.mxu1 }
0x1fec   :  { %v6780_v33 = vpop.f32.mrf.mxu1 }
0x1fee   :  { %v8533_v59 = vpop.f32.mrf.mxu1 }
0x1ff0   :  { %v6946_v62 = vpop.f32.mrf.mxu1 }
0x1ff1   :  { %7281 = vrot.lane.b32.xlu1 %v6946_v62, %s8907_s8  ;;  %v7433_v62 = vrot.slane %v9686_v35, %v9243_v52 }
0x1ff2   :  { %v8543_v63 = vpop.f32.mrf.mxu1 }
0x2021   :  { %v7111_v2 = vpop.f32.mrf.mxu1 }
0x2022   :  { %7285 = vrot.lane.b32.xlu1 %v7111_v2, %s8917_s20 }
0x2023   :  { %v8553_v3 = vpop.f32.mrf.mxu1 }
0x2025   :  { %v7276_v15 = vpop.f32.mrf.mxu1 }
0x2026   :  { %7289 = vrot.lane.b32.xlu0 %v7276_v15, %s8918_s21 }
0x2027   :  { %v8563_v6 = vpop.f32.mrf.mxu1 }
0x2051   :  { %v6610_v7 = vpop.permute.xlu1 %6609 }
0x2052   :  { %v6620_v12 = vsel %vm376_vm2, %v6108_v53, %v6610_v7 }
0x2057   :  { %v6614_v8 = vpop.permute.xlu0 %6613 }
0x2058   :  { %v6621_v17 = vsel %vm1046_vm3, %v6620_v12, %v6614_v8 }
0x205b   :  { %v6618_v18 = vpop.permute.xlu0 %6617 }
0x205c   :  { %v6622_v46 = vsel %vm1048_vm4, %v6621_v17, %v6618_v18 }
0x205d   :  { %8572 = vmatprep.mubr.msk.f32.mxu0 %vm127_vm0, %v6622_v46 }
0x2063   :  { %v7282_v19 = vpop.permute.xlu1 %7281 }
0x2064   :  { %v7292_v21 = vsel %vm376_vm2, %v6780_v33, %v7282_v19 }
0x2094   :  { %v7286_v20 = vpop.permute.xlu1 %7285 }
0x2095   :  { %v7293_v22 = vsel %vm1046_vm3, %v7292_v21, %v7286_v20 }
0x2098   :  { %v7290_v23 = vpop.permute.xlu0 %7289 }
0x2099   :  { %v7294_v24 = vsel %vm1048_vm4, %v7293_v22, %v7290_v23  ;;  %v7554_v22 = vld [vmem:[%s9881_s7 + $0x18] sm:$0xff]  ;;  %v7553_v23 = vld [vmem:[%s9881_s7 + $0x10] sm:$0xff] }
0x209a   :  { %8573 = vmatmul.mubr.msk.f32.vlgmr.msra.gmra.mxu0 %vm127_vm0, %v7294_v24  ;;  %v7552_v24 = vld [vmem:[%s9881_s7 + $0x8] sm:$0xff] }
0x209b   :  { %8594 = vmatprep.mubr.msk.f32.mxu0 %vm8913_vm1, %v8912_v11  ;;  %8587 = vmatpush3.msra.mxu0 %v7554_v22 }
0x209c   :  { %8588 = vmatprep.subr.mxu0 %v8912_v11 }
0x209d   :  { %8589 = vmatpush3.msra.mxu0 %v7553_v23 }
0x209e   :  { %8590 = vmatprep.subr.mxu0 %v8912_v11 }
0x209f   :  { %8591 = vmatpush3.msra.mxu0 %v7552_v24 }
0x20a0   :  { %8592 = vmatprep.subr.mxu0 %v8912_v11  ;;  %v7790_v11 = vld [vmem:[#allocation2] ss:$0 sm:$0xff] }
0x215a   :  { %v8574_v27 = vpop.f32.mrf.mxu0 }
0x215b   :  { %v7382_v1 = vadd.f32 %v8574_v27, %v7303_v25 }
0x215c   :  { %v7376_v13 = vpop.f32.mrf.mxu0 }
0x215d   :  { %v7386_v28 = vadd.f32 %v7382_v1, %v9664_v45  ;;  %v7377_v26 = vadd.f32 %v7376_v13, %v7303_v25  ;;  %v7551_v25 = vld [vmem:[%s9881_s7] sm:$0xff] }
0x215e   :  { %8593 = vmatpush3.msra.mxu0 %v7551_v25 }
0x215f   :  { %v7385_v10 = vadd.f32 %v7377_v26, %v9661_v30  ;;  %v7390_v29 = vsel %vm127_vm0, %v7386_v28, 0.0  ;;  %v7429_v30 = vld [vmem:[#allocation11 + $0x78] sm:$0xff] }
0x2160   :  { %7391 = vadd.xlane.f32.xlu0 %v7390_v29  ;;  %8575 = vmatprep.subr.mxu1 %v7429_v30 }
0x2161   :  { %v7387_v9 = vsel %vm127_vm0, %v7385_v10, 0.0  ;;  %8576 = vmatpush3.msra.mxu1 %v7429_v30 }
0x2162   :  { %7388 = vadd.xlane.f32.xlu1 %v7387_v9  ;;  %8577 = vmatprep.subr.mxu1 %v7428_v16 }
0x2163   :  { %8578 = vmatpush3.msra.mxu1 %v7428_v16 }
0x2164   :  { %8579 = vmatprep.subr.mxu1 %v7427_v47 }
0x2165   :  { %8580 = vmatpush3.msra.mxu1 %v7427_v47 }
0x2166   :  { %8581 = vmatprep.subr.mxu1 %v7426_v48 }
0x2167   :  { %8582 = vmatpush3.msra.mxu1 %v7426_v48 }
0x21e9   :  { %v7392_v31 = vpop.xlane.xlu0 %7391 }
0x21ea   :  { %v7394_v32 = vmul.f32 0.03125, %v7392_v31 }
0x21eb   :  { %v7389_v39 = vpop.xlane.xlu1 %7388 }
0x21ec   :  { %v7396_v36 = vsub.f32 %v7386_v28, %v7394_v32  ;;  %v7393_v38 = vmul.f32 0.03125, %v7389_v39 }
0x21ee   :  { %v7395_v5 = vsub.f32 %v7385_v10, %v7393_v38  ;;  %v7398_v42 = vmul.f32 %v7396_v36, %v7396_v36 }
0x21f0   :  { %v7402_v43 = vsel %vm127_vm0, %v7398_v42, 0.0  ;;  %v7397_v44 = vmul.f32 %v7395_v5, %v7395_v5 }
0x21f1   :  { %7403 = vadd.xlane.f32.xlu1 %v7402_v43 }
0x21f2   :  { %v7399_v45 = vsel %vm127_vm0, %v7397_v44, 0.0 }
0x21f3   :  { %7400 = vadd.xlane.f32.xlu0 %v7399_v45 }
0x227a   :  { %v7404_v49 = vpop.xlane.xlu1 %7403 }
0x227b   :  { %v7406_v50 = vmul.f32 0.03125, %v7404_v49 }
0x227c   :  { %v7401_v51 = vpop.xlane.xlu0 %7400 }
0x227d   :  { %v7408_v14 = vadd.f32 1e-05, %v7406_v50  ;;  %v7405_v53 = vmul.f32 0.03125, %v7401_v51 }
0x227f   :  { %8764 = vrsqrt.f32 %v7408_v14  ;;  %v7407_v54 = vadd.f32 1e-05, %v7405_v53 }
0x2281   :  { %8766 = vrsqrt.f32 %v7407_v54 }
0x228c   :  { %v8765_v55 = vpop.eup %8764 }
0x228d   :  { %v7412_v56 = vmul.f32 %v8765_v55, %v7396_v36 }
0x228e   :  { %v8767_v57 = vpop.eup %8766 }
0x228f   :  { %v7411_v58 = vmul.f32 %v8767_v57, %v7395_v5  ;;  %v7418_v34 = vmul.f32 %v7416_v41, %v7412_v56 }
0x2291   :  { %v7417_v61 = vmul.f32 %v7416_v41, %v7411_v58  ;;  %v7424_v59 = vadd.f32 %v7422_v60, %v7418_v34 }
0x2293   :  { %v7423_v33 = vadd.f32 %v7422_v60, %v7417_v61 }
0x2295   :  { %8583 = vmatprep.mubr.msk.f32.mxu1 %vm127_vm0, %v7423_v33 }
0x2296   :  { %8584 = vmatmul.mubr.msk.f32.vlgmr.msra.gmra.mxu1 %vm127_vm0, %v7424_v59 }
0x2356   :  { %v8585_v63 = vpop.f32.mrf.mxu1 }
0x2357   :  { %v7512_v0 = vadd.f32 %v8585_v63, %v7433_v62 }
0x2358   :  { %v7506_v37 = vpop.f32.mrf.mxu1 }
0x2359   :  { %v7516_v4 = vmax.f32 %v7512_v0, 0.0  ;;  %v7507_v2 = vadd.f32 %v7506_v37, %v7433_v62 }
0x235b   :  { %v7518_v3 = vadd.f32 %v7516_v4, %v7424_v59  ;;  %v7515_v15 = vmax.f32 %v7507_v2, 0.0 }
0x235d   :  { %v7517_v6 = vadd.f32 %v7515_v15, %v7423_v33  ;;  %v7522_v40 = vsel %vm127_vm0, %v7518_v3, 0.0 }
0x235e   :  { %7523 = vadd.xlane.f32.xlu1 %v7522_v40 }
0x235f   :  { %v7519_v7 = vsel %vm127_vm0, %v7517_v6, 0.0 }
0x2360   :  { %7520 = vadd.xlane.f32.xlu0 %v7519_v7 }
0x23e7   :  { %v7524_v8 = vpop.xlane.xlu1 %7523 }
0x23e8   :  { %v7526_v12 = vmul.f32 0.03125, %v7524_v8 }
0x23e9   :  { %v7521_v17 = vpop.xlane.xlu0 %7520 }
0x23ea   :  { %v7528_v18 = vsub.f32 %v7518_v3, %v7526_v12  ;;  %v7525_v46 = vmul.f32 0.03125, %v7521_v17 }
0x23ec   :  { %v7527_v52 = vsub.f32 %v7517_v6, %v7525_v46  ;;  %v7530_v35 = vmul.f32 %v7528_v18, %v7528_v18 }
0x23ee   :  { %v7534_v19 = vsel %vm127_vm0, %v7530_v35, 0.0  ;;  %v7529_v20 = vmul.f32 %v7527_v52, %v7527_v52 }
0x23ef   :  { %7535 = vadd.xlane.f32.xlu1 %v7534_v19 }
0x23f0   :  { %v7531_v21 = vsel %vm127_vm0, %v7529_v20, 0.0 }
0x23f1   :  { %7532 = vadd.xlane.f32.xlu0 %v7531_v21 }
0x2478   :  { %v7536_v27 = vpop.xlane.xlu1 %7535 }
0x2479   :  { %v7538_v1 = vmul.f32 0.03125, %v7536_v27 }
0x247a   :  { %v7533_v13 = vpop.xlane.xlu0 %7532 }
0x247b   :  { %v7540_v28 = vadd.f32 1e-05, %v7538_v1  ;;  %v7537_v26 = vmul.f32 0.03125, %v7533_v13 }
0x247d   :  { %8768 = vrsqrt.f32 %v7540_v28  ;;  %v7539_v10 = vadd.f32 1e-05, %v7537_v26 }
0x247f   :  { %8770 = vrsqrt.f32 %v7539_v10 }
0x248a   :  { %v8769_v29 = vpop.eup %8768 }
0x248b   :  { %v7544_v9 = vmul.f32 %v8769_v29, %v7528_v18 }
0x248c   :  { %v8771_v31 = vpop.eup %8770 }
0x248d   :  { %v7543_v32 = vmul.f32 %v8771_v31, %v7527_v52  ;;  %v7546_v39 = vmul.f32 %v7544_v9, %v7416_v41 }
0x248f   :  { %v7545_v36 = vmul.f32 %v7543_v32, %v7416_v41  ;;  %v7548_v5 = vadd.f32 %v7546_v39, %v7422_v60 }
0x2491   :  { %v7547_v38 = vadd.f32 %v7545_v36, %v7422_v60 }
0x2493   :  { %v7549_v42 = vadd.f32 %v7548_v5, %v7547_v38 }
0x2495   :  { %v7550_v43 = vmul.f32 0.5, %v7549_v42 }
0x2497   :  { %8595 = vmatmul.mubr.msk.f32.vlgmr.msra.gmra.mxu0 %vm127_vm0, %v7550_v43 }
0x2557   :  { %v7631_v44 = vpop.f32.mrf.mxu0 }
0x2558   :  { %v7632_v45 = vadd.f32 %v7790_v11, %v7631_v44 }
0x2559   :  { %v8596_v30 = vpop.f32.mrf.mxu0 }
0x255a   :  { %v7792_v16 = vmul.f32 -1.442695, %v7632_v45 }
0x255c   :  { %8772 = vpow2.f32 %v7792_v16 }
0x2569   :  { %v8773_v47 = vpop.eup %8772 }
0x256a   :  { %v7638_v48 = vadd.f32 1.0, %v8773_v47 }
0x256c   :  { %8774 = vrcp.f32 %v7638_v48 }
0x2579   :  { %v8775_v49 = vpop.eup %8774 }
0x257a   :  { %7642 = vst.msk [vmem:[%s9883_s9] sm:$0xff] %vm7641_vm5, %v8775_v49 }
0x257b   :  { %7647 = vsyncpa [#allocation4], 1 }
0x257c   :  { %7648 = vsyncpa [#allocation6], 1 }
0x257d   :  { %7649 = vsyncpa [#allocation9], 1 }
0x257e   :  { %7650 = vsyncpa [#allocation12], 1 }

</bundles_post_ra>
